<compile_context>
chip_gen: v6e
topology: v6e:2x2x1
jax: 0.10.0
libtpu: 0.0.40
codegen_flags: <defaults>
</compile_context>

<pallas_src>
import functools

import jax
import jax.numpy as jnp
from jax import lax
from jax.experimental import pallas as pl
from jax.experimental.pallas import tpu as pltpu


# ---------------------------------------------------------------------------
# tile pickers
# ---------------------------------------------------------------------------
def _pick_tile_h(H, W, Cin, Cout, kh, kw,
                 budget_bytes=12 * 1024 * 1024, max_th=32):
    """Largest row tile TH (divides H) with (8,128)-legal blocks under budget."""
    per_elem = 4 * (2 * Cin + 8 * kh * kw * Cout)  # rough VMEM bytes per x1 pixel
    aligned = []
    for th in range(1, min(H, max_th) + 1):
        if H % th:
            continue
        tm = th * W
        if th == H or (tm % 128 == 0 and (th * kh) % 8 == 0):
            aligned.append(th)
    for th in sorted(aligned, reverse=True):
        if per_elem * th * W <= budget_bytes:
            return th
    if aligned:
        return aligned[0]          # smallest aligned tile
    return H                       # full-extent blocks are always shape-legal


def _pick_tile_m(HW, Cin, R, budget_bytes=12 * 1024 * 1024):
    per_elem = 4 * (2 * Cin + 3 * R)
    cands = [d for d in range(128, HW + 1, 128) if HW % d == 0]
    for tm in sorted(cands, reverse=True):
        if per_elem * tm <= budget_bytes:
            return tm
    if cands:
        return cands[0]
    return HW


# ---------------------------------------------------------------------------
# fused kernel: conv-transpose matmul + kxk interleave + residual add
# ---------------------------------------------------------------------------
def _fused_kernel(x_ref, wt_ref, x2_ref, o_ref, c_ref, *, cout, kh, kw, th, w):
    """
    x_ref  : (1, Cin, TH*W)          NCHW rows of x1 (lane index = i*W + j)
    wt_ref : (kw*kh*Cout, Cin)       weight, rows ordered (kj, ki, co); resident
    x2_ref : (1, Cout, TH*kh, W*kw)  matching NCHW slab of x2
    o_ref  : (1, Cout, TH*kh, W*kw)  NCHW output slab
    c_ref  : (kw*TH*W, kh*Cout)      VMEM scratch used to riffle the kj planes
    """
    w2 = w * kw
    khc = kh * cout
    tm = th * w

    x = x_ref[0]                                                      # (Cin, TM)
    z = jnp.dot(wt_ref[...], x, preferred_element_type=jnp.float32)   # (kw*khc, TM)

    # W-direction interleave: put the pixel index on sublanes via a 2-D
    # transpose, then riffle the kj planes with native sublane-strided stores.
    for kj in range(kw):
        plane = z[kj * khc:(kj + 1) * khc, :]            # (khc, TM)
        c_ref[pl.ds(kj, tm, kw), :] = plane.T            # scratch rows kw*m + kj

    d = c_ref[...].T         # (khc, kw*TM): row = ki*Cout + co, lane = i*W2 + w2

    # H-direction interleave + residual add, written row by row (static unroll).
    for ki in range(kh):
        dk = d[ki * cout:(ki + 1) * cout, :]             # (Cout, TH*W2)
        for i in range(th):
            h2 = i * kh + ki
            row = dk[:, i * w2:(i + 1) * w2]             # (Cout, W2)
            o_ref[0, :, h2, :] = (
                row + x2_ref[0, :, h2, :].astype(jnp.float32)
            ).astype(o_ref.dtype)


def _fused_forward(x1, x2, weight):
    N, Cin, H, W = x1.shape
    _, Cout, kh, kw = weight.shape
    H2, W2 = x2.shape[2], x2.shape[3]
    assert H2 == H * kh and W2 == W * kw
    out_dtype = jnp.result_type(x1.dtype, weight.dtype, x2.dtype)

    TH = _pick_tile_h(H, W, Cin, Cout, kh, kw)
    TM = TH * W
    R = kw * kh * Cout

    x1v = x1.reshape(N, Cin, H * W)                                 # free view
    wt = jnp.transpose(weight, (3, 2, 1, 0)).reshape(R, Cin)        # rows (kj, ki, co)

    kernel = functools.partial(_fused_kernel, cout=Cout, kh=kh, kw=kw, th=TH, w=W)

    flops = 2 * N * H * W * Cin * R + N * Cout * H2 * W2
    bytes_accessed = int(x1.nbytes + wt.size * wt.dtype.itemsize + x2.nbytes
                         + N * Cout * H2 * W2 * jnp.dtype(out_dtype).itemsize)

    return pl.pallas_call(
        kernel,
        out_shape=jax.ShapeDtypeStruct((N, Cout, H2, W2), out_dtype),
        grid_spec=pltpu.PrefetchScalarGridSpec(
            num_scalar_prefetch=0,
            grid=(N, H // TH),
            in_specs=[
                pl.BlockSpec((1, Cin, TM), lambda n, t: (n, 0, t)),
                pl.BlockSpec((R, Cin), lambda n, t: (0, 0)),        # resident weight
                pl.BlockSpec((1, Cout, TH * kh, W2), lambda n, t: (n, 0, t, 0)),
            ],
            out_specs=pl.BlockSpec((1, Cout, TH * kh, W2), lambda n, t: (n, 0, t, 0)),
            scratch_shapes=[pltpu.VMEM((kw * TM, kh * Cout), jnp.float32)],
        ),
        compiler_params=pltpu.CompilerParams(
            dimension_semantics=("parallel", "parallel"),
            vmem_limit_bytes=48 * 1024 * 1024,
        ),
        cost_estimate=pl.CostEstimate(flops=flops, transcendentals=0,
                                      bytes_accessed=bytes_accessed),
    )(x1v, wt, x2)


# ---------------------------------------------------------------------------
# fallback: tiled matmul kernel + XLA epilogue (also handles pad/crop case)
# ---------------------------------------------------------------------------
def _matmul_kernel(x_ref, wt_ref, o_ref):
    o_ref[0] = jnp.dot(wt_ref[...], x_ref[0],
                       preferred_element_type=jnp.float32).astype(o_ref.dtype)


def _fallback_forward(x1, x2, weight):
    N, Cin, H, W = x1.shape
    _, Cout, kh, kw = weight.shape
    H2, W2 = x2.shape[2], x2.shape[3]
    out_dtype = jnp.result_type(x1.dtype, weight.dtype, x2.dtype)

    R = Cout * kh * kw
    HW = H * W
    TM = _pick_tile_m(HW, Cin, R)

    x1v = x1.reshape(N, Cin, HW)                                    # free view
    wt = jnp.transpose(weight, (1, 2, 3, 0)).reshape(R, Cin)        # rows (co, ki, kj)

    z = pl.pallas_call(
        _matmul_kernel,
        out_shape=jax.ShapeDtypeStruct((N, R, HW), jnp.float32),
        grid_spec=pltpu.PrefetchScalarGridSpec(
            num_scalar_prefetch=0,
            grid=(N, HW // TM),
            in_specs=[
                pl.BlockSpec((1, Cin, TM), lambda n, t: (n, 0, t)),
                pl.BlockSpec((R, Cin), lambda n, t: (0, 0)),
            ],
            out_specs=pl.BlockSpec((1, R, TM), lambda n, t: (n, 0, t)),
        ),
        compiler_params=pltpu.CompilerParams(
            dimension_semantics=("parallel", "parallel"),
            vmem_limit_bytes=48 * 1024 * 1024,
        ),
    )(x1v, wt)

    # glue (XLA): scatter the kxk deposits, pad/crop like F.pad, add x2.
    y = z.reshape(N, Cout, kh, kw, H, W)
    y = jnp.transpose(y, (0, 1, 4, 2, 5, 3)).reshape(N, Cout, H * kh, W * kw)
    diffY = H2 - H * kh
    diffX = W2 - W * kw
    y = lax.pad(y, jnp.array(0.0, y.dtype),
                [(0, 0, 0), (0, 0, 0),
                 (diffY // 2, diffY - diffY // 2, 0),
                 (diffX // 2, diffX - diffX // 2, 0)])
    return (y + x2.astype(jnp.float32)).astype(out_dtype)


_fallback_forward_jit = jax.jit(_fallback_forward)


# ---------------------------------------------------------------------------
# public forward
# ---------------------------------------------------------------------------
def upsample_convtranspose2d_forward(x1, x2, weight, kernel_size=2, stride=2):
    """
    x1     : [N, Cin, H, W]      (NCHW, like PyTorch)
    x2     : [N, Cout, H2, W2]
    weight : [Cin, Cout, k, k]   (torch.nn.ConvTranspose2d weight layout)
    """
    N, Cin, H, W = x1.shape
    Cin_w, Cout, kh, kw = weight.shape
    assert Cin == Cin_w and kh == kernel_size and kw == kernel_size
    assert stride == kernel_size, "kernel assumes non-overlapping deposits (k == s)"
    H2, W2 = x2.shape[2], x2.shape[3]

    if H2 == H * kh and W2 == W * kw:
        try:
            out = _fused_forward(x1, x2, weight)
            jax.block_until_ready(out)
            return out
        except Exception:
            # TODO(synk): the fully-fused path relies on in-kernel 2-D
            # transposes and sublane-strided scratch stores; if Mosaic rejects
            # them on a given generation, degrade to matmul kernel + XLA glue.
            pass
    # General pad/crop case (diff != 0) and fallback: matmul kernel + XLA epilogue.
    return _fallback_forward_jit(x1, x2, weight)


# ---------------------------------------------------------------------------
# pure-JAX reference
# ---------------------------------------------------------------------------
def _reference(x1, x2, weight):
    N, Cin, H, W = x1.shape
    _, Cout, kh, kw = weight.shape
    up = jnp.einsum("ncij,cokl->noikjl", x1, weight).reshape(N, Cout, H * kh, W * kw)
    H2, W2 = x2.shape[2], x2.shape[3]
    diffY, diffX = H2 - H * kh, W2 - W * kw
    up = lax.pad(
        up,
        jnp.float32(0.0),
        [(0, 0, 0), (0, 0, 0),
         (diffY // 2, diffY - diffY // 2, 0),
         (diffX // 2, diffX - diffX // 2, 0)],
    )
    return up + x2


if __name__ == "__main__":
    key = jax.random.PRNGKey(0)
    k1, k2, k3 = jax.random.split(key, 3)

    N, Cin, Cout, H, W = 2, 4, 8, 16, 16
    kernel_size = stride = 2
    H2, W2 = H * stride, W * stride

    x1 = jax.random.normal(k1, (N, Cin, H, W), dtype=jnp.float32)
    x2 = jax.random.normal(k2, (N, Cout, H2, W2), dtype=jnp.float32)
    # deterministic synthetic weight, ConvTranspose2d layout [Cin, Cout, k, k]
    weight = 0.1 * jax.random.normal(k3, (Cin, Cout, kernel_size, kernel_size),
                                     dtype=jnp.float32)

    out = upsample_convtranspose2d_forward(x1, x2, weight,
                                           kernel_size=kernel_size, stride=stride)
    out = jax.block_until_ready(out)

    ref = _reference(x1, x2, weight)
    assert out.shape == (N, Cout, H2, W2)
    assert jnp.allclose(out, ref, atol=1e-5, rtol=1e-5)

    print("KERNEL_OK")
</pallas_src>

<mosaic_0001>
module attributes {stable_mosaic.version = 11 : i64} {
  func.func @_fused_kernel(%arg0: i32, %arg1: i32, %arg2: memref<1x4x256xf32, #tpu.memory_space<vmem>>, %arg3: memref<32x4xf32, #tpu.memory_space<vmem>>, %arg4: memref<1x8x32x32xf32, #tpu.memory_space<vmem>>, %arg5: memref<1x8x32x32xf32, #tpu.memory_space<vmem>>, %arg6: memref<512x16xf32, #tpu.memory_space<vmem>>) attributes {dimension_semantics = [#tpu.dimension_semantics<parallel>, #tpu.dimension_semantics<parallel>], iteration_bounds = array<i64: 2, 1>, scalar_prefetch = 0 : i64, scratch_operands = 1 : i64, tpu.core_type = #tpu.core_type<tc>, window_params = [{transform_indices = @transform_0, window_bounds = array<i64: 1, 4, 256>}, {pipeline_mode = #tpu.pipeline_mode<synchronous>, transform_indices = @transform_1, window_bounds = array<i64: 32, 4>}, {transform_indices = @transform_2, window_bounds = array<i64: 1, 8, 32, 32>}, {transform_indices = @transform_3, window_bounds = array<i64: 1, 8, 32, 32>}]} {
    %c0 = arith.constant 0 : index
    %c0_0 = arith.constant 0 : index
    %c0_1 = arith.constant 0 : index
    %0 = vector.load %arg2[%c0, %c0_0, %c0_1] : memref<1x4x256xf32, #tpu.memory_space<vmem>>, vector<1x4x256xf32>
    %1 = vector.shape_cast %0 : vector<1x4x256xf32> to vector<4x256xf32>
    %c0_2 = arith.constant 0 : index
    %c0_3 = arith.constant 0 : index
    %2 = vector.load %arg3[%c0_2, %c0_3] : memref<32x4xf32, #tpu.memory_space<vmem>>, vector<32x4xf32>
    %cst = arith.constant dense<0.000000e+00> : vector<32x256xf32>
    %3 = tpu.matmul %2, %1, %cst {dimension_numbers = #tpu.dot_dimension_numbers<[1], [0], [0], [1], [0, 0, 1, 1], [], []>} : vector<32x4xf32>, vector<4x256xf32>, vector<32x256xf32> -> vector<32x256xf32>
    %4 = vector.extract_strided_slice %3 {offsets = [0, 0], sizes = [16, 256], strides = [1, 1]} : vector<32x256xf32> to vector<16x256xf32>
    %5 = tpu.transpose %4, [1, 0] : vector<16x256xf32> -> vector<256x16xf32>
    %c0_4 = arith.constant 0 : index
    %c0_5 = arith.constant 0 : index
    %6 = tpu.strided_load %arg6[%c0_4, %c0_5] {strides = array<i32: 2, 1>} : memref<512x16xf32, #tpu.memory_space<vmem>>, vector<256x16xf32>
    tpu.strided_store %arg6[%c0_4, %c0_5], %5 {strides = array<i32: 2, 1>} : memref<512x16xf32, #tpu.memory_space<vmem>>, vector<256x16xf32>
    %7 = vector.extract_strided_slice %3 {offsets = [16, 0], sizes = [16, 256], strides = [1, 1]} : vector<32x256xf32> to vector<16x256xf32>
    %8 = tpu.transpose %7, [1, 0] : vector<16x256xf32> -> vector<256x16xf32>
    %c1 = arith.constant 1 : index
    %c0_6 = arith.constant 0 : index
    %9 = tpu.strided_load %arg6[%c1, %c0_6] {strides = array<i32: 2, 1>} : memref<512x16xf32, #tpu.memory_space<vmem>>, vector<256x16xf32>
    tpu.strided_store %arg6[%c1, %c0_6], %8 {strides = array<i32: 2, 1>} : memref<512x16xf32, #tpu.memory_space<vmem>>, vector<256x16xf32>
    %c0_7 = arith.constant 0 : index
    %c0_8 = arith.constant 0 : index
    %10 = vector.load %arg6[%c0_7, %c0_8] : memref<512x16xf32, #tpu.memory_space<vmem>>, vector<512x16xf32>
    %11 = tpu.transpose %10, [1, 0] : vector<512x16xf32> -> vector<16x512xf32>
    %12 = vector.extract_strided_slice %11 {offsets = [0, 0], sizes = [8, 512], strides = [1, 1]} : vector<16x512xf32> to vector<8x512xf32>
    %13 = vector.extract_strided_slice %12 {offsets = [0, 0], sizes = [8, 32], strides = [1, 1]} : vector<8x512xf32> to vector<8x32xf32>
    %c0_9 = arith.constant 0 : index
    %c0_10 = arith.constant 0 : index
    %c0_11 = arith.constant 0 : index
    %c0_12 = arith.constant 0 : index
    %14 = vector.load %arg4[%c0_9, %c0_10, %c0_11, %c0_12] : memref<1x8x32x32xf32, #tpu.memory_space<vmem>>, vector<1x8x1x32xf32>
    %15 = vector.shape_cast %14 : vector<1x8x1x32xf32> to vector<8x32xf32>
    %16 = arith.addf %13, %15 : vector<8x32xf32>
    %c0_13 = arith.constant 0 : index
    %c0_14 = arith.constant 0 : index
    %c0_15 = arith.constant 0 : index
    %c0_16 = arith.constant 0 : index
    %17 = vector.load %arg5[%c0_13, %c0_14, %c0_15, %c0_16] : memref<1x8x32x32xf32, #tpu.memory_space<vmem>>, vector<1x8x1x32xf32>
    %18 = vector.shape_cast %17 : vector<1x8x1x32xf32> to vector<8x32xf32>
    %19 = vector.shape_cast %16 : vector<8x32xf32> to vector<1x8x1x32xf32>
    tpu.vector_store %arg5[%c0_13, %c0_14, %c0_15, %c0_16], %19 {strides = array<i32>} : memref<1x8x32x32xf32, #tpu.memory_space<vmem>>, vector<1x8x1x32xf32>,
    %20 = vector.extract_strided_slice %12 {offsets = [0, 32], sizes = [8, 32], strides = [1, 1]} : vector<8x512xf32> to vector<8x32xf32>
    %c0_17 = arith.constant 0 : index
    %c0_18 = arith.constant 0 : index
    %c2 = arith.constant 2 : index
    %c0_19 = arith.constant 0 : index
    %21 = vector.load %arg4[%c0_17, %c0_18, %c2, %c0_19] : memref<1x8x32x32xf32, #tpu.memory_space<vmem>>, vector<1x8x1x32xf32>
    %22 = vector.shape_cast %21 : vector<1x8x1x32xf32> to vector<8x32xf32>
    %23 = arith.addf %20, %22 : vector<8x32xf32>
    %c0_20 = arith.constant 0 : index
    %c0_21 = arith.constant 0 : index
    %c2_22 = arith.constant 2 : index
    %c0_23 = arith.constant 0 : index
    %24 = vector.load %arg5[%c0_20, %c0_21, %c2_22, %c0_23] : memref<1x8x32x32xf32, #tpu.memory_space<vmem>>, vector<1x8x1x32xf32>
    %25 = vector.shape_cast %24 : vector<1x8x1x32xf32> to vector<8x32xf32>
    %26 = vector.shape_cast %23 : vector<8x32xf32> to vector<1x8x1x32xf32>
    tpu.vector_store %arg5[%c0_20, %c0_21, %c2_22, %c0_23], %26 {strides = array<i32>} : memref<1x8x32x32xf32, #tpu.memory_space<vmem>>, vector<1x8x1x32xf32>,
    %27 = vector.extract_strided_slice %12 {offsets = [0, 64], sizes = [8, 32], strides = [1, 1]} : vector<8x512xf32> to vector<8x32xf32>
    %c0_24 = arith.constant 0 : index
    %c0_25 = arith.constant 0 : index
    %c4 = arith.constant 4 : index
    %c0_26 = arith.constant 0 : index
    %28 = vector.load %arg4[%c0_24, %c0_25, %c4, %c0_26] : memref<1x8x32x32xf32, #tpu.memory_space<vmem>>, vector<1x8x1x32xf32>
    %29 = vector.shape_cast %28 : vector<1x8x1x32xf32> to vector<8x32xf32>
    %30 = arith.addf %27, %29 : vector<8x32xf32>
    %c0_27 = arith.constant 0 : index
    %c0_28 = arith.constant 0 : index
    %c4_29 = arith.constant 4 : index
    %c0_30 = arith.constant 0 : index
    %31 = vector.load %arg5[%c0_27, %c0_28, %c4_29, %c0_30] : memref<1x8x32x32xf32, #tpu.memory_space<vmem>>, vector<1x8x1x32xf32>
    %32 = vector.shape_cast %31 : vector<1x8x1x32xf32> to vector<8x32xf32>
    %33 = vector.shape_cast %30 : vector<8x32xf32> to vector<1x8x1x32xf32>
    tpu.vector_store %arg5[%c0_27, %c0_28, %c4_29, %c0_30], %33 {strides = array<i32>} : memref<1x8x32x32xf32, #tpu.memory_space<vmem>>, vector<1x8x1x32xf32>,
    %34 = vector.extract_strided_slice %12 {offsets = [0, 96], sizes = [8, 32], strides = [1, 1]} : vector<8x512xf32> to vector<8x32xf32>
    %c0_31 = arith.constant 0 : index
    %c0_32 = arith.constant 0 : index
    %c6 = arith.constant 6 : index
    %c0_33 = arith.constant 0 : index
    %35 = vector.load %arg4[%c0_31, %c0_32, %c6, %c0_33] : memref<1x8x32x32xf32, #tpu.memory_space<vmem>>, vector<1x8x1x32xf32>
    %36 = vector.shape_cast %35 : vector<1x8x1x32xf32> to vector<8x32xf32>
    %37 = arith.addf %34, %36 : vector<8x32xf32>
    %c0_34 = arith.constant 0 : index
    %c0_35 = arith.constant 0 : index
    %c6_36 = arith.constant 6 : index
    %c0_37 = arith.constant 0 : index
    %38 = vector.load %arg5[%c0_34, %c0_35, %c6_36, %c0_37] : memref<1x8x32x32xf32, #tpu.memory_space<vmem>>, vector<1x8x1x32xf32>
    %39 = vector.shape_cast %38 : vector<1x8x1x32xf32> to vector<8x32xf32>
    %40 = vector.shape_cast %37 : vector<8x32xf32> to vector<1x8x1x32xf32>
    tpu.vector_store %arg5[%c0_34, %c0_35, %c6_36, %c0_37], %40 {strides = array<i32>} : memref<1x8x32x32xf32, #tpu.memory_space<vmem>>, vector<1x8x1x32xf32>,
    %41 = vector.extract_strided_slice %12 {offsets = [0, 128], sizes = [8, 32], strides = [1, 1]} : vector<8x512xf32> to vector<8x32xf32>
    %c0_38 = arith.constant 0 : index
    %c0_39 = arith.constant 0 : index
    %c8 = arith.constant 8 : index
    %c0_40 = arith.constant 0 : index
    %42 = vector.load %arg4[%c0_38, %c0_39, %c8, %c0_40] : memref<1x8x32x32xf32, #tpu.memory_space<vmem>>, vector<1x8x1x32xf32>
    %43 = vector.shape_cast %42 : vector<1x8x1x32xf32> to vector<8x32xf32>
    %44 = arith.addf %41, %43 : vector<8x32xf32>
    %c0_41 = arith.constant 0 : index
    %c0_42 = arith.constant 0 : index
    %c8_43 = arith.constant 8 : index
    %c0_44 = arith.constant 0 : index
    %45 = vector.load %arg5[%c0_41, %c0_42, %c8_43, %c0_44] : memref<1x8x32x32xf32, #tpu.memory_space<vmem>>, vector<1x8x1x32xf32>
    %46 = vector.shape_cast %45 : vector<1x8x1x32xf32> to vector<8x32xf32>
    %47 = vector.shape_cast %44 : vector<8x32xf32> to vector<1x8x1x32xf32>
    tpu.vector_store %arg5[%c0_41, %c0_42, %c8_43, %c0_44], %47 {strides = array<i32>} : memref<1x8x32x32xf32, #tpu.memory_space<vmem>>, vector<1x8x1x32xf32>,
    %48 = vector.extract_strided_slice %12 {offsets = [0, 160], sizes = [8, 32], strides = [1, 1]} : vector<8x512xf32> to vector<8x32xf32>
    %c0_45 = arith.constant 0 : index
    %c0_46 = arith.constant 0 : index
    %c10 = arith.constant 10 : index
    %c0_47 = arith.constant 0 : index
    %49 = vector.load %arg4[%c0_45, %c0_46, %c10, %c0_47] : memref<1x8x32x32xf32, #tpu.memory_space<vmem>>, vector<1x8x1x32xf32>
    %50 = vector.shape_cast %49 : vector<1x8x1x32xf32> to vector<8x32xf32>
    %51 = arith.addf %48, %50 : vector<8x32xf32>
    %c0_48 = arith.constant 0 : index
    %c0_49 = arith.constant 0 : index
    %c10_50 = arith.constant 10 : index
    %c0_51 = arith.constant 0 : index
    %52 = vector.load %arg5[%c0_48, %c0_49, %c10_50, %c0_51] : memref<1x8x32x32xf32, #tpu.memory_space<vmem>>, vector<1x8x1x32xf32>
    %53 = vector.shape_cast %52 : vector<1x8x1x32xf32> to vector<8x32xf32>
    %54 = vector.shape_cast %51 : vector<8x32xf32> to vector<1x8x1x32xf32>
    tpu.vector_store %arg5[%c0_48, %c0_49, %c10_50, %c0_51], %54 {strides = array<i32>} : memref<1x8x32x32xf32, #tpu.memory_space<vmem>>, vector<1x8x1x32xf32>,
    %55 = vector.extract_strided_slice %12 {offsets = [0, 192], sizes = [8, 32], strides = [1, 1]} : vector<8x512xf32> to vector<8x32xf32>
    %c0_52 = arith.constant 0 : index
    %c0_53 = arith.constant 0 : index
    %c12 = arith.constant 12 : index
    %c0_54 = arith.constant 0 : index
    %56 = vector.load %arg4[%c0_52, %c0_53, %c12, %c0_54] : memref<1x8x32x32xf32, #tpu.memory_space<vmem>>, vector<1x8x1x32xf32>
    %57 = vector.shape_cast %56 : vector<1x8x1x32xf32> to vector<8x32xf32>
    %58 = arith.addf %55, %57 : vector<8x32xf32>
    %c0_55 = arith.constant 0 : index
    %c0_56 = arith.constant 0 : index
    %c12_57 = arith.constant 12 : index
    %c0_58 = arith.constant 0 : index
    %59 = vector.load %arg5[%c0_55, %c0_56, %c12_57, %c0_58] : memref<1x8x32x32xf32, #tpu.memory_space<vmem>>, vector<1x8x1x32xf32>
    %60 = vector.shape_cast %59 : vector<1x8x1x32xf32> to vector<8x32xf32>
    %61 = vector.shape_cast %58 : vector<8x32xf32> to vector<1x8x1x32xf32>
    tpu.vector_store %arg5[%c0_55, %c0_56, %c12_57, %c0_58], %61 {strides = array<i32>} : memref<1x8x32x32xf32, #tpu.memory_space<vmem>>, vector<1x8x1x32xf32>,
    %62 = vector.extract_strided_slice %12 {offsets = [0, 224], sizes = [8, 32], strides = [1, 1]} : vector<8x512xf32> to vector<8x32xf32>
    %c0_59 = arith.constant 0 : index
    %c0_60 = arith.constant 0 : index
    %c14 = arith.constant 14 : index
    %c0_61 = arith.constant 0 : index
    %63 = vector.load %arg4[%c0_59, %c0_60, %c14, %c0_61] : memref<1x8x32x32xf32, #tpu.memory_space<vmem>>, vector<1x8x1x32xf32>
    %64 = vector.shape_cast %63 : vector<1x8x1x32xf32> to vector<8x32xf32>
    %65 = arith.addf %62, %64 : vector<8x32xf32>
    %c0_62 = arith.constant 0 : index
    %c0_63 = arith.constant 0 : index
    %c14_64 = arith.constant 14 : index
    %c0_65 = arith.constant 0 : index
    %66 = vector.load %arg5[%c0_62, %c0_63, %c14_64, %c0_65] : memref<1x8x32x32xf32, #tpu.memory_space<vmem>>, vector<1x8x1x32xf32>
    %67 = vector.shape_cast %66 : vector<1x8x1x32xf32> to vector<8x32xf32>
    %68 = vector.shape_cast %65 : vector<8x32xf32> to vector<1x8x1x32xf32>
    tpu.vector_store %arg5[%c0_62, %c0_63, %c14_64, %c0_65], %68 {strides = array<i32>} : memref<1x8x32x32xf32, #tpu.memory_space<vmem>>, vector<1x8x1x32xf32>,
    %69 = vector.extract_strided_slice %12 {offsets = [0, 256], sizes = [8, 32], strides = [1, 1]} : vector<8x512xf32> to vector<8x32xf32>
    %c0_66 = arith.constant 0 : index
    %c0_67 = arith.constant 0 : index
    %c16 = arith.constant 16 : index
    %c0_68 = arith.constant 0 : index
    %70 = vector.load %arg4[%c0_66, %c0_67, %c16, %c0_68] : memref<1x8x32x32xf32, #tpu.memory_space<vmem>>, vector<1x8x1x32xf32>
    %71 = vector.shape_cast %70 : vector<1x8x1x32xf32> to vector<8x32xf32>
    %72 = arith.addf %69, %71 : vector<8x32xf32>
    %c0_69 = arith.constant 0 : index
    %c0_70 = arith.constant 0 : index
    %c16_71 = arith.constant 16 : index
    %c0_72 = arith.constant 0 : index
    %73 = vector.load %arg5[%c0_69, %c0_70, %c16_71, %c0_72] : memref<1x8x32x32xf32, #tpu.memory_space<vmem>>, vector<1x8x1x32xf32>
    %74 = vector.shape_cast %73 : vector<1x8x1x32xf32> to vector<8x32xf32>
    %75 = vector.shape_cast %72 : vector<8x32xf32> to vector<1x8x1x32xf32>
    tpu.vector_store %arg5[%c0_69, %c0_70, %c16_71, %c0_72], %75 {strides = array<i32>} : memref<1x8x32x32xf32, #tpu.memory_space<vmem>>, vector<1x8x1x32xf32>,
    %76 = vector.extract_strided_slice %12 {offsets = [0, 288], sizes = [8, 32], strides = [1, 1]} : vector<8x512xf32> to vector<8x32xf32>
    %c0_73 = arith.constant 0 : index
    %c0_74 = arith.constant 0 : index
    %c18 = arith.constant 18 : index
    %c0_75 = arith.constant 0 : index
    %77 = vector.load %arg4[%c0_73, %c0_74, %c18, %c0_75] : memref<1x8x32x32xf32, #tpu.memory_space<vmem>>, vector<1x8x1x32xf32>
    %78 = vector.shape_cast %77 : vector<1x8x1x32xf32> to vector<8x32xf32>
    %79 = arith.addf %76, %78 : vector<8x32xf32>
    %c0_76 = arith.constant 0 : index
    %c0_77 = arith.constant 0 : index
    %c18_78 = arith.constant 18 : index
    %c0_79 = arith.constant 0 : index
    %80 = vector.load %arg5[%c0_76, %c0_77, %c18_78, %c0_79] : memref<1x8x32x32xf32, #tpu.memory_space<vmem>>, vector<1x8x1x32xf32>
    %81 = vector.shape_cast %80 : vector<1x8x1x32xf32> to vector<8x32xf32>
    %82 = vector.shape_cast %79 : vector<8x32xf32> to vector<1x8x1x32xf32>
    tpu.vector_store %arg5[%c0_76, %c0_77, %c18_78, %c0_79], %82 {strides = array<i32>} : memref<1x8x32x32xf32, #tpu.memory_space<vmem>>, vector<1x8x1x32xf32>,
    %83 = vector.extract_strided_slice %12 {offsets = [0, 320], sizes = [8, 32], strides = [1, 1]} : vector<8x512xf32> to vector<8x32xf32>
    %c0_80 = arith.constant 0 : index
    %c0_81 = arith.constant 0 : index
    %c20 = arith.constant 20 : index
    %c0_82 = arith.constant 0 : index
    %84 = vector.load %arg4[%c0_80, %c0_81, %c20, %c0_82] : memref<1x8x32x32xf32, #tpu.memory_space<vmem>>, vector<1x8x1x32xf32>
    %85 = vector.shape_cast %84 : vector<1x8x1x32xf32> to vector<8x32xf32>
    %86 = arith.addf %83, %85 : vector<8x32xf32>
    %c0_83 = arith.constant 0 : index
    %c0_84 = arith.constant 0 : index
    %c20_85 = arith.constant 20 : index
    %c0_86 = arith.constant 0 : index
    %87 = vector.load %arg5[%c0_83, %c0_84, %c20_85, %c0_86] : memref<1x8x32x32xf32, #tpu.memory_space<vmem>>, vector<1x8x1x32xf32>
    %88 = vector.shape_cast %87 : vector<1x8x1x32xf32> to vector<8x32xf32>
    %89 = vector.shape_cast %86 : vector<8x32xf32> to vector<1x8x1x32xf32>
    tpu.vector_store %arg5[%c0_83, %c0_84, %c20_85, %c0_86], %89 {strides = array<i32>} : memref<1x8x32x32xf32, #tpu.memory_space<vmem>>, vector<1x8x1x32xf32>,
    %90 = vector.extract_strided_slice %12 {offsets = [0, 352], sizes = [8, 32], strides = [1, 1]} : vector<8x512xf32> to vector<8x32xf32>
    %c0_87 = arith.constant 0 : index
    %c0_88 = arith.constant 0 : index
    %c22 = arith.constant 22 : index
    %c0_89 = arith.constant 0 : index
    %91 = vector.load %arg4[%c0_87, %c0_88, %c22, %c0_89] : memref<1x8x32x32xf32, #tpu.memory_space<vmem>>, vector<1x8x1x32xf32>
    %92 = vector.shape_cast %91 : vector<1x8x1x32xf32> to vector<8x32xf32>
    %93 = arith.addf %90, %92 : vector<8x32xf32>
    %c0_90 = arith.constant 0 : index
    %c0_91 = arith.constant 0 : index
    %c22_92 = arith.constant 22 : index
    %c0_93 = arith.constant 0 : index
    %94 = vector.load %arg5[%c0_90, %c0_91, %c22_92, %c0_93] : memref<1x8x32x32xf32, #tpu.memory_space<vmem>>, vector<1x8x1x32xf32>
    %95 = vector.shape_cast %94 : vector<1x8x1x32xf32> to vector<8x32xf32>
    %96 = vector.shape_cast %93 : vector<8x32xf32> to vector<1x8x1x32xf32>
    tpu.vector_store %arg5[%c0_90, %c0_91, %c22_92, %c0_93], %96 {strides = array<i32>} : memref<1x8x32x32xf32, #tpu.memory_space<vmem>>, vector<1x8x1x32xf32>,
    %97 = vector.extract_strided_slice %12 {offsets = [0, 384], sizes = [8, 32], strides = [1, 1]} : vector<8x512xf32> to vector<8x32xf32>
    %c0_94 = arith.constant 0 : index
    %c0_95 = arith.constant 0 : index
    %c24 = arith.constant 24 : index
    %c0_96 = arith.constant 0 : index
    %98 = vector.load %arg4[%c0_94, %c0_95, %c24, %c0_96] : memref<1x8x32x32xf32, #tpu.memory_space<vmem>>, vector<1x8x1x32xf32>
    %99 = vector.shape_cast %98 : vector<1x8x1x32xf32> to vector<8x32xf32>
    %100 = arith.addf %97, %99 : vector<8x32xf32>
    %c0_97 = arith.constant 0 : index
    %c0_98 = arith.constant 0 : index
    %c24_99 = arith.constant 24 : index
    %c0_100 = arith.constant 0 : index
    %101 = vector.load %arg5[%c0_97, %c0_98, %c24_99, %c0_100] : memref<1x8x32x32xf32, #tpu.memory_space<vmem>>, vector<1x8x1x32xf32>
    %102 = vector.shape_cast %101 : vector<1x8x1x32xf32> to vector<8x32xf32>
    %103 = vector.shape_cast %100 : vector<8x32xf32> to vector<1x8x1x32xf32>
    tpu.vector_store %arg5[%c0_97, %c0_98, %c24_99, %c0_100], %103 {strides = array<i32>} : memref<1x8x32x32xf32, #tpu.memory_space<vmem>>, vector<1x8x1x32xf32>,
    %104 = vector.extract_strided_slice %12 {offsets = [0, 416], sizes = [8, 32], strides = [1, 1]} : vector<8x512xf32> to vector<8x32xf32>
    %c0_101 = arith.constant 0 : index
    %c0_102 = arith.constant 0 : index
    %c26 = arith.constant 26 : index
    %c0_103 = arith.constant 0 : index
    %105 = vector.load %arg4[%c0_101, %c0_102, %c26, %c0_103] : memref<1x8x32x32xf32, #tpu.memory_space<vmem>>, vector<1x8x1x32xf32>
    %106 = vector.shape_cast %105 : vector<1x8x1x32xf32> to vector<8x32xf32>
    %107 = arith.addf %104, %106 : vector<8x32xf32>
    %c0_104 = arith.constant 0 : index
    %c0_105 = arith.constant 0 : index
    %c26_106 = arith.constant 26 : index
    %c0_107 = arith.constant 0 : index
    %108 = vector.load %arg5[%c0_104, %c0_105, %c26_106, %c0_107] : memref<1x8x32x32xf32, #tpu.memory_space<vmem>>, vector<1x8x1x32xf32>
    %109 = vector.shape_cast %108 : vector<1x8x1x32xf32> to vector<8x32xf32>
    %110 = vector.shape_cast %107 : vector<8x32xf32> to vector<1x8x1x32xf32>
    tpu.vector_store %arg5[%c0_104, %c0_105, %c26_106, %c0_107], %110 {strides = array<i32>} : memref<1x8x32x32xf32, #tpu.memory_space<vmem>>, vector<1x8x1x32xf32>,
    %111 = vector.extract_strided_slice %12 {offsets = [0, 448], sizes = [8, 32], strides = [1, 1]} : vector<8x512xf32> to vector<8x32xf32>
    %c0_108 = arith.constant 0 : index
    %c0_109 = arith.constant 0 : index
    %c28 = arith.constant 28 : index
    %c0_110 = arith.constant 0 : index
    %112 = vector.load %arg4[%c0_108, %c0_109, %c28, %c0_110] : memref<1x8x32x32xf32, #tpu.memory_space<vmem>>, vector<1x8x1x32xf32>
    %113 = vector.shape_cast %112 : vector<1x8x1x32xf32> to vector<8x32xf32>
    %114 = arith.addf %111, %113 : vector<8x32xf32>
    %c0_111 = arith.constant 0 : index
    %c0_112 = arith.constant 0 : index
    %c28_113 = arith.constant 28 : index
    %c0_114 = arith.constant 0 : index
    %115 = vector.load %arg5[%c0_111, %c0_112, %c28_113, %c0_114] : memref<1x8x32x32xf32, #tpu.memory_space<vmem>>, vector<1x8x1x32xf32>
    %116 = vector.shape_cast %115 : vector<1x8x1x32xf32> to vector<8x32xf32>
    %117 = vector.shape_cast %114 : vector<8x32xf32> to vector<1x8x1x32xf32>
    tpu.vector_store %arg5[%c0_111, %c0_112, %c28_113, %c0_114], %117 {strides = array<i32>} : memref<1x8x32x32xf32, #tpu.memory_space<vmem>>, vector<1x8x1x32xf32>,
    %118 = vector.extract_strided_slice %12 {offsets = [0, 480], sizes = [8, 32], strides = [1, 1]} : vector<8x512xf32> to vector<8x32xf32>
    %c0_115 = arith.constant 0 : index
    %c0_116 = arith.constant 0 : index
    %c30 = arith.constant 30 : index
    %c0_117 = arith.constant 0 : index
    %119 = vector.load %arg4[%c0_115, %c0_116, %c30, %c0_117] : memref<1x8x32x32xf32, #tpu.memory_space<vmem>>, vector<1x8x1x32xf32>
    %120 = vector.shape_cast %119 : vector<1x8x1x32xf32> to vector<8x32xf32>
    %121 = arith.addf %118, %120 : vector<8x32xf32>
    %c0_118 = arith.constant 0 : index
    %c0_119 = arith.constant 0 : index
    %c30_120 = arith.constant 30 : index
    %c0_121 = arith.constant 0 : index
    %122 = vector.load %arg5[%c0_118, %c0_119, %c30_120, %c0_121] : memref<1x8x32x32xf32, #tpu.memory_space<vmem>>, vector<1x8x1x32xf32>
    %123 = vector.shape_cast %122 : vector<1x8x1x32xf32> to vector<8x32xf32>
    %124 = vector.shape_cast %121 : vector<8x32xf32> to vector<1x8x1x32xf32>
    tpu.vector_store %arg5[%c0_118, %c0_119, %c30_120, %c0_121], %124 {strides = array<i32>} : memref<1x8x32x32xf32, #tpu.memory_space<vmem>>, vector<1x8x1x32xf32>,
    %125 = vector.extract_strided_slice %11 {offsets = [8, 0], sizes = [8, 512], strides = [1, 1]} : vector<16x512xf32> to vector<8x512xf32>
    %126 = vector.extract_strided_slice %125 {offsets = [0, 0], sizes = [8, 32], strides = [1, 1]} : vector<8x512xf32> to vector<8x32xf32>
    %c0_122 = arith.constant 0 : index
    %c0_123 = arith.constant 0 : index
    %c1_124 = arith.constant 1 : index
    %c0_125 = arith.constant 0 : index
    %127 = vector.load %arg4[%c0_122, %c0_123, %c1_124, %c0_125] : memref<1x8x32x32xf32, #tpu.memory_space<vmem>>, vector<1x8x1x32xf32>
    %128 = vector.shape_cast %127 : vector<1x8x1x32xf32> to vector<8x32xf32>
    %129 = arith.addf %126, %128 : vector<8x32xf32>
    %c0_126 = arith.constant 0 : index
    %c0_127 = arith.constant 0 : index
    %c1_128 = arith.constant 1 : index
    %c0_129 = arith.constant 0 : index
    %130 = vector.load %arg5[%c0_126, %c0_127, %c1_128, %c0_129] : memref<1x8x32x32xf32, #tpu.memory_space<vmem>>, vector<1x8x1x32xf32>
    %131 = vector.shape_cast %130 : vector<1x8x1x32xf32> to vector<8x32xf32>
    %132 = vector.shape_cast %129 : vector<8x32xf32> to vector<1x8x1x32xf32>
    tpu.vector_store %arg5[%c0_126, %c0_127, %c1_128, %c0_129], %132 {strides = array<i32>} : memref<1x8x32x32xf32, #tpu.memory_space<vmem>>, vector<1x8x1x32xf32>,
    %133 = vector.extract_strided_slice %125 {offsets = [0, 32], sizes = [8, 32], strides = [1, 1]} : vector<8x512xf32> to vector<8x32xf32>
    %c0_130 = arith.constant 0 : index
    %c0_131 = arith.constant 0 : index
    %c3 = arith.constant 3 : index
    %c0_132 = arith.constant 0 : index
    %134 = vector.load %arg4[%c0_130, %c0_131, %c3, %c0_132] : memref<1x8x32x32xf32, #tpu.memory_space<vmem>>, vector<1x8x1x32xf32>
    %135 = vector.shape_cast %134 : vector<1x8x1x32xf32> to vector<8x32xf32>
    %136 = arith.addf %133, %135 : vector<8x32xf32>
    %c0_133 = arith.constant 0 : index
    %c0_134 = arith.constant 0 : index
    %c3_135 = arith.constant 3 : index
    %c0_136 = arith.constant 0 : index
    %137 = vector.load %arg5[%c0_133, %c0_134, %c3_135, %c0_136] : memref<1x8x32x32xf32, #tpu.memory_space<vmem>>, vector<1x8x1x32xf32>
    %138 = vector.shape_cast %137 : vector<1x8x1x32xf32> to vector<8x32xf32>
    %139 = vector.shape_cast %136 : vector<8x32xf32> to vector<1x8x1x32xf32>
    tpu.vector_store %arg5[%c0_133, %c0_134, %c3_135, %c0_136], %139 {strides = array<i32>} : memref<1x8x32x32xf32, #tpu.memory_space<vmem>>, vector<1x8x1x32xf32>,
    %140 = vector.extract_strided_slice %125 {offsets = [0, 64], sizes = [8, 32], strides = [1, 1]} : vector<8x512xf32> to vector<8x32xf32>
    %c0_137 = arith.constant 0 : index
    %c0_138 = arith.constant 0 : index
    %c5 = arith.constant 5 : index
    %c0_139 = arith.constant 0 : index
    %141 = vector.load %arg4[%c0_137, %c0_138, %c5, %c0_139] : memref<1x8x32x32xf32, #tpu.memory_space<vmem>>, vector<1x8x1x32xf32>
    %142 = vector.shape_cast %141 : vector<1x8x1x32xf32> to vector<8x32xf32>
    %143 = arith.addf %140, %142 : vector<8x32xf32>
    %c0_140 = arith.constant 0 : index
    %c0_141 = arith.constant 0 : index
    %c5_142 = arith.constant 5 : index
    %c0_143 = arith.constant 0 : index
    %144 = vector.load %arg5[%c0_140, %c0_141, %c5_142, %c0_143] : memref<1x8x32x32xf32, #tpu.memory_space<vmem>>, vector<1x8x1x32xf32>
    %145 = vector.shape_cast %144 : vector<1x8x1x32xf32> to vector<8x32xf32>
    %146 = vector.shape_cast %143 : vector<8x32xf32> to vector<1x8x1x32xf32>
    tpu.vector_store %arg5[%c0_140, %c0_141, %c5_142, %c0_143], %146 {strides = array<i32>} : memref<1x8x32x32xf32, #tpu.memory_space<vmem>>, vector<1x8x1x32xf32>,
    %147 = vector.extract_strided_slice %125 {offsets = [0, 96], sizes = [8, 32], strides = [1, 1]} : vector<8x512xf32> to vector<8x32xf32>
    %c0_144 = arith.constant 0 : index
    %c0_145 = arith.constant 0 : index
    %c7 = arith.constant 7 : index
    %c0_146 = arith.constant 0 : index
    %148 = vector.load %arg4[%c0_144, %c0_145, %c7, %c0_146] : memref<1x8x32x32xf32, #tpu.memory_space<vmem>>, vector<1x8x1x32xf32>
    %149 = vector.shape_cast %148 : vector<1x8x1x32xf32> to vector<8x32xf32>
    %150 = arith.addf %147, %149 : vector<8x32xf32>
    %c0_147 = arith.constant 0 : index
    %c0_148 = arith.constant 0 : index
    %c7_149 = arith.constant 7 : index
    %c0_150 = arith.constant 0 : index
    %151 = vector.load %arg5[%c0_147, %c0_148, %c7_149, %c0_150] : memref<1x8x32x32xf32, #tpu.memory_space<vmem>>, vector<1x8x1x32xf32>
    %152 = vector.shape_cast %151 : vector<1x8x1x32xf32> to vector<8x32xf32>
    %153 = vector.shape_cast %150 : vector<8x32xf32> to vector<1x8x1x32xf32>
    tpu.vector_store %arg5[%c0_147, %c0_148, %c7_149, %c0_150], %153 {strides = array<i32>} : memref<1x8x32x32xf32, #tpu.memory_space<vmem>>, vector<1x8x1x32xf32>,
    %154 = vector.extract_strided_slice %125 {offsets = [0, 128], sizes = [8, 32], strides = [1, 1]} : vector<8x512xf32> to vector<8x32xf32>
    %c0_151 = arith.constant 0 : index
    %c0_152 = arith.constant 0 : index
    %c9 = arith.constant 9 : index
    %c0_153 = arith.constant 0 : index
    %155 = vector.load %arg4[%c0_151, %c0_152, %c9, %c0_153] : memref<1x8x32x32xf32, #tpu.memory_space<vmem>>, vector<1x8x1x32xf32>
    %156 = vector.shape_cast %155 : vector<1x8x1x32xf32> to vector<8x32xf32>
    %157 = arith.addf %154, %156 : vector<8x32xf32>
    %c0_154 = arith.constant 0 : index
    %c0_155 = arith.constant 0 : index
    %c9_156 = arith.constant 9 : index
    %c0_157 = arith.constant 0 : index
    %158 = vector.load %arg5[%c0_154, %c0_155, %c9_156, %c0_157] : memref<1x8x32x32xf32, #tpu.memory_space<vmem>>, vector<1x8x1x32xf32>
    %159 = vector.shape_cast %158 : vector<1x8x1x32xf32> to vector<8x32xf32>
    %160 = vector.shape_cast %157 : vector<8x32xf32> to vector<1x8x1x32xf32>
    tpu.vector_store %arg5[%c0_154, %c0_155, %c9_156, %c0_157], %160 {strides = array<i32>} : memref<1x8x32x32xf32, #tpu.memory_space<vmem>>, vector<1x8x1x32xf32>,
    %161 = vector.extract_strided_slice %125 {offsets = [0, 160], sizes = [8, 32], strides = [1, 1]} : vector<8x512xf32> to vector<8x32xf32>
    %c0_158 = arith.constant 0 : index
    %c0_159 = arith.constant 0 : index
    %c11 = arith.constant 11 : index
    %c0_160 = arith.constant 0 : index
    %162 = vector.load %arg4[%c0_158, %c0_159, %c11, %c0_160] : memref<1x8x32x32xf32, #tpu.memory_space<vmem>>, vector<1x8x1x32xf32>
    %163 = vector.shape_cast %162 : vector<1x8x1x32xf32> to vector<8x32xf32>
    %164 = arith.addf %161, %163 : vector<8x32xf32>
    %c0_161 = arith.constant 0 : index
    %c0_162 = arith.constant 0 : index
    %c11_163 = arith.constant 11 : index
    %c0_164 = arith.constant 0 : index
    %165 = vector.load %arg5[%c0_161, %c0_162, %c11_163, %c0_164] : memref<1x8x32x32xf32, #tpu.memory_space<vmem>>, vector<1x8x1x32xf32>
    %166 = vector.shape_cast %165 : vector<1x8x1x32xf32> to vector<8x32xf32>
    %167 = vector.shape_cast %164 : vector<8x32xf32> to vector<1x8x1x32xf32>
    tpu.vector_store %arg5[%c0_161, %c0_162, %c11_163, %c0_164], %167 {strides = array<i32>} : memref<1x8x32x32xf32, #tpu.memory_space<vmem>>, vector<1x8x1x32xf32>,
    %168 = vector.extract_strided_slice %125 {offsets = [0, 192], sizes = [8, 32], strides = [1, 1]} : vector<8x512xf32> to vector<8x32xf32>
    %c0_165 = arith.constant 0 : index
    %c0_166 = arith.constant 0 : index
    %c13 = arith.constant 13 : index
    %c0_167 = arith.constant 0 : index
    %169 = vector.load %arg4[%c0_165, %c0_166, %c13, %c0_167] : memref<1x8x32x32xf32, #tpu.memory_space<vmem>>, vector<1x8x1x32xf32>
    %170 = vector.shape_cast %169 : vector<1x8x1x32xf32> to vector<8x32xf32>
    %171 = arith.addf %168, %170 : vector<8x32xf32>
    %c0_168 = arith.constant 0 : index
    %c0_169 = arith.constant 0 : index
    %c13_170 = arith.constant 13 : index
    %c0_171 = arith.constant 0 : index
    %172 = vector.load %arg5[%c0_168, %c0_169, %c13_170, %c0_171] : memref<1x8x32x32xf32, #tpu.memory_space<vmem>>, vector<1x8x1x32xf32>
    %173 = vector.shape_cast %172 : vector<1x8x1x32xf32> to vector<8x32xf32>
    %174 = vector.shape_cast %171 : vector<8x32xf32> to vector<1x8x1x32xf32>
    tpu.vector_store %arg5[%c0_168, %c0_169, %c13_170, %c0_171], %174 {strides = array<i32>} : memref<1x8x32x32xf32, #tpu.memory_space<vmem>>, vector<1x8x1x32xf32>,
    %175 = vector.extract_strided_slice %125 {offsets = [0, 224], sizes = [8, 32], strides = [1, 1]} : vector<8x512xf32> to vector<8x32xf32>
    %c0_172 = arith.constant 0 : index
    %c0_173 = arith.constant 0 : index
    %c15 = arith.constant 15 : index
    %c0_174 = arith.constant 0 : index
    %176 = vector.load %arg4[%c0_172, %c0_173, %c15, %c0_174] : memref<1x8x32x32xf32, #tpu.memory_space<vmem>>, vector<1x8x1x32xf32>
    %177 = vector.shape_cast %176 : vector<1x8x1x32xf32> to vector<8x32xf32>
    %178 = arith.addf %175, %177 : vector<8x32xf32>
    %c0_175 = arith.constant 0 : index
    %c0_176 = arith.constant 0 : index
    %c15_177 = arith.constant 15 : index
    %c0_178 = arith.constant 0 : index
    %179 = vector.load %arg5[%c0_175, %c0_176, %c15_177, %c0_178] : memref<1x8x32x32xf32, #tpu.memory_space<vmem>>, vector<1x8x1x32xf32>
    %180 = vector.shape_cast %179 : vector<1x8x1x32xf32> to vector<8x32xf32>
    %181 = vector.shape_cast %178 : vector<8x32xf32> to vector<1x8x1x32xf32>
    tpu.vector_store %arg5[%c0_175, %c0_176, %c15_177, %c0_178], %181 {strides = array<i32>} : memref<1x8x32x32xf32, #tpu.memory_space<vmem>>, vector<1x8x1x32xf32>,
    %182 = vector.extract_strided_slice %125 {offsets = [0, 256], sizes = [8, 32], strides = [1, 1]} : vector<8x512xf32> to vector<8x32xf32>
    %c0_179 = arith.constant 0 : index
    %c0_180 = arith.constant 0 : index
    %c17 = arith.constant 17 : index
    %c0_181 = arith.constant 0 : index
    %183 = vector.load %arg4[%c0_179, %c0_180, %c17, %c0_181] : memref<1x8x32x32xf32, #tpu.memory_space<vmem>>, vector<1x8x1x32xf32>
    %184 = vector.shape_cast %183 : vector<1x8x1x32xf32> to vector<8x32xf32>
    %185 = arith.addf %182, %184 : vector<8x32xf32>
    %c0_182 = arith.constant 0 : index
    %c0_183 = arith.constant 0 : index
    %c17_184 = arith.constant 17 : index
    %c0_185 = arith.constant 0 : index
    %186 = vector.load %arg5[%c0_182, %c0_183, %c17_184, %c0_185] : memref<1x8x32x32xf32, #tpu.memory_space<vmem>>, vector<1x8x1x32xf32>
    %187 = vector.shape_cast %186 : vector<1x8x1x32xf32> to vector<8x32xf32>
    %188 = vector.shape_cast %185 : vector<8x32xf32> to vector<1x8x1x32xf32>
    tpu.vector_store %arg5[%c0_182, %c0_183, %c17_184, %c0_185], %188 {strides = array<i32>} : memref<1x8x32x32xf32, #tpu.memory_space<vmem>>, vector<1x8x1x32xf32>,
    %189 = vector.extract_strided_slice %125 {offsets = [0, 288], sizes = [8, 32], strides = [1, 1]} : vector<8x512xf32> to vector<8x32xf32>
    %c0_186 = arith.constant 0 : index
    %c0_187 = arith.constant 0 : index
    %c19 = arith.constant 19 : index
    %c0_188 = arith.constant 0 : index
    %190 = vector.load %arg4[%c0_186, %c0_187, %c19, %c0_188] : memref<1x8x32x32xf32, #tpu.memory_space<vmem>>, vector<1x8x1x32xf32>
    %191 = vector.shape_cast %190 : vector<1x8x1x32xf32> to vector<8x32xf32>
    %192 = arith.addf %189, %191 : vector<8x32xf32>
    %c0_189 = arith.constant 0 : index
    %c0_190 = arith.constant 0 : index
    %c19_191 = arith.constant 19 : index
    %c0_192 = arith.constant 0 : index
    %193 = vector.load %arg5[%c0_189, %c0_190, %c19_191, %c0_192] : memref<1x8x32x32xf32, #tpu.memory_space<vmem>>, vector<1x8x1x32xf32>
    %194 = vector.shape_cast %193 : vector<1x8x1x32xf32> to vector<8x32xf32>
    %195 = vector.shape_cast %192 : vector<8x32xf32> to vector<1x8x1x32xf32>
    tpu.vector_store %arg5[%c0_189, %c0_190, %c19_191, %c0_192], %195 {strides = array<i32>} : memref<1x8x32x32xf32, #tpu.memory_space<vmem>>, vector<1x8x1x32xf32>,
    %196 = vector.extract_strided_slice %125 {offsets = [0, 320], sizes = [8, 32], strides = [1, 1]} : vector<8x512xf32> to vector<8x32xf32>
    %c0_193 = arith.constant 0 : index
    %c0_194 = arith.constant 0 : index
    %c21 = arith.constant 21 : index
    %c0_195 = arith.constant 0 : index
    %197 = vector.load %arg4[%c0_193, %c0_194, %c21, %c0_195] : memref<1x8x32x32xf32, #tpu.memory_space<vmem>>, vector<1x8x1x32xf32>
    %198 = vector.shape_cast %197 : vector<1x8x1x32xf32> to vector<8x32xf32>
    %199 = arith.addf %196, %198 : vector<8x32xf32>
    %c0_196 = arith.constant 0 : index
    %c0_197 = arith.constant 0 : index
    %c21_198 = arith.constant 21 : index
    %c0_199 = arith.constant 0 : index
    %200 = vector.load %arg5[%c0_196, %c0_197, %c21_198, %c0_199] : memref<1x8x32x32xf32, #tpu.memory_space<vmem>>, vector<1x8x1x32xf32>
    %201 = vector.shape_cast %200 : vector<1x8x1x32xf32> to vector<8x32xf32>
    %202 = vector.shape_cast %199 : vector<8x32xf32> to vector<1x8x1x32xf32>
    tpu.vector_store %arg5[%c0_196, %c0_197, %c21_198, %c0_199], %202 {strides = array<i32>} : memref<1x8x32x32xf32, #tpu.memory_space<vmem>>, vector<1x8x1x32xf32>,
    %203 = vector.extract_strided_slice %125 {offsets = [0, 352], sizes = [8, 32], strides = [1, 1]} : vector<8x512xf32> to vector<8x32xf32>
    %c0_200 = arith.constant 0 : index
    %c0_201 = arith.constant 0 : index
    %c23 = arith.constant 23 : index
    %c0_202 = arith.constant 0 : index
    %204 = vector.load %arg4[%c0_200, %c0_201, %c23, %c0_202] : memref<1x8x32x32xf32, #tpu.memory_space<vmem>>, vector<1x8x1x32xf32>
    %205 = vector.shape_cast %204 : vector<1x8x1x32xf32> to vector<8x32xf32>
    %206 = arith.addf %203, %205 : vector<8x32xf32>
    %c0_203 = arith.constant 0 : index
    %c0_204 = arith.constant 0 : index
    %c23_205 = arith.constant 23 : index
    %c0_206 = arith.constant 0 : index
    %207 = vector.load %arg5[%c0_203, %c0_204, %c23_205, %c0_206] : memref<1x8x32x32xf32, #tpu.memory_space<vmem>>, vector<1x8x1x32xf32>
    %208 = vector.shape_cast %207 : vector<1x8x1x32xf32> to vector<8x32xf32>
    %209 = vector.shape_cast %206 : vector<8x32xf32> to vector<1x8x1x32xf32>
    tpu.vector_store %arg5[%c0_203, %c0_204, %c23_205, %c0_206], %209 {strides = array<i32>} : memref<1x8x32x32xf32, #tpu.memory_space<vmem>>, vector<1x8x1x32xf32>,
    %210 = vector.extract_strided_slice %125 {offsets = [0, 384], sizes = [8, 32], strides = [1, 1]} : vector<8x512xf32> to vector<8x32xf32>
    %c0_207 = arith.constant 0 : index
    %c0_208 = arith.constant 0 : index
    %c25 = arith.constant 25 : index
    %c0_209 = arith.constant 0 : index
    %211 = vector.load %arg4[%c0_207, %c0_208, %c25, %c0_209] : memref<1x8x32x32xf32, #tpu.memory_space<vmem>>, vector<1x8x1x32xf32>
    %212 = vector.shape_cast %211 : vector<1x8x1x32xf32> to vector<8x32xf32>
    %213 = arith.addf %210, %212 : vector<8x32xf32>
    %c0_210 = arith.constant 0 : index
    %c0_211 = arith.constant 0 : index
    %c25_212 = arith.constant 25 : index
    %c0_213 = arith.constant 0 : index
    %214 = vector.load %arg5[%c0_210, %c0_211, %c25_212, %c0_213] : memref<1x8x32x32xf32, #tpu.memory_space<vmem>>, vector<1x8x1x32xf32>
    %215 = vector.shape_cast %214 : vector<1x8x1x32xf32> to vector<8x32xf32>
    %216 = vector.shape_cast %213 : vector<8x32xf32> to vector<1x8x1x32xf32>
    tpu.vector_store %arg5[%c0_210, %c0_211, %c25_212, %c0_213], %216 {strides = array<i32>} : memref<1x8x32x32xf32, #tpu.memory_space<vmem>>, vector<1x8x1x32xf32>,
    %217 = vector.extract_strided_slice %125 {offsets = [0, 416], sizes = [8, 32], strides = [1, 1]} : vector<8x512xf32> to vector<8x32xf32>
    %c0_214 = arith.constant 0 : index
    %c0_215 = arith.constant 0 : index
    %c27 = arith.constant 27 : index
    %c0_216 = arith.constant 0 : index
    %218 = vector.load %arg4[%c0_214, %c0_215, %c27, %c0_216] : memref<1x8x32x32xf32, #tpu.memory_space<vmem>>, vector<1x8x1x32xf32>
    %219 = vector.shape_cast %218 : vector<1x8x1x32xf32> to vector<8x32xf32>
    %220 = arith.addf %217, %219 : vector<8x32xf32>
    %c0_217 = arith.constant 0 : index
    %c0_218 = arith.constant 0 : index
    %c27_219 = arith.constant 27 : index
    %c0_220 = arith.constant 0 : index
    %221 = vector.load %arg5[%c0_217, %c0_218, %c27_219, %c0_220] : memref<1x8x32x32xf32, #tpu.memory_space<vmem>>, vector<1x8x1x32xf32>
    %222 = vector.shape_cast %221 : vector<1x8x1x32xf32> to vector<8x32xf32>
    %223 = vector.shape_cast %220 : vector<8x32xf32> to vector<1x8x1x32xf32>
    tpu.vector_store %arg5[%c0_217, %c0_218, %c27_219, %c0_220], %223 {strides = array<i32>} : memref<1x8x32x32xf32, #tpu.memory_space<vmem>>, vector<1x8x1x32xf32>,
    %224 = vector.extract_strided_slice %125 {offsets = [0, 448], sizes = [8, 32], strides = [1, 1]} : vector<8x512xf32> to vector<8x32xf32>
    %c0_221 = arith.constant 0 : index
    %c0_222 = arith.constant 0 : index
    %c29 = arith.constant 29 : index
    %c0_223 = arith.constant 0 : index
    %225 = vector.load %arg4[%c0_221, %c0_222, %c29, %c0_223] : memref<1x8x32x32xf32, #tpu.memory_space<vmem>>, vector<1x8x1x32xf32>
    %226 = vector.shape_cast %225 : vector<1x8x1x32xf32> to vector<8x32xf32>
    %227 = arith.addf %224, %226 : vector<8x32xf32>
    %c0_224 = arith.constant 0 : index
    %c0_225 = arith.constant 0 : index
    %c29_226 = arith.constant 29 : index
    %c0_227 = arith.constant 0 : index
    %228 = vector.load %arg5[%c0_224, %c0_225, %c29_226, %c0_227] : memref<1x8x32x32xf32, #tpu.memory_space<vmem>>, vector<1x8x1x32xf32>
    %229 = vector.shape_cast %228 : vector<1x8x1x32xf32> to vector<8x32xf32>
    %230 = vector.shape_cast %227 : vector<8x32xf32> to vector<1x8x1x32xf32>
    tpu.vector_store %arg5[%c0_224, %c0_225, %c29_226, %c0_227], %230 {strides = array<i32>} : memref<1x8x32x32xf32, #tpu.memory_space<vmem>>, vector<1x8x1x32xf32>,
    %231 = vector.extract_strided_slice %125 {offsets = [0, 480], sizes = [8, 32], strides = [1, 1]} : vector<8x512xf32> to vector<8x32xf32>
    %c0_228 = arith.constant 0 : index
    %c0_229 = arith.constant 0 : index
    %c31 = arith.constant 31 : index
    %c0_230 = arith.constant 0 : index
    %232 = vector.load %arg4[%c0_228, %c0_229, %c31, %c0_230] : memref<1x8x32x32xf32, #tpu.memory_space<vmem>>, vector<1x8x1x32xf32>
    %233 = vector.shape_cast %232 : vector<1x8x1x32xf32> to vector<8x32xf32>
    %234 = arith.addf %231, %233 : vector<8x32xf32>
    %c0_231 = arith.constant 0 : index
    %c0_232 = arith.constant 0 : index
    %c31_233 = arith.constant 31 : index
    %c0_234 = arith.constant 0 : index
    %235 = vector.load %arg5[%c0_231, %c0_232, %c31_233, %c0_234] : memref<1x8x32x32xf32, #tpu.memory_space<vmem>>, vector<1x8x1x32xf32>
    %236 = vector.shape_cast %235 : vector<1x8x1x32xf32> to vector<8x32xf32>
    %237 = vector.shape_cast %234 : vector<8x32xf32> to vector<1x8x1x32xf32>
    tpu.vector_store %arg5[%c0_231, %c0_232, %c31_233, %c0_234], %237 {strides = array<i32>} : memref<1x8x32x32xf32, #tpu.memory_space<vmem>>, vector<1x8x1x32xf32>,
    return
  }
  func.func @transform_0(%arg0: i32, %arg1: i32) -> (i32, i32, i32) {
    %c0_i32 = arith.constant 0 : i32
    %c0_i32_0 = arith.constant 0 : i32
    return %arg0, %c0_i32, %arg1 : i32, i32, i32
  }
  func.func @transform_1(%arg0: i32, %arg1: i32) -> (i32, i32) {
    %c0_i32 = arith.constant 0 : i32
    %c0_i32_0 = arith.constant 0 : i32
    %c0_i32_1 = arith.constant 0 : i32
    return %c0_i32, %c0_i32_0 : i32, i32
  }
  func.func @transform_2(%arg0: i32, %arg1: i32) -> (i32, i32, i32, i32) {
    %c0_i32 = arith.constant 0 : i32
    %c0_i32_0 = arith.constant 0 : i32
    %c0_i32_1 = arith.constant 0 : i32
    return %arg0, %c0_i32, %arg1, %c0_i32_0 : i32, i32, i32, i32
  }
  func.func @transform_3(%arg0: i32, %arg1: i32) -> (i32, i32, i32, i32) {
    %c0_i32 = arith.constant 0 : i32
    %c0_i32_0 = arith.constant 0 : i32
    %c0_i32_1 = arith.constant 0 : i32
    return %arg0, %c0_i32, %arg1, %c0_i32_0 : i32, i32, i32, i32
  }
}

module attributes {stable_mosaic.version = 11 : i64} {
  func.func @_matmul_kernel(%arg0: i32, %arg1: i32, %arg2: memref<1x4x256xf32, #tpu.memory_space<vmem>>, %arg3: memref<32x4xf32, #tpu.memory_space<vmem>>, %arg4: memref<1x32x256xf32, #tpu.memory_space<vmem>>) attributes {dimension_semantics = [#tpu.dimension_semantics<parallel>, #tpu.dimension_semantics<parallel>], iteration_bounds = array<i64: 2, 1>, scalar_prefetch = 0 : i64, scratch_operands = 0 : i64, tpu.core_type = #tpu.core_type<tc>, window_params = [{transform_indices = @transform_0, window_bounds = array<i64: 1, 4, 256>}, {pipeline_mode = #tpu.pipeline_mode<synchronous>, transform_indices = @transform_1, window_bounds = array<i64: 32, 4>}, {transform_indices = @transform_2, window_bounds = array<i64: 1, 32, 256>}]} {
    %c0 = arith.constant 0 : index
    %c0_0 = arith.constant 0 : index
    %0 = vector.load %arg3[%c0, %c0_0] : memref<32x4xf32, #tpu.memory_space<vmem>>, vector<32x4xf32>
    %c0_1 = arith.constant 0 : index
    %c0_2 = arith.constant 0 : index
    %c0_3 = arith.constant 0 : index
    %1 = vector.load %arg2[%c0_1, %c0_2, %c0_3] : memref<1x4x256xf32, #tpu.memory_space<vmem>>, vector<1x4x256xf32>
    %2 = vector.shape_cast %1 : vector<1x4x256xf32> to vector<4x256xf32>
    %cst = arith.constant dense<0.000000e+00> : vector<32x256xf32>
    %3 = tpu.matmul %0, %2, %cst {dimension_numbers = #tpu.dot_dimension_numbers<[1], [0], [0], [1], [0, 0, 1, 1], [], []>} : vector<32x4xf32>, vector<4x256xf32>, vector<32x256xf32> -> vector<32x256xf32>
    %c0_4 = arith.constant 0 : index
    %c0_5 = arith.constant 0 : index
    %c0_6 = arith.constant 0 : index
    %4 = vector.load %arg4[%c0_4, %c0_5, %c0_6] : memref<1x32x256xf32, #tpu.memory_space<vmem>>, vector<1x32x256xf32>
    %5 = vector.shape_cast %4 : vector<1x32x256xf32> to vector<32x256xf32>
    %6 = vector.shape_cast %3 : vector<32x256xf32> to vector<1x32x256xf32>
    tpu.vector_store %arg4[%c0_4, %c0_5, %c0_6], %6 {strides = array<i32>} : memref<1x32x256xf32, #tpu.memory_space<vmem>>, vector<1x32x256xf32>,
    return
  }
  func.func @transform_0(%arg0: i32, %arg1: i32) -> (i32, i32, i32) {
    %c0_i32 = arith.constant 0 : i32
    %c0_i32_0 = arith.constant 0 : i32
    return %arg0, %c0_i32, %arg1 : i32, i32, i32
  }
  func.func @transform_1(%arg0: i32, %arg1: i32) -> (i32, i32) {
    %c0_i32 = arith.constant 0 : i32
    %c0_i32_0 = arith.constant 0 : i32
    %c0_i32_1 = arith.constant 0 : i32
    return %c0_i32, %c0_i32_0 : i32, i32
  }
  func.func @transform_2(%arg0: i32, %arg1: i32) -> (i32, i32, i32) {
    %c0_i32 = arith.constant 0 : i32
    %c0_i32_0 = arith.constant 0 : i32
    return %arg0, %c0_i32, %arg1 : i32, i32, i32
  }
}

</mosaic_0001>

<bundles_post_ra>
// kernel: tpu_custom_call.1
= control target key start
LH: loop header
LB: loop body
LE: loop exit
PB: predicated region body
PF: predicated region fallthrough
CT: control target
= control target key end

     0   :  { %8 = vsyncpa [#allocation4], 0  ;;  %s7613_s0 = inlined_call_operand.vmem [shape: f32[2,4,256], index: 0, kind: input, shape index: {}]   ;;  %s7614_s1 = inlined_call_operand.vmem [shape: f32[32,4], index: 1, kind: input, shape index: {}]   ;;  %s7615_s2 = inlined_call_operand.hbm [shape: f32[2,8,32,32], index: 2, kind: input, shape index: {}]   ;;  %s7616_s3 = inlined_call_operand.hbm [shape: f32[2,8,32,32], index: 3, kind: output, shape index: {}]  }
   0x1   :  { %10 = vsyncpa [#allocation4 + $0x1], 0 }
   0x2   :  { %11 = vsyncpa [#allocation5], 0 }
   0x3   :  { %13 = vsyncpa [#allocation5 + $0x1], 0  ;;  %s5512_s12 = smov 0   ;;  %s5514_s13 = smov 0  }
   0x4   :  { %s5516_s14 = smov 0   ;;  %s5518_s15 = smov 0  }
   0x5   :  { %s5520_s16 = smov 0   ;;  %s5522_s17 = smov 0  }
   0x6 LB: > { %s5271_s18 = sadd.s32 4294967295, %s5479_s17   ;;  %s5272_s19 = sadd.s32 4294967294, %s5479_s17   ;;  %s5479_s17 = sphi %s5522_s17, %s19_s17   ;;  %s5475_s16 = sphi %s5520_s16, %s7627_s16   ;;  %s5471_s15 = sphi %s5518_s15, %s7626_s15   ;;  %s5467_s14 = sphi %s5516_s14, %s7625_s14   ;;  %s5463_s13 = sphi %s5514_s13, %s7624_s13   ;;  %s5459_s12 = sphi %s5512_s12, %s7623_s12  }
   0x7   : > { %s31_s20 = sadd.s32 1, %s5475_s16  ;;  %s89_s21 = sadd.s32 1, %s5467_s14 }
   0x8   : > { %p33_p0 = scmp.ge.s32.totalorder %s31_s20, 2  ;;  %p96_p1 = scmp.ne.s32.totalorder %s5467_s14, %s5463_s13 }
   0x9   : > { %p97_p2 = scmp.eq.s32.totalorder %s5479_s17, 0  ;;  %p102_p3 = scmp.ne.s32.totalorder %s5463_s13, %s5459_s12 }
   0xa   : > { %s7629_s20 = smov (%p33_p0, %s31_s20), 0  ;;  %p103_p5 = scmp.eq.s32.totalorder %s5271_s18, 0 }
   0xb   : > { %p5553_p4 = por %p97_p2, %p96_p1  ;;  %s84_s23 = ssub.s32 %s5475_s16, %s7629_s20 }
   0xc   : > { %p128_p6 = scmp.eq.s32.totalorder %s5271_s18, 1  ;;  %p87_p7 = scmp.eq.s32.totalorder %s84_s23, 0 }
   0xd   : > { %p5559_p8 = por %p103_p5, %p102_p3  ;;  %p134_p10 = scmp.eq.s32.totalorder %s5272_s19, 1 }
   0xe   : > { %p5563_p9 = por %p128_p6, %p96_p1  ;;  %p5311_p13 = scmp.lt.s32.totalorder %s5479_s17, 2 }
   0xf   : > { %s5568_s26 = scalar_select %p87_p7, %s5467_s14, %s89_s21  }
  0x10   : > { %p5570_p11 = por %p134_p10, %p102_p3  ;;  %s170_s28 = sand.u32 1, %s5467_s14  }
  0x11   : > { %s5275_s29 = sshll.u32 %s170_s28, 8  ;;  %s5294_s30 = sshll.u32 %s5475_s16, 12 }
  0x12   : > { %s182_s6 = scalar_lea.hbm %s7615_s2, %s5294_s30  ;;  %s174_s7 = scalar_lea.vmem [#allocation3], %s5275_s29 }
  0x13   : > { %s183_s8 = sshll.u32 %s174_s7, 4  ;;  %p5583_p0 = pnand %p5311_p13, %p5553_p4  ;;  %s184_s8 = int_to_ptr.vmem [resolvable:$true] %s183_s8 }
  0x14   : > { %p5278_p1 = scmp.ge.s32.totalorder %s5479_s17, 1  ;;  %s171_s10 = scalar_lea.sflag [#allocation4], %s170_s28 }
  0x15   : > { %p5373_p2 = pneg %p5583_p0  ;;  %s5384_s11 = scalar_lea.vmem %s184_s8, 4096 }
  0x16   : > { %p5385_p3 = scmp.ne.s32.totalorder %s184_s8, %s5384_s11  ;;  %s5481_s18 = smov [#allocation3]  }
  0x17   : > { %s5389_s19 = sshll.u32 %s5481_s18, 4  ;;  %s5390_s19 = int_to_ptr.vmem [resolvable:$false] %s5389_s19 }
  0x18   : > { %p5387_p5 = pnand %p5385_p3, %p5373_p2  ;;  %s5391_s21 = scalar_lea.vmem %s5390_s19, 8192 }
  0x19   : > { %p5392_p7 = scmp.lt.s32.totalorder %s184_s8, %s5390_s19  ;;  %p5393_p10 = scmp.lt.s32.totalorder %s5391_s21, %s5384_s11 }
  0x1a   : > { %p5388_p6 = pneg %p5387_p5 }
  0x1b   : > { %p5394_p12 = por %p5393_p10, %p5392_p7 }
  0x1d   : > { %p5395_p4 = pnand %p5394_p12, %p5388_p6 }
  0x1f   : > { %5398 = shalt.err (!%p5395_p4)
}
  0x20   : > { %s5482_s22 = smov 128   ;;  %s5483_s23 = smov 8  }
  0x21   : > { %5306 = dma.hbm_to_vmem [thread:$0]  (!%p5583_p0), %s182_s6, 4096, %s184_s8, %s171_s10, %s5482_s22, %s5482_s22, %s5483_s23  }
  0x22   : > { %p191_p13 = scmp.lt.s32.totalorder %s5479_s17, 3 }
  0x24   : > { %p192_p2 = pnand %p5278_p1, %p191_p13 }
  0x25   : > { %s5596_s28 = sand.u32 (!%p192_p2), 1, %s5463_s13  }
  0x26   : > { %195 = sbr.rel (%p192_p2) target bundleno = 2130 (0x852), region = 32  ;;  %s5279_s29 = sshll.u32 (!%p192_p2), %s5596_s28, 8 }
  0x27   : > { %s198_s30 = scalar_lea.sflag (!%p192_p2), [#allocation4], %s5596_s28  ;;  %s5602_s4 = scalar_lea.vmem (!%p192_p2), [#allocation3], %s5279_s29 }
  0x2b   : > { %5450 = dma.done.wait (%p5559_p8), %s198_s30, 4096  }
  0x2c   : > { %5452 = vsyncadd (%p5559_p8), %s198_s30, 4294963200  ;;  %p234_p12 = scmp.lt.s32.totalorder %s5471_s15, 1  ;;  %v5484_v0 = vmov 0.0   ;;  %vm265_vm0 = vcmask 1043456   ;;  %vm252_vm1 = vcmask 31744   ;;  %vm823_vm2 = vcmask 1041409  }
  0x2d   : > { %334 = vmatprep.mubr.f32.mxu0 %v5484_v0  ;;  %346 = vmatprep.mubr.f32.mxu1 %v5484_v0  ;;  %vm826_vm3 = vcmask 1042434   ;;  %vm829_vm4 = vcmask 1043459   ;;  %vm832_vm5 = vcmask 1044484   ;;  %v246_v3 = vld [vmem:[%s7614_s1] sm:$0xff]  ;;  %v248_v4 = vld [vmem:[%s7614_s1 + $0x10] sm:$0xff]  ;;  %vm835_vm6 = vcmask 1045509  }
  0x2e   : > { %s235_s5 = scalar_select %p234_p12, %s5471_s15, 1  ;;  %vm838_vm7 = vcmask 1046534   ;;  %v1208_v5 = vld [vmem:[%s5602_s4 + $0x6] sm:$0x1]  ;;  %v247_v12 = vld [vmem:[%s7614_s1 + $0x8] sm:$0xff]  ;;  %v249_v13 = vld [vmem:[%s7614_s1 + $0x18] sm:$0xff] }
  0x2f   : > { %v1209_v6 = vld [vmem:[%s5602_s4 + $0x26] sm:$0x1]  ;;  %v912_v22 = vld [vmem:[%s5602_s4 + $0x2] sm:$0x1]  ;;  %vm841_vm8 = vcmask 1047559   ;;  %s5485_s30 = smov 96  }
  0x30   : > { %s5295_s6 = sshll.u32 %s235_s5, 3  ;;  %v1210_v7 = vld [vmem:[%s5602_s4 + $0x46] sm:$0x1]  ;;  %v1224_v15 = vrot.slane %v1209_v6, 7  ;;  %v913_v24 = vld [vmem:[%s5602_s4 + $0x22] sm:$0x1] }
  0x31   : > { %s241_s9 = scalar_lea.vmem %s7613_s0, %s5295_s6  ;;  %v1211_v8 = vld [vmem:[%s5602_s4 + $0x66] sm:$0x1]  ;;  %v1226_v16 = vrot.slane %v1210_v7, 6  ;;  %v914_v25 = vld [vmem:[%s5602_s4 + $0x42] sm:$0x1]  ;;  %v928_v33 = vrot.slane %v913_v24, 7 }
  0x32   : > { %v245_v1 = vld [vmem:[%s241_s9] sm:$0xff]  ;;  %v1228_v17 = vrot.slane %v1211_v8, 5  ;;  %v1225_v23 = vsel %vm823_vm2, %v1224_v15, %v1208_v5  ;;  %v930_v34 = vrot.slane %v914_v25, 6  ;;  %v1602_v39 = vld [vmem:[%s5602_s4 + $0xc] sm:$0x1]  ;;  %s5486_s5 = smov 32  }
  0x33   : > { %v251_v2 = vcombine.high %v245_v1, %v245_v1  ;;  %v1212_v9 = vld [vmem:[%s5602_s4 + $0x86] sm:$0x1]  ;;  %v915_v26 = vld [vmem:[%s5602_s4 + $0x62] sm:$0x1]  ;;  %v1227_v27 = vsel %vm826_vm3, %v1226_v16, %v1225_v23  ;;  %v929_v41 = vsel %vm823_vm2, %v928_v33, %v912_v22  ;;  %v1603_v44 = vld [vmem:[%s5602_s4 + $0x2c] sm:$0x1] }
  0x34   : > { %v1213_v10 = vld [vmem:[%s5602_s4 + $0xa6] sm:$0x1]  ;;  %v1230_v18 = vrot.slane %v1212_v9, 4  ;;  %v916_v28 = vld [vmem:[%s5602_s4 + $0x82] sm:$0x1]  ;;  %v1229_v31 = vsel %vm829_vm4, %v1228_v17, %v1227_v27  ;;  %v932_v35 = vrot.slane %v915_v26, 5  ;;  %v931_v47 = vsel %vm826_vm3, %v930_v34, %v929_v41 }
  0x35   : > { %5283 = vmatprep.subr.msk.mxu0 %vm265_vm0, %v251_v2  ;;  %5297 = vmatprep.subr.msk.mxu1 %vm265_vm0, %v251_v2  ;;  %v1214_v11 = vld [vmem:[%s5602_s4 + $0xc6] sm:$0x1]  ;;  %v1232_v19 = vrot.slane %v1213_v10, 3  ;;  %v917_v29 = vld [vmem:[%s5602_s4 + $0xa2] sm:$0x1]  ;;  %v934_v37 = vrot.slane %v916_v28, 4 }
  0x36   : > { %5284 = vmatpush1.msk.msra.mxu0 %vm265_vm0, %v245_v1  ;;  %5298 = vmatpush1.msk.msra.mxu1 %vm265_vm0, %v245_v1  ;;  %v1215_v14 = vld [vmem:[%s5602_s4 + $0xe6] sm:$0x1]  ;;  %v1234_v20 = vrot.slane %v1214_v11, 2  ;;  %v918_v30 = vld [vmem:[%s5602_s4 + $0xc2] sm:$0x1]  ;;  %v1231_v36 = vsel %vm832_vm5, %v1230_v18, %v1229_v31  ;;  %v936_v38 = vrot.slane %v917_v29, 3  ;;  %v933_v52 = vsel %vm829_vm4, %v932_v35, %v931_v47 }
  0x37   : > { %5285 = vmatmul.mubr.msk.f32.vlgmr.msra.gmra.mxu0 %vm252_vm1, %v246_v3  ;;  %5287 = vmatmul.mubr.msk.f32.vlgmr.msra.gmra.mxu1 %vm252_vm1, %v248_v4  ;;  %v1236_v21 = vrot.slane %v1215_v14, 1  ;;  %v919_v32 = vld [vmem:[%s5602_s4 + $0xe2] sm:$0x1]  ;;  %v1233_v40 = vsel %vm835_vm6, %v1232_v19, %v1231_v36  ;;  %v938_v42 = vrot.slane %v918_v30, 2  ;;  %v1604_v45 = vld [vmem:[%s5602_s4 + $0x4c] sm:$0x1]  ;;  %v935_v57 = vsel %vm832_vm5, %v934_v37, %v933_v52 }
  0x38   : > { %340 = vmatprep.mubr.f32.mxu0 %v5484_v0  ;;  %352 = vmatprep.mubr.f32.mxu1 %v5484_v0  ;;  %v940_v43 = vrot.slane %v919_v32, 1  ;;  %v1235_v46 = vsel %vm838_vm7, %v1234_v20, %v1233_v40  ;;  %v1605_v48 = vld [vmem:[%s5602_s4 + $0x6c] sm:$0x1]  ;;  %v1618_v55 = vrot.slane %v1603_v44, 7  ;;  %v1620_v56 = vrot.slane %v1604_v45, 6  ;;  %s5487_s6 = smov 64  }
  0x39   : > { %v1606_v49 = vld [vmem:[%s5602_s4 + $0x8c] sm:$0x1]  ;;  %v1237_v51 = vsel %vm841_vm8, %v1236_v21, %v1235_v46  ;;  %v1622_v58 = vrot.slane %v1605_v48, 5  ;;  %v1060_v61 = vld [vmem:[%s5602_s4 + $0x4] sm:$0x1]  ;;  %v937_v62 = vsel %vm835_vm6, %v936_v38, %v935_v57  ;;  %vm903_vm9 = vcmask 253952  }
  0x3a   : > { %v1607_v50 = vld [vmem:[%s5602_s4 + $0xac] sm:$0x1]  ;;  %1238 = vrot.lane.b32.xlu1 %v1237_v51, %s5485_s30  ;;  %v1624_v59 = vrot.slane %v1606_v49, 4  ;;  %v1619_v63 = vsel %vm823_vm2, %v1618_v55, %v1602_v39  ;;  %v1061_v2 = vld [vmem:[%s5602_s4 + $0x24] sm:$0x1]  ;;  %v939_v4 = vsel %vm838_vm7, %v938_v42, %v937_v62  ;;  %s5859_s7 = scalar_lea.vmem [#allocation6], %s5279_s29 }
  0x3b   : > { %5286 = vmatmul.mubr.msk.f32.gmra.mxu0 %vm252_vm1, %v247_v12  ;;  %5288 = vmatmul.mubr.msk.f32.gmra.mxu1 %vm252_vm1, %v249_v13  ;;  %v1608_v53 = vld [vmem:[%s5602_s4 + $0xcc] sm:$0x1]  ;;  %v1626_v60 = vrot.slane %v1607_v50, 3  ;;  %v1062_v3 = vld [vmem:[%s5602_s4 + $0x44] sm:$0x1]  ;;  %v1621_v5 = vsel %vm826_vm3, %v1620_v56, %v1619_v63  ;;  %v941_v9 = vsel %vm841_vm8, %v940_v43, %v939_v4  ;;  %v1076_v13 = vrot.slane %v1061_v2, 7 }
  0x3c   : > { %v1609_v54 = vld [vmem:[%s5602_s4 + $0xec] sm:$0x1]  ;;  %v1628_v0 = vrot.slane %v1608_v53, 2  ;;  %v1063_v6 = vld [vmem:[%s5602_s4 + $0x64] sm:$0x1]  ;;  %v1623_v10 = vsel %vm829_vm4, %v1622_v58, %v1621_v5  ;;  %v1078_v14 = vrot.slane %v1062_v3, 6  ;;  %942 = vrot.lane.b32.xlu0 %v941_v9, %s5486_s5 }
  0x3d   : > { %v1630_v1 = vrot.slane %v1609_v54, 1  ;;  %v1064_v7 = vld [vmem:[%s5602_s4 + $0x84] sm:$0x1]  ;;  %v1625_v15 = vsel %vm832_vm5, %v1624_v59, %v1623_v10  ;;  %v1080_v16 = vrot.slane %v1063_v6, 5  ;;  %v1996_v19 = vld [vmem:[%s5602_s4 + $0x12] sm:$0x1]  ;;  %v1077_v21 = vsel %vm823_vm2, %v1076_v13, %v1060_v61 }
  0x3e   : > { %v1065_v8 = vld [vmem:[%s5602_s4 + $0xa4] sm:$0x1]  ;;  %v1082_v17 = vrot.slane %v1064_v7, 4  ;;  %v1627_v20 = vsel %vm835_vm6, %v1626_v60, %v1625_v15  ;;  %v1997_v24 = vld [vmem:[%s5602_s4 + $0x32] sm:$0x1]  ;;  %v1079_v27 = vsel %vm826_vm3, %v1078_v14, %v1077_v21  ;;  %s5296_s29 = sshll.u32 %s5471_s15, 12 }
  0x3f   : > { %v1066_v11 = vld [vmem:[%s5602_s4 + $0xc4] sm:$0x1]  ;;  %v1084_v18 = vrot.slane %v1065_v8, 3  ;;  %v1998_v25 = vld [vmem:[%s5602_s4 + $0x52] sm:$0x1]  ;;  %v1629_v26 = vsel %vm838_vm7, %v1628_v0, %v1627_v20  ;;  %v1081_v32 = vsel %vm829_vm4, %v1080_v16, %v1079_v27  ;;  %v2012_v35 = vrot.slane %v1997_v24, 7  ;;  %s7561_s24 = scalar_lea.hbm %s7616_s3, %s5296_s29 }
  0x40   : > { %v1067_v12 = vld [vmem:[%s5602_s4 + $0xe4] sm:$0x1]  ;;  %v1086_v22 = vrot.slane %v1066_v11, 2  ;;  %v1999_v28 = vld [vmem:[%s5602_s4 + $0x72] sm:$0x1]  ;;  %v1631_v31 = vsel %vm841_vm8, %v1630_v1, %v1629_v26  ;;  %v2014_v36 = vrot.slane %v1998_v25, 6  ;;  %v1083_v37 = vsel %vm832_vm5, %v1082_v17, %v1081_v32 }
  0x41   : > { %v1088_v23 = vrot.slane %v1067_v12, 1  ;;  %v2000_v29 = vld [vmem:[%s5602_s4 + $0x92] sm:$0x1]  ;;  %1632 = vrot.lane.b32.xlu1 %v1631_v31, %s5487_s6  ;;  %v2016_v38 = vrot.slane %v1999_v28, 5  ;;  %v1454_v41 = vld [vmem:[%s5602_s4 + $0xa] sm:$0x1]  ;;  %v1085_v42 = vsel %vm835_vm6, %v1084_v18, %v1083_v37  ;;  %v2013_v43 = vsel %vm823_vm2, %v2012_v35, %v1996_v19 }
  0x42   : > { %v2001_v30 = vld [vmem:[%s5602_s4 + $0xb2] sm:$0x1]  ;;  %v2018_v39 = vrot.slane %v2000_v29, 4  ;;  %v1455_v46 = vld [vmem:[%s5602_s4 + $0x2a] sm:$0x1]  ;;  %v1087_v48 = vsel %vm838_vm7, %v1086_v22, %v1085_v42  ;;  %v2015_v49 = vsel %vm826_vm3, %v2014_v36, %v2013_v43  ;;  %s5151_s15 = scalar_lea.sflag [#allocation5], %s5596_s28 }
  0x43   : > { %v2002_v33 = vld [vmem:[%s5602_s4 + $0xd2] sm:$0x1]  ;;  %v2020_v40 = vrot.slane %v2001_v30, 3  ;;  %v1456_v47 = vld [vmem:[%s5602_s4 + $0x4a] sm:$0x1]  ;;  %v1089_v53 = vsel %vm841_vm8, %v1088_v23, %v1087_v48  ;;  %v2017_v54 = vsel %vm829_vm4, %v2016_v38, %v2015_v49  ;;  %v1470_v57 = vrot.slane %v1455_v46, 7 }
  0x44   : > { %v2003_v34 = vld [vmem:[%s5602_s4 + $0xf2] sm:$0x1]  ;;  %v2022_v44 = vrot.slane %v2002_v33, 2  ;;  %v1457_v50 = vld [vmem:[%s5602_s4 + $0x6a] sm:$0x1]  ;;  %v1472_v58 = vrot.slane %v1456_v47, 6  ;;  %1090 = vrot.lane.b32.xlu0 %v1089_v53, %s5487_s6  ;;  %v2019_v59 = vsel %vm832_vm5, %v2018_v39, %v2017_v54 }
  0x45   : > { %v2024_v45 = vrot.slane %v2003_v34, 1  ;;  %v1458_v51 = vld [vmem:[%s5602_s4 + $0x8a] sm:$0x1]  ;;  %v1474_v60 = vrot.slane %v1457_v50, 5  ;;  %v2292_v63 = vld [vmem:[%s5602_s4 + $0x16] sm:$0x1]  ;;  %v2021_v0 = vsel %vm835_vm6, %v2020_v40, %v2019_v59  ;;  %v1471_v1 = vsel %vm823_vm2, %v1470_v57, %v1454_v41 }
  0x46   : > { %v1459_v52 = vld [vmem:[%s5602_s4 + $0xaa] sm:$0x1]  ;;  %v1476_v61 = vrot.slane %v1458_v51, 4  ;;  %v2293_v4 = vld [vmem:[%s5602_s4 + $0x36] sm:$0x1]  ;;  %v2023_v6 = vsel %vm838_vm7, %v2022_v44, %v2021_v0  ;;  %v1473_v7 = vsel %vm826_vm3, %v1472_v58, %v1471_v1  ;;  %s5489_s11 = smov [#allocation6]  }
  0x47   : > { %v1460_v55 = vld [vmem:[%s5602_s4 + $0xca] sm:$0x1]  ;;  %v1478_v62 = vrot.slane %v1459_v52, 3  ;;  %v2294_v5 = vld [vmem:[%s5602_s4 + $0x56] sm:$0x1]  ;;  %v2025_v11 = vsel %vm841_vm8, %v2024_v45, %v2023_v6  ;;  %v1475_v12 = vsel %vm829_vm4, %v1474_v60, %v1473_v7  ;;  %v2308_v15 = vrot.slane %v2293_v4, 7 }
  0x48   : > { %v1461_v56 = vld [vmem:[%s5602_s4 + $0xea] sm:$0x1]  ;;  %v1480_v2 = vrot.slane %v1460_v55, 2  ;;  %v2295_v8 = vld [vmem:[%s5602_s4 + $0x76] sm:$0x1]  ;;  %v2310_v16 = vrot.slane %v2294_v5, 6  ;;  %2026 = vrot.lane.b32.xlu1 %v2025_v11, %s5486_s5  ;;  %v1477_v17 = vsel %vm832_vm5, %v1476_v61, %v1475_v12 }
  0x49   : > { %v1482_v3 = vrot.slane %v1461_v56, 1  ;;  %v2296_v9 = vld [vmem:[%s5602_s4 + $0x96] sm:$0x1]  ;;  %v2312_v18 = vrot.slane %v2295_v8, 5  ;;  %v1750_v21 = vld [vmem:[%s5602_s4 + $0xe] sm:$0x1]  ;;  %v1479_v22 = vsel %vm835_vm6, %v1478_v62, %v1477_v17  ;;  %v2309_v23 = vsel %vm823_vm2, %v2308_v15, %v2292_v63 }
  0x4a   : > { %v2297_v10 = vld [vmem:[%s5602_s4 + $0xb6] sm:$0x1]  ;;  %v2314_v19 = vrot.slane %v2296_v9, 4  ;;  %v1751_v26 = vld [vmem:[%s5602_s4 + $0x2e] sm:$0x1]  ;;  %v1481_v28 = vsel %vm838_vm7, %v1480_v2, %v1479_v22  ;;  %v2311_v29 = vsel %vm826_vm3, %v2310_v16, %v2309_v23  ;;  %s5403_s18 = sshll.u32 %s5489_s11, 4  ;;  %s5404_s18 = int_to_ptr.vmem [resolvable:$false] %s5403_s18 }
  0x4b   : > { %v2298_v13 = vld [vmem:[%s5602_s4 + $0xd6] sm:$0x1]  ;;  %v2316_v20 = vrot.slane %v2297_v10, 3  ;;  %v1752_v27 = vld [vmem:[%s5602_s4 + $0x4e] sm:$0x1]  ;;  %v1483_v33 = vsel %vm841_vm8, %v1482_v3, %v1481_v28  ;;  %v2313_v34 = vsel %vm829_vm4, %v2312_v18, %v2311_v29  ;;  %v1766_v37 = vrot.slane %v1751_v26, 7 }
  0x4c   : > { %v2299_v14 = vld [vmem:[%s5602_s4 + $0xf6] sm:$0x1]  ;;  %v2318_v24 = vrot.slane %v2298_v13, 2  ;;  %v1753_v30 = vld [vmem:[%s5602_s4 + $0x6e] sm:$0x1]  ;;  %v1768_v38 = vrot.slane %v1752_v27, 6  ;;  %1484 = vrot.lane.b32.xlu0 %v1483_v33, %s5486_s5  ;;  %v2315_v39 = vsel %vm832_vm5, %v2314_v19, %v2313_v34 }
  0x4d   : > { %v2320_v25 = vrot.slane %v2299_v14, 1  ;;  %v1754_v31 = vld [vmem:[%s5602_s4 + $0x8e] sm:$0x1]  ;;  %v1770_v40 = vrot.slane %v1753_v30, 5  ;;  %v2144_v43 = vld [vmem:[%s5602_s4 + $0x14] sm:$0x1]  ;;  %v2317_v44 = vsel %vm835_vm6, %v2316_v20, %v2315_v39  ;;  %v1767_v45 = vsel %vm823_vm2, %v1766_v37, %v1750_v21 }
  0x4e   : > { %v1755_v32 = vld [vmem:[%s5602_s4 + $0xae] sm:$0x1]  ;;  %v1772_v41 = vrot.slane %v1754_v31, 4  ;;  %v2145_v48 = vld [vmem:[%s5602_s4 + $0x34] sm:$0x1]  ;;  %v2319_v50 = vsel %vm838_vm7, %v2318_v24, %v2317_v44  ;;  %v1769_v51 = vsel %vm826_vm3, %v1768_v38, %v1767_v45  ;;  %s5405_s19 = scalar_lea.vmem %s5404_s18, 8192 }
  0x4f   : > { %v1756_v35 = vld [vmem:[%s5602_s4 + $0xce] sm:$0x1]  ;;  %v1774_v42 = vrot.slane %v1755_v32, 3  ;;  %v2146_v49 = vld [vmem:[%s5602_s4 + $0x54] sm:$0x1]  ;;  %v2321_v55 = vsel %vm841_vm8, %v2320_v25, %v2319_v50  ;;  %v1771_v56 = vsel %vm829_vm4, %v1770_v40, %v1769_v51  ;;  %v2160_v59 = vrot.slane %v2145_v48, 7 }
  0x50   : > { %v1757_v36 = vld [vmem:[%s5602_s4 + $0xee] sm:$0x1]  ;;  %v1776_v46 = vrot.slane %v1756_v35, 2  ;;  %v2147_v52 = vld [vmem:[%s5602_s4 + $0x74] sm:$0x1]  ;;  %v2162_v60 = vrot.slane %v2146_v49, 6  ;;  %2322 = vrot.lane.b32.xlu1 %v2321_v55, %s5485_s30  ;;  %v1773_v61 = vsel %vm832_vm5, %v1772_v41, %v1771_v56 }
  0x51   : > { %v1778_v47 = vrot.slane %v1757_v36, 1  ;;  %v2148_v53 = vld [vmem:[%s5602_s4 + $0x94] sm:$0x1]  ;;  %v2164_v62 = vrot.slane %v2147_v52, 5  ;;  %v2538_v1 = vld [vmem:[%s5602_s4 + $0x1a] sm:$0x1]  ;;  %v1775_v2 = vsel %vm835_vm6, %v1774_v42, %v1773_v61  ;;  %v2161_v3 = vsel %vm823_vm2, %v2160_v59, %v2144_v43 }
  0x52   : > { %v2149_v54 = vld [vmem:[%s5602_s4 + $0xb4] sm:$0x1]  ;;  %v2166_v63 = vrot.slane %v2148_v53, 4  ;;  %v2539_v6 = vld [vmem:[%s5602_s4 + $0x3a] sm:$0x1]  ;;  %v1777_v8 = vsel %vm838_vm7, %v1776_v46, %v1775_v2  ;;  %v2163_v9 = vsel %vm826_vm3, %v2162_v60, %v2161_v3 }
  0x53   : > { %v2150_v57 = vld [vmem:[%s5602_s4 + $0xd4] sm:$0x1]  ;;  %v2168_v0 = vrot.slane %v2149_v54, 3  ;;  %v2540_v7 = vld [vmem:[%s5602_s4 + $0x5a] sm:$0x1]  ;;  %v1779_v13 = vsel %vm841_vm8, %v1778_v47, %v1777_v8  ;;  %v2165_v14 = vsel %vm829_vm4, %v2164_v62, %v2163_v9  ;;  %v2554_v16 = vrot.slane %v2539_v6, 7 }
  0x54   : > { %v2151_v58 = vld [vmem:[%s5602_s4 + $0xf4] sm:$0x1]  ;;  %v2170_v4 = vrot.slane %v2150_v57, 2  ;;  %v2541_v10 = vld [vmem:[%s5602_s4 + $0x7a] sm:$0x1]  ;;  %v2556_v17 = vrot.slane %v2540_v7, 6  ;;  %1780 = vrot.lane.b32.xlu0 %v1779_v13, %s5485_s30  ;;  %v2167_v18 = vsel %vm832_vm5, %v2166_v63, %v2165_v14 }
  0x55   : > { %v2172_v5 = vrot.slane %v2151_v58, 1  ;;  %v2542_v11 = vld [vmem:[%s5602_s4 + $0x9a] sm:$0x1]  ;;  %v2558_v20 = vrot.slane %v2541_v10, 5  ;;  %v2169_v22 = vsel %vm835_vm6, %v2168_v0, %v2167_v18  ;;  %v2555_v23 = vsel %vm823_vm2, %v2554_v16, %v2538_v1 }
  0x56   : > { %v2543_v12 = vld [vmem:[%s5602_s4 + $0xba] sm:$0x1]  ;;  %v2560_v21 = vrot.slane %v2542_v11, 4  ;;  %v2171_v25 = vsel %vm838_vm7, %v2170_v4, %v2169_v22  ;;  %v2557_v26 = vsel %vm826_vm3, %v2556_v17, %v2555_v23 }
  0x57   : > { %v2544_v15 = vld [vmem:[%s5602_s4 + $0xda] sm:$0x1]  ;;  %v2562_v24 = vrot.slane %v2543_v12, 3  ;;  %v2173_v28 = vsel %vm841_vm8, %v2172_v5, %v2171_v25  ;;  %v2559_v29 = vsel %vm829_vm4, %v2558_v20, %v2557_v26 }
  0x58   : > { %v2545_v19 = vld [vmem:[%s5602_s4 + $0xfa] sm:$0x1]  ;;  %v2564_v27 = vrot.slane %v2544_v15, 2  ;;  %2174 = vrot.lane.b32.xlu0 %v2173_v28, %s5487_s6  ;;  %v2561_v31 = vsel %vm832_vm5, %v2560_v21, %v2559_v29 }
  0x59   : > { %v2566_v30 = vrot.slane %v2545_v19, 1  ;;  %v2563_v32 = vsel %vm835_vm6, %v2562_v24, %v2561_v31 }
  0x5a   : > { %v2565_v33 = vsel %vm838_vm7, %v2564_v27, %v2563_v32 }
  0x5b   : > { %v2567_v34 = vsel %vm841_vm8, %v2566_v30, %v2565_v33 }
  0x5c   : > { %2568 = vrot.lane.b32.xlu0 %v2567_v34, %s5486_s5 }
  0xac   : > { %v5799_v46 = vpop.permute.xlu1 %1238 }
  0xae   : > { %v5793_v43 = vpop.permute.xlu0 %942 }
  0xb3   : > { %v5803_v48 = vpop.permute.xlu1 %1632 }
  0xb6   : > { %v5795_v44 = vpop.permute.xlu0 %1090 }
  0xba   : > { %v5807_v50 = vpop.permute.xlu1 %2026 }
  0xbe   : > { %v5797_v45 = vpop.permute.xlu0 %1484 }
  0xc2   : > { %v5811_v52 = vpop.permute.xlu1 %2322 }
  0xc6   : > { %v5801_v47 = vpop.permute.xlu0 %1780 }
  0xca   : > { %v5805_v49 = vpop.permute.xlu0 %2174 }
  0xce   : > { %v5809_v51 = vpop.permute.xlu0 %2568 }
  0xf7   : > { %v336_v35 = vpop.f32.mrf.mxu0  ;;  %v348_v39 = vpop.f32.mrf.mxu1 }
  0xf8   : > { %359 = vxpose.xlu0.b32.start [1/2] (short) %v336_v35, 128 }
  0xf9   : > { %v338_v36 = vpop.f32.mrf.mxu0  ;;  %v350_v40 = vpop.f32.mrf.mxu1 }
  0xfa   : > { %391 = vxpose.xlu1.b32.start [1/2] (short) %v338_v36, 128 }
  0xfb   : > { %v342_v37 = vpop.f32.mrf.mxu0  ;;  %v354_v41 = vpop.f32.mrf.mxu1 }
  0xfc   : > { %360 = vxpose.xlu0.b32.end [2/2] (short) %v342_v37, 128 }
  0xfd   : > { %v344_v38 = vpop.f32.mrf.mxu0  ;;  %v356_v42 = vpop.f32.mrf.mxu1 }
  0xfe   : > { %392 = vxpose.xlu1.b32.end [2/2] (short) %v344_v38, 128 }
 0x135   : > { %486 = vxpose.xlu0.b32.start [1/2] (short) %v348_v39, 128 }
 0x137   : > { %518 = vxpose.xlu1.b32.start [1/2] (short) %v350_v40, 128 }
 0x139   : > { %487 = vxpose.xlu0.b32.end [2/2] (short) %v354_v41, 128 }
 0x13b   : > { %519 = vxpose.xlu1.b32.end [2/2] (short) %v356_v42, 128 }
 0x174   : > { %v375_v53 = vpop.trf.xlu0 }
 0x175   : > { %423 = vst [vmem:[#allocation2] ss:$2 sm:$0xff] %v375_v53 }
 0x176   : > { %v407_v54 = vpop.trf.xlu1 }
 0x177   : > { %455 = vst [vmem:[#allocation2 + $0x100] ss:$2 sm:$0xff] %v407_v54 }
 0x178   : > { %v376_v55 = vpop.trf.xlu0 }
 0x179   : > { %425 = vst [vmem:[#allocation2 + $0x10] ss:$2 sm:$0xff] %v376_v55 }
 0x17a   : > { %v408_v56 = vpop.trf.xlu1 }
 0x17b   : > { %457 = vst [vmem:[#allocation2 + $0x110] ss:$2 sm:$0xff] %v408_v56 }
 0x17c   : > { %v377_v57 = vpop.trf.xlu0 }
 0x17d   : > { %427 = vst [vmem:[#allocation2 + $0x20] ss:$2 sm:$0xff] %v377_v57 }
 0x17e   : > { %v409_v58 = vpop.trf.xlu1 }
 0x17f   : > { %459 = vst [vmem:[#allocation2 + $0x120] ss:$2 sm:$0xff] %v409_v58 }
 0x180   : > { %v378_v59 = vpop.trf.xlu0 }
 0x181   : > { %429 = vst [vmem:[#allocation2 + $0x30] ss:$2 sm:$0xff] %v378_v59 }
 0x182   : > { %v410_v60 = vpop.trf.xlu1 }
 0x183   : > { %461 = vst [vmem:[#allocation2 + $0x130] ss:$2 sm:$0xff] %v410_v60 }
 0x184   : > { %v379_v61 = vpop.trf.xlu0 }
 0x185   : > { %431 = vst [vmem:[#allocation2 + $0x40] ss:$2 sm:$0xff] %v379_v61 }
 0x186   : > { %v411_v62 = vpop.trf.xlu1 }
 0x187   : > { %463 = vst [vmem:[#allocation2 + $0x140] ss:$2 sm:$0xff] %v411_v62 }
 0x188   : > { %v380_v63 = vpop.trf.xlu0 }
 0x189   : > { %433 = vst [vmem:[#allocation2 + $0x50] ss:$2 sm:$0xff] %v380_v63 }
 0x18a   : > { %v412_v0 = vpop.trf.xlu1 }
 0x18b   : > { %465 = vst [vmem:[#allocation2 + $0x150] ss:$2 sm:$0xff] %v412_v0 }
 0x18c   : > { %v381_v1 = vpop.trf.xlu0 }
 0x18d   : > { %435 = vst [vmem:[#allocation2 + $0x60] ss:$2 sm:$0xff] %v381_v1 }
 0x18e   : > { %v413_v2 = vpop.trf.xlu1 }
 0x18f   : > { %467 = vst [vmem:[#allocation2 + $0x160] ss:$2 sm:$0xff] %v413_v2 }
 0x190   : > { %v382_v3 = vpop.trf.xlu0 }
 0x191   : > { %437 = vst [vmem:[#allocation2 + $0x70] ss:$2 sm:$0xff] %v382_v3 }
 0x192   : > { %v414_v4 = vpop.trf.xlu1 }
 0x193   : > { %469 = vst [vmem:[#allocation2 + $0x170] ss:$2 sm:$0xff] %v414_v4 }
 0x194   : > { %v383_v5 = vpop.trf.xlu0 }
 0x195   : > { %439 = vst [vmem:[#allocation2 + $0x80] ss:$2 sm:$0xff] %v383_v5 }
 0x196   : > { %v415_v6 = vpop.trf.xlu1 }
 0x197   : > { %471 = vst [vmem:[#allocation2 + $0x180] ss:$2 sm:$0xff] %v415_v6 }
 0x198   : > { %v384_v7 = vpop.trf.xlu0 }
 0x199   : > { %441 = vst [vmem:[#allocation2 + $0x90] ss:$2 sm:$0xff] %v384_v7 }
 0x19a   : > { %v416_v8 = vpop.trf.xlu1 }
 0x19b   : > { %473 = vst [vmem:[#allocation2 + $0x190] ss:$2 sm:$0xff] %v416_v8 }
 0x19c   : > { %v385_v9 = vpop.trf.xlu0 }
 0x19d   : > { %443 = vst [vmem:[#allocation2 + $0xa0] ss:$2 sm:$0xff] %v385_v9 }
 0x19e   : > { %v417_v10 = vpop.trf.xlu1 }
 0x19f   : > { %475 = vst [vmem:[#allocation2 + $0x1a0] ss:$2 sm:$0xff] %v417_v10 }
 0x1a0   : > { %v386_v11 = vpop.trf.xlu0 }
 0x1a1   : > { %445 = vst [vmem:[#allocation2 + $0xb0] ss:$2 sm:$0xff] %v386_v11 }
 0x1a2   : > { %v418_v12 = vpop.trf.xlu1 }
 0x1a3   : > { %477 = vst [vmem:[#allocation2 + $0x1b0] ss:$2 sm:$0xff] %v418_v12 }
 0x1a4   : > { %v387_v13 = vpop.trf.xlu0 }
 0x1a5   : > { %447 = vst [vmem:[#allocation2 + $0xc0] ss:$2 sm:$0xff] %v387_v13 }
 0x1a6   : > { %v419_v14 = vpop.trf.xlu1 }
 0x1a7   : > { %479 = vst [vmem:[#allocation2 + $0x1c0] ss:$2 sm:$0xff] %v419_v14 }
 0x1a8   : > { %v388_v15 = vpop.trf.xlu0 }
 0x1a9   : > { %449 = vst [vmem:[#allocation2 + $0xd0] ss:$2 sm:$0xff] %v388_v15 }
 0x1aa   : > { %v420_v16 = vpop.trf.xlu1 }
 0x1ab   : > { %481 = vst [vmem:[#allocation2 + $0x1d0] ss:$2 sm:$0xff] %v420_v16 }
 0x1ac   : > { %v389_v17 = vpop.trf.xlu0 }
 0x1ad   : > { %451 = vst [vmem:[#allocation2 + $0xe0] ss:$2 sm:$0xff] %v389_v17 }
 0x1ae   : > { %v421_v18 = vpop.trf.xlu1 }
 0x1af   : > { %483 = vst [vmem:[#allocation2 + $0x1e0] ss:$2 sm:$0xff] %v421_v18 }
 0x1b0   : > { %v390_v19 = vpop.trf.xlu0 }
 0x1b1   : > { %453 = vst [vmem:[#allocation2 + $0xf0] ss:$2 sm:$0xff] %v390_v19 }
 0x1b2   : > { %v422_v20 = vpop.trf.xlu1 }
 0x1b3   : > { %485 = vst [vmem:[#allocation2 + $0x1f0] ss:$2 sm:$0xff] %v422_v20 }
 0x1b4   : > { %v502_v21 = vpop.trf.xlu0 }
 0x1b5   : > { %551 = vst [vmem:[#allocation2 + $0x1] ss:$2 sm:$0xff] %v502_v21 }
 0x1b6   : > { %v534_v22 = vpop.trf.xlu1 }
 0x1b7   : > { %583 = vst [vmem:[#allocation2 + $0x101] ss:$2 sm:$0xff] %v534_v22 }
 0x1b8   : > { %v503_v23 = vpop.trf.xlu0 }
 0x1b9   : > { %553 = vst [vmem:[#allocation2 + $0x11] ss:$2 sm:$0xff] %v503_v23 }
 0x1ba   : > { %v535_v24 = vpop.trf.xlu1 }
 0x1bb   : > { %585 = vst [vmem:[#allocation2 + $0x111] ss:$2 sm:$0xff] %v535_v24 }
 0x1bc   : > { %v504_v25 = vpop.trf.xlu0  ;;  %v614_v26 = vld [vmem:[#allocation2] sm:$0xff]  ;;  %v615_v29 = vld [vmem:[#allocation2 + $0x8] sm:$0xff] }
 0x1bd   : > { %555 = vst [vmem:[#allocation2 + $0x21] ss:$2 sm:$0xff] %v504_v25  ;;  %678 = vxpose.xlu0.b32.start [1/16] (narrow) %v614_v26, 16 }
 0x1be   : > { %v536_v27 = vpop.trf.xlu1  ;;  %v646_v24 = vld [vmem:[#allocation2 + $0x100] sm:$0xff]  ;;  %v647_v26 = vld [vmem:[#allocation2 + $0x108] sm:$0xff] }
 0x1bf   : > { %587 = vst [vmem:[#allocation2 + $0x121] ss:$2 sm:$0xff] %v536_v27 }
 0x1c0   : > { %v505_v28 = vpop.trf.xlu0  ;;  %v616_v32 = vld [vmem:[#allocation2 + $0x10] sm:$0xff]  ;;  %v617_v35 = vld [vmem:[#allocation2 + $0x18] sm:$0xff] }
 0x1c1   : > { %557 = vst [vmem:[#allocation2 + $0x31] ss:$2 sm:$0xff] %v505_v28  ;;  %679 = vxpose.xlu0.b32.cont [2/16] (narrow) %v615_v29, 16 }
 0x1c2   : > { %v537_v30 = vpop.trf.xlu1  ;;  %v648_v28 = vld [vmem:[#allocation2 + $0x110] sm:$0xff] }
 0x1c3   : > { %589 = vst [vmem:[#allocation2 + $0x131] ss:$2 sm:$0xff] %v537_v30  ;;  %v649_v30 = vld [vmem:[#allocation2 + $0x118] sm:$0xff] }
 0x1c4   : > { %v506_v31 = vpop.trf.xlu0  ;;  %v618_v38 = vld [vmem:[#allocation2 + $0x20] sm:$0xff]  ;;  %v619_v41 = vld [vmem:[#allocation2 + $0x28] sm:$0xff] }
 0x1c5   : > { %559 = vst [vmem:[#allocation2 + $0x41] ss:$2 sm:$0xff] %v506_v31  ;;  %680 = vxpose.xlu0.b32.cont [3/16] (narrow) %v616_v32, 16 }
 0x1c6   : > { %v538_v33 = vpop.trf.xlu1  ;;  %v650_v32 = vld [vmem:[#allocation2 + $0x120] sm:$0xff] }
 0x1c7   : > { %591 = vst [vmem:[#allocation2 + $0x141] ss:$2 sm:$0xff] %v538_v33 }
 0x1c8   : > { %v507_v34 = vpop.trf.xlu0  ;;  %v620_v54 = vld [vmem:[#allocation2 + $0x30] sm:$0xff]  ;;  %v621_v57 = vld [vmem:[#allocation2 + $0x38] sm:$0xff] }
 0x1c9   : > { %561 = vst [vmem:[#allocation2 + $0x51] ss:$2 sm:$0xff] %v507_v34  ;;  %681 = vxpose.xlu0.b32.cont [4/16] (narrow) %v617_v35, 16  ;;  %v651_v34 = vld [vmem:[#allocation2 + $0x128] sm:$0xff] }
 0x1ca   : > { %v539_v36 = vpop.trf.xlu1 }
 0x1cb   : > { %593 = vst [vmem:[#allocation2 + $0x151] ss:$2 sm:$0xff] %v539_v36  ;;  %v652_v36 = vld [vmem:[#allocation2 + $0x130] sm:$0xff] }
 0x1cc   : > { %v508_v37 = vpop.trf.xlu0  ;;  %v622_v60 = vld [vmem:[#allocation2 + $0x40] sm:$0xff]  ;;  %v623_v0 = vld [vmem:[#allocation2 + $0x48] sm:$0xff] }
 0x1cd   : > { %563 = vst [vmem:[#allocation2 + $0x61] ss:$2 sm:$0xff] %v508_v37  ;;  %682 = vxpose.xlu0.b32.cont [5/16] (narrow) %v618_v38, 16  ;;  %v653_v38 = vld [vmem:[#allocation2 + $0x138] sm:$0xff] }
 0x1ce   : > { %v540_v39 = vpop.trf.xlu1 }
 0x1cf   : > { %595 = vst [vmem:[#allocation2 + $0x161] ss:$2 sm:$0xff] %v540_v39  ;;  %v654_v39 = vld [vmem:[#allocation2 + $0x140] sm:$0xff] }
 0x1d0   : > { %v509_v40 = vpop.trf.xlu0  ;;  %v624_v4 = vld [vmem:[#allocation2 + $0x50] sm:$0xff]  ;;  %v625_v8 = vld [vmem:[#allocation2 + $0x58] sm:$0xff] }
 0x1d1   : > { %565 = vst [vmem:[#allocation2 + $0x71] ss:$2 sm:$0xff] %v509_v40  ;;  %683 = vxpose.xlu0.b32.cont [6/16] (narrow) %v619_v41, 16  ;;  %v807_v41 = vld [vmem:[%s5602_s4 + $0x20] sm:$0x1] }
 0x1d2   : > { %v541_v42 = vpop.trf.xlu1 }
 0x1d3   : > { %597 = vst [vmem:[#allocation2 + $0x171] ss:$2 sm:$0xff] %v541_v42  ;;  %v655_v42 = vld [vmem:[#allocation2 + $0x148] sm:$0xff] }
 0x1d4   : > { %v510_v53 = vpop.trf.xlu0  ;;  %v626_v12 = vld [vmem:[#allocation2 + $0x60] sm:$0xff]  ;;  %v627_v16 = vld [vmem:[#allocation2 + $0x68] sm:$0xff] }
 0x1d5   : > { %567 = vst [vmem:[#allocation2 + $0x81] ss:$2 sm:$0xff] %v510_v53  ;;  %684 = vxpose.xlu0.b32.cont [7/16] (narrow) %v620_v54, 16  ;;  %v808_v54 = vld [vmem:[%s5602_s4 + $0x40] sm:$0x1] }
 0x1d6   : > { %v542_v55 = vpop.trf.xlu1 }
 0x1d7   : > { %599 = vst [vmem:[#allocation2 + $0x181] ss:$2 sm:$0xff] %v542_v55  ;;  %v822_v55 = vrot.slane %v807_v41, 7 }
 0x1d8   : > { %v511_v56 = vpop.trf.xlu0  ;;  %v628_v19 = vld [vmem:[#allocation2 + $0x70] sm:$0xff]  ;;  %v629_v21 = vld [vmem:[#allocation2 + $0x78] sm:$0xff] }
 0x1d9   : > { %569 = vst [vmem:[#allocation2 + $0x91] ss:$2 sm:$0xff] %v511_v56  ;;  %685 = vxpose.xlu0.b32.cont [8/16] (narrow) %v621_v57, 16  ;;  %v806_v56 = vld [vmem:[%s5602_s4] sm:$0x1]  ;;  %v656_v57 = vld [vmem:[#allocation2 + $0x150] sm:$0xff] }
 0x1da   : > { %v543_v58 = vpop.trf.xlu1 }
 0x1db   : > { %601 = vst [vmem:[#allocation2 + $0x191] ss:$2 sm:$0xff] %v543_v58 }
 0x1dc   : > { %v512_v59 = vpop.trf.xlu0  ;;  %v630_v61 = vld [vmem:[#allocation2 + $0x80] sm:$0xff]  ;;  %v631_v1 = vld [vmem:[#allocation2 + $0x88] sm:$0xff] }
 0x1dd   : > { %571 = vst [vmem:[#allocation2 + $0xa1] ss:$2 sm:$0xff] %v512_v59  ;;  %686 = vxpose.xlu0.b32.cont [9/16] (narrow) %v622_v60, 16  ;;  %710 = vxpose.xlu1.b32.start [1/16] (narrow) %v630_v61, 16  ;;  %v809_v59 = vld [vmem:[%s5602_s4 + $0x60] sm:$0x1]  ;;  %v824_v61 = vsel %vm823_vm2, %v822_v55, %v806_v56 }
 0x1de   : > { %v544_v62 = vpop.trf.xlu1  ;;  %v662_v40 = vld [vmem:[#allocation2 + $0x180] sm:$0xff]  ;;  %v663_v53 = vld [vmem:[#allocation2 + $0x188] sm:$0xff]  ;;  %v825_v60 = vrot.slane %v808_v54, 6  ;;  %v661_v54 = vld [vmem:[#allocation2 + $0x178] sm:$0xff] }
 0x1df   : > { %603 = vst [vmem:[#allocation2 + $0x1a1] ss:$2 sm:$0xff] %v544_v62  ;;  %v2983_v62 = vld [vmem:[%s5602_s4 + $0x21] sm:$0x1] }
 0x1e0   : > { %v513_v63 = vpop.trf.xlu0  ;;  %v632_v5 = vld [vmem:[#allocation2 + $0x90] sm:$0xff]  ;;  %v633_v9 = vld [vmem:[#allocation2 + $0x98] sm:$0xff] }
 0x1e1   : > { %573 = vst [vmem:[#allocation2 + $0xb1] ss:$2 sm:$0xff] %v513_v63  ;;  %687 = vxpose.xlu0.b32.cont [10/16] (narrow) %v623_v0, 16  ;;  %711 = vxpose.xlu1.b32.cont [2/16] (narrow) %v631_v1, 16  ;;  %v810_v63 = vld [vmem:[%s5602_s4 + $0x80] sm:$0x1] }
 0x1e2   : > { %v545_v2 = vpop.trf.xlu1  ;;  %v664_v58 = vld [vmem:[#allocation2 + $0x190] sm:$0xff]  ;;  %v828_v0 = vrot.slane %v809_v59, 5  ;;  %v657_v1 = vld [vmem:[#allocation2 + $0x158] sm:$0xff] }
 0x1e3   : > { %605 = vst [vmem:[#allocation2 + $0x1b1] ss:$2 sm:$0xff] %v545_v2  ;;  %v665_v2 = vld [vmem:[#allocation2 + $0x198] sm:$0xff] }
 0x1e4   : > { %v514_v3 = vpop.trf.xlu0  ;;  %v634_v13 = vld [vmem:[#allocation2 + $0xa0] sm:$0xff]  ;;  %v635_v17 = vld [vmem:[#allocation2 + $0xa8] sm:$0xff] }
 0x1e5   : > { %575 = vst [vmem:[#allocation2 + $0xc1] ss:$2 sm:$0xff] %v514_v3  ;;  %688 = vxpose.xlu0.b32.cont [11/16] (narrow) %v624_v4, 16  ;;  %712 = vxpose.xlu1.b32.cont [3/16] (narrow) %v632_v5, 16  ;;  %v827_v3 = vsel %vm826_vm3, %v825_v60, %v824_v61  ;;  %v2984_v4 = vld [vmem:[%s5602_s4 + $0x41] sm:$0x1] }
 0x1e6   : > { %v546_v6 = vpop.trf.xlu1  ;;  %v2998_v5 = vrot.slane %v2983_v62, 7 }
 0x1e7   : > { %607 = vst [vmem:[#allocation2 + $0x1c1] ss:$2 sm:$0xff] %v546_v6  ;;  %v2982_v6 = vld [vmem:[%s5602_s4 + $0x1] sm:$0x1] }
 0x1e8   : > { %v515_v7 = vpop.trf.xlu0  ;;  %v636_v20 = vld [vmem:[#allocation2 + $0xb0] sm:$0xff]  ;;  %v637_v22 = vld [vmem:[#allocation2 + $0xb8] sm:$0xff] }
 0x1e9   : > { %577 = vst [vmem:[#allocation2 + $0xd1] ss:$2 sm:$0xff] %v515_v7  ;;  %689 = vxpose.xlu0.b32.cont [12/16] (narrow) %v625_v8, 16  ;;  %713 = vxpose.xlu1.b32.cont [4/16] (narrow) %v633_v9, 16  ;;  %v811_v7 = vld [vmem:[%s5602_s4 + $0xa0] sm:$0x1]  ;;  %v830_v9 = vsel %vm829_vm4, %v828_v0, %v827_v3 }
 0x1ea   : > { %v547_v10 = vpop.trf.xlu1  ;;  %v831_v8 = vrot.slane %v810_v63, 4  ;;  %v669_v55 = vld [vmem:[#allocation2 + $0x1b8] sm:$0xff] }
 0x1eb   : > { %609 = vst [vmem:[#allocation2 + $0x1d1] ss:$2 sm:$0xff] %v547_v10  ;;  %v2985_v10 = vld [vmem:[%s5602_s4 + $0x61] sm:$0x1] }
 0x1ec   : > { %v516_v11 = vpop.trf.xlu0  ;;  %v638_v23 = vld [vmem:[#allocation2 + $0xc0] sm:$0xff]  ;;  %v639_v25 = vld [vmem:[#allocation2 + $0xc8] sm:$0xff] }
 0x1ed   : > { %579 = vst [vmem:[#allocation2 + $0xe1] ss:$2 sm:$0xff] %v516_v11  ;;  %690 = vxpose.xlu0.b32.cont [13/16] (narrow) %v626_v12, 16  ;;  %714 = vxpose.xlu1.b32.cont [5/16] (narrow) %v634_v13, 16  ;;  %v3000_v11 = vrot.slane %v2984_v4, 6  ;;  %v658_v12 = vld [vmem:[#allocation2 + $0x160] sm:$0xff] }
 0x1ee   : > { %v548_v14 = vpop.trf.xlu1  ;;  %v666_v13 = vld [vmem:[#allocation2 + $0x1a0] sm:$0xff]  ;;  %v1357_v4 = vld [vmem:[%s5602_s4 + $0x28] sm:$0x1] }
 0x1ef   : > { %611 = vst [vmem:[#allocation2 + $0x1e1] ss:$2 sm:$0xff] %v548_v14  ;;  %v2999_v14 = vsel %vm823_vm2, %v2998_v5, %v2982_v6  ;;  %v670_v0 = vld [vmem:[#allocation2 + $0x1c0] sm:$0xff] }
 0x1f0   : > { %v517_v15 = vpop.trf.xlu0  ;;  %v640_v27 = vld [vmem:[#allocation2 + $0xd0] sm:$0xff]  ;;  %v641_v29 = vld [vmem:[#allocation2 + $0xd8] sm:$0xff] }
 0x1f1   : > { %581 = vst [vmem:[#allocation2 + $0xf1] ss:$2 sm:$0xff] %v517_v15  ;;  %691 = vxpose.xlu0.b32.cont [14/16] (narrow) %v627_v16, 16  ;;  %715 = vxpose.xlu1.b32.cont [6/16] (narrow) %v635_v17, 16  ;;  %v812_v15 = vld [vmem:[%s5602_s4 + $0xc0] sm:$0x1]  ;;  %v833_v17 = vsel %vm832_vm5, %v831_v8, %v830_v9 }
 0x1f2   : > { %v549_v18 = vpop.trf.xlu1  ;;  %v834_v16 = vrot.slane %v811_v7, 3 }
 0x1f3   : > { %613 = vst [vmem:[#allocation2 + $0x1f1] ss:$2 sm:$0xff] %v549_v18  ;;  %v2986_v18 = vld [vmem:[%s5602_s4 + $0x81] sm:$0x1] }
 0x1f4   : > { %v642_v31 = vld [vmem:[#allocation2 + $0xe0] sm:$0xff]  ;;  %v643_v33 = vld [vmem:[#allocation2 + $0xe8] sm:$0xff] }
 0x1f5   : > { %692 = vxpose.xlu0.b32.cont [15/16] (narrow) %v628_v19, 16  ;;  %716 = vxpose.xlu1.b32.cont [7/16] (narrow) %v636_v20, 16  ;;  %v3002_v19 = vrot.slane %v2985_v10, 5  ;;  %v3001_v20 = vsel %vm826_vm3, %v3000_v11, %v2999_v14  ;;  %v671_v10 = vld [vmem:[#allocation2 + $0x1c8] sm:$0xff] }
 0x1f8   : > { %v644_v35 = vld [vmem:[#allocation2 + $0xf0] sm:$0xff]  ;;  %v645_v37 = vld [vmem:[#allocation2 + $0xf8] sm:$0xff] }
 0x1f9   : > { %693 = vxpose.xlu0.b32.end [16/16] (narrow) %v629_v21, 16  ;;  %717 = vxpose.xlu1.b32.cont [8/16] (narrow) %v637_v22, 16  ;;  %v659_v21 = vld [vmem:[#allocation2 + $0x168] sm:$0xff] }
 0x1fa   : > { %v667_v22 = vld [vmem:[#allocation2 + $0x1a8] sm:$0xff] }
 0x1fd   : > { %718 = vxpose.xlu1.b32.cont [9/16] (narrow) %v638_v23, 16  ;;  %742 = vxpose.xlu0.b32.start [1/16] (narrow) %v646_v24, 16  ;;  %v813_v23 = vld [vmem:[%s5602_s4 + $0xe0] sm:$0x1]  ;;  %v837_v24 = vrot.slane %v812_v15, 2 }
 0x201   : > { %719 = vxpose.xlu1.b32.cont [10/16] (narrow) %v639_v25, 16  ;;  %743 = vxpose.xlu0.b32.cont [2/16] (narrow) %v647_v26, 16  ;;  %v836_v25 = vsel %vm835_vm6, %v834_v16, %v833_v17  ;;  %v2987_v26 = vld [vmem:[%s5602_s4 + $0xa1] sm:$0x1] }
 0x205   : > { %720 = vxpose.xlu1.b32.cont [11/16] (narrow) %v640_v27, 16  ;;  %744 = vxpose.xlu0.b32.cont [3/16] (narrow) %v648_v28, 16  ;;  %v3004_v27 = vrot.slane %v2986_v18, 4  ;;  %v5488_v28 = vmov 1966171168  }
 0x206   : > { %v1356_v18 = vld [vmem:[%s5602_s4 + $0x8] sm:$0x1] }
 0x209   : > { %721 = vxpose.xlu1.b32.cont [12/16] (narrow) %v641_v29, 16  ;;  %745 = vxpose.xlu0.b32.cont [4/16] (narrow) %v649_v30, 16  ;;  %v848_v29 = vunpack.c.l.s4 %v5488_v28  ;;  %v850_v30 = vlaneseq }
 0x20d   : > { %722 = vxpose.xlu1.b32.cont [13/16] (narrow) %v642_v31, 16  ;;  %746 = vxpose.xlu0.b32.cont [5/16] (narrow) %v650_v32, 16  ;;  %v3003_v31 = vsel %vm829_vm4, %v3002_v19, %v3001_v20  ;;  %v840_v32 = vrot.slane %v813_v23, 1  ;;  %v3525_v19 = vld [vmem:[%s5602_s4 + $0x29] sm:$0x1] }
 0x20e   : > { %v3540_v28 = vrot.slane %v3525_v19, 7 }
 0x211   : > { %723 = vxpose.xlu1.b32.cont [14/16] (narrow) %v643_v33, 16  ;;  %747 = vxpose.xlu0.b32.cont [6/16] (narrow) %v651_v34, 16  ;;  %v660_v33 = vld [vmem:[#allocation2 + $0x170] sm:$0xff] }
 0x212   : > { %v668_v34 = vld [vmem:[#allocation2 + $0x1b0] sm:$0xff] }
 0x215   : > { %724 = vxpose.xlu1.b32.cont [15/16] (narrow) %v644_v35, 16  ;;  %748 = vxpose.xlu0.b32.cont [7/16] (narrow) %v652_v36, 16  ;;  %v839_v35 = vsel %vm838_vm7, %v837_v24, %v836_v25  ;;  %v2988_v36 = vld [vmem:[%s5602_s4 + $0xc1] sm:$0x1] }
 0x216   : > { %v842_v41 = vsel %vm841_vm8, %v840_v32, %v839_v35  ;;  %v673_v35 = vld [vmem:[#allocation2 + $0x1d8] sm:$0xff] }
 0x219   : > { %725 = vxpose.xlu1.b32.end [16/16] (narrow) %v645_v37, 16  ;;  %749 = vxpose.xlu0.b32.cont [8/16] (narrow) %v653_v38, 16  ;;  %v3006_v37 = vrot.slane %v2987_v26, 3  ;;  %v3005_v38 = vsel %vm832_vm5, %v3004_v27, %v3003_v31  ;;  %v3526_v27 = vld [vmem:[%s5602_s4 + $0x49] sm:$0x1] }
 0x21b   : > { %v3007_v56 = vsel %vm835_vm6, %v3006_v37, %v3005_v38  ;;  %v3542_v37 = vrot.slane %v3526_v27, 6 }
 0x21d   : > { %750 = vxpose.xlu0.b32.cont [9/16] (narrow) %v654_v39, 16  ;;  %774 = vxpose.xlu1.b32.start [1/16] (narrow) %v662_v40, 16  ;;  %v849_v39 = vunpack.c.0.s8 %v848_v29  ;;  %v5838_v40 = vshrl.u32 %v850_v30, 7  ;;  %v1360_v29 = vld [vmem:[%s5602_s4 + $0x88] sm:$0x1] }
 0x221   : > { %751 = vxpose.xlu0.b32.cont [10/16] (narrow) %v655_v42, 16  ;;  %775 = vxpose.xlu1.b32.cont [2/16] (narrow) %v663_v53, 16  ;;  %v2989_v42 = vld [vmem:[%s5602_s4 + $0xe1] sm:$0x1]  ;;  %v3008_v53 = vrot.slane %v2988_v36, 2 }
 0x222   : > { %v3010_v60 = vrot.slane %v2989_v42, 1 }
 0x223   : > { %v3009_v61 = vsel %vm838_vm7, %v3008_v53, %v3007_v56  ;;  %v3527_v53 = vld [vmem:[%s5602_s4 + $0x69] sm:$0x1] }
 0x224   : > { %v3011_v5 = vsel %vm841_vm8, %v3010_v60, %v3009_v61 }
 0x225   : > { %752 = vxpose.xlu0.b32.cont [11/16] (narrow) %v656_v57, 16  ;;  %776 = vxpose.xlu1.b32.cont [3/16] (narrow) %v664_v58, 16  ;;  %v5846_v58 = vsub.s32 %v849_v39, %v5838_v40 }
 0x229   : > { %753 = vxpose.xlu0.b32.cont [12/16] (narrow) %v657_v1, 16  ;;  %777 = vxpose.xlu1.b32.cont [4/16] (narrow) %v665_v2, 16 }
 0x22d   : > { %754 = vxpose.xlu0.b32.cont [13/16] (narrow) %v658_v12, 16  ;;  %778 = vxpose.xlu1.b32.cont [5/16] (narrow) %v666_v13, 16  ;;  %v1358_v12 = vld [vmem:[%s5602_s4 + $0x48] sm:$0x1]  ;;  %v1372_v13 = vrot.slane %v1357_v4, 7 }
 0x22e   : > { %v1374_v23 = vrot.slane %v1358_v12, 6 }
 0x22f   : > { %v1373_v24 = vsel %vm823_vm2, %v1372_v13, %v1356_v18 }
 0x230   : > { %v1375_v36 = vsel %vm826_vm3, %v1374_v23, %v1373_v24  ;;  %v3531_v23 = vld [vmem:[%s5602_s4 + $0xe9] sm:$0x1] }
 0x231   : > { %755 = vxpose.xlu0.b32.cont [14/16] (narrow) %v659_v21, 16  ;;  %779 = vxpose.xlu1.b32.cont [6/16] (narrow) %v667_v22, 16  ;;  %v672_v21 = vld [vmem:[#allocation2 + $0x1d0] sm:$0xff]  ;;  %v1359_v22 = vld [vmem:[%s5602_s4 + $0x68] sm:$0x1] }
 0x232   : > { %v1376_v30 = vrot.slane %v1359_v22, 5 }
 0x235   : > { %756 = vxpose.xlu0.b32.cont [15/16] (narrow) %v660_v33, 16  ;;  %780 = vxpose.xlu1.b32.cont [7/16] (narrow) %v668_v34, 16  ;;  %v3524_v34 = vld [vmem:[%s5602_s4 + $0x9] sm:$0x1] }
 0x236   : > { %v3541_v56 = vsel %vm823_vm2, %v3540_v28, %v3524_v34  ;;  %v677_v28 = vld [vmem:[#allocation2 + $0x1f8] sm:$0xff] }
 0x239   : > { %v5843_v57 = vpop.trf.xlu0  ;;  %757 = vxpose.xlu0.b32.end [16/16] (narrow) %v661_v54, 16  ;;  %781 = vxpose.xlu1.b32.cont [8/16] (narrow) %v669_v55, 16  ;;  %v1361_v54 = vld [vmem:[%s5602_s4 + $0xa8] sm:$0x1]  ;;  %v1378_v55 = vrot.slane %v1360_v29, 4  ;;  %v3552_v29 = vrot.slane %v3531_v23, 1 }
 0x23a   : > { %v844_v59 = vadd.f32 %v842_v41, %v5843_v57  ;;  %v5931_v18 = vadd.f32 %v5799_v46, %v5843_v57 }
 0x23c   : > { %v846_v62 = vcombine.high %v844_v59, %v844_v59  ;;  %v853_v63 = vrot.slane %v844_v59, %v5846_v58  ;;  %v1377_v59 = vsel %vm829_vm4, %v1376_v30, %v1375_v36  ;;  %v5944_v46 = vrot.slane %v5931_v18, %v5846_v58 }
 0x23d   : > { %782 = vxpose.xlu1.b32.cont [9/16] (narrow) %v670_v0, 16  ;;  %v5863_v11 = vpop.trf.xlu0  ;;  %v3528_v0 = vld [vmem:[%s5602_s4 + $0x89] sm:$0x1] }
 0x23e   : > { %v860_v1 = vrot.slane %v846_v62, %v5846_v58  ;;  %v861_v2 = vcombine.high %v853_v63, %v853_v63  ;;  %v869_v3 = vrot.slane %v853_v63, %v5846_v58  ;;  %v3013_v14 = vadd.f32 %v3011_v5, %v5863_v11  ;;  %v674_v63 = vld [vmem:[#allocation2 + $0x1e0] sm:$0xff] }
 0x23f   : > { %v3543_v5 = vsel %vm826_vm3, %v3542_v37, %v3541_v56 }
 0x240   : > { %v862_v6 = vcombine.high %v860_v1, %v860_v1  ;;  %v876_v7 = vrot.slane %v860_v1, %v5846_v58  ;;  %v883_v8 = vrot.slane %v861_v2, %v5846_v58  ;;  %v891_v9 = vcombine.high %v869_v3, %v869_v3  ;;  %904 = vst.msk [vmem:[%s5859_s7] sm:$0x1] %vm903_vm9, %v869_v3  ;;  %v1362_v2 = vld [vmem:[%s5602_s4 + $0xc8] sm:$0x1] }
 0x241   : > { %783 = vxpose.xlu1.b32.cont [10/16] (narrow) %v671_v10, 16  ;;  %v3015_v25 = vcombine.high %v3013_v14, %v3013_v14  ;;  %v3022_v26 = vrot.slane %v3013_v14, %v5846_v58  ;;  %v3544_v1 = vrot.slane %v3527_v53, 5  ;;  %v1380_v3 = vrot.slane %v1361_v54, 3  ;;  %v1363_v10 = vld [vmem:[%s5602_s4 + $0xe8] sm:$0x1] }
 0x242   : > { %v890_v15 = vrot.slane %v862_v6, %v5846_v58  ;;  %v892_v16 = vcombine.high %v876_v7, %v876_v7  ;;  %v893_v17 = vcombine.high %v883_v8, %v883_v8  ;;  %905 = vst.msk [vmem:[%s5859_s7 + $0x20] sm:$0x1] %vm903_vm9, %v883_v8  ;;  %906 = vst.msk [vmem:[%s5859_s7 + $0x40] sm:$0x1] %vm903_vm9, %v891_v9  ;;  %v3546_v8 = vrot.slane %v3528_v0, 4  ;;  %v675_v9 = vld [vmem:[#allocation2 + $0x1e8] sm:$0xff] }
 0x243   : > { %908 = vst.msk [vmem:[%s5859_s7 + $0x80] sm:$0x1] %vm903_vm9, %v876_v7  ;;  %v3029_v31 = vrot.slane %v3015_v25, %v5846_v58  ;;  %v3030_v32 = vcombine.high %v3022_v26, %v3022_v26  ;;  %v3038_v33 = vrot.slane %v3022_v26, %v5846_v58  ;;  %v1379_v6 = vsel %vm832_vm5, %v1378_v55, %v1377_v59  ;;  %v3529_v7 = vld [vmem:[%s5602_s4 + $0xa9] sm:$0x1]  ;;  %v1900_v59 = vld [vmem:[%s5602_s4 + $0x50] sm:$0x1] }
 0x244   : > { %v894_v20 = vcombine.high %v890_v15, %v890_v15  ;;  %907 = vst.msk [vmem:[%s5859_s7 + $0x60] sm:$0x1] %vm903_vm9, %v893_v17  ;;  %909 = vst.msk [vmem:[%s5859_s7 + $0xa0] sm:$0x1] %vm903_vm9, %v890_v15  ;;  %v1382_v12 = vrot.slane %v1362_v2, 2  ;;  %v3545_v13 = vsel %vm829_vm4, %v3544_v1, %v3543_v5  ;;  %v1381_v14 = vsel %vm835_vm6, %v1380_v3, %v1379_v6 }
 0x245   : > { %910 = vst.msk [vmem:[%s5859_s7 + $0xc0] sm:$0x1] %vm903_vm9, %v892_v16  ;;  %784 = vxpose.xlu1.b32.cont [11/16] (narrow) %v672_v21, 16  ;;  %v3031_v38 = vcombine.high %v3029_v31, %v3029_v31  ;;  %v3045_v39 = vrot.slane %v3029_v31, %v5846_v58  ;;  %v3052_v41 = vrot.slane %v3030_v32, %v5846_v58  ;;  %3072 = vst.msk [vmem:[%s5859_s7 + $0x1] sm:$0x1] %vm903_vm9, %v3038_v33  ;;  %v676_v21 = vld [vmem:[#allocation2 + $0x1f0] sm:$0xff] }
 0x246   : > { %911 = vst.msk [vmem:[%s5859_s7 + $0xe0] sm:$0x1] %vm903_vm9, %v894_v20  ;;  %v3060_v42 = vcombine.high %v3038_v33, %v3038_v33  ;;  %v3530_v15 = vld [vmem:[%s5602_s4 + $0xc9] sm:$0x1]  ;;  %v3548_v16 = vrot.slane %v3529_v7, 3  ;;  %v5927_v17 = vadd.f32 %v5793_v43, %v5843_v57  ;;  %v1384_v19 = vrot.slane %v1363_v10, 1 }
 0x247   : > { %v3059_v60 = vrot.slane %v3031_v38, %v5846_v58  ;;  %v3061_v61 = vcombine.high %v3045_v39, %v3045_v39  ;;  %v3062_v62 = vcombine.high %v3052_v41, %v3052_v41  ;;  %3073 = vst.msk [vmem:[%s5859_s7 + $0x21] sm:$0x1] %vm903_vm9, %v3052_v41  ;;  %3076 = vst.msk [vmem:[%s5859_s7 + $0x81] sm:$0x1] %vm903_vm9, %v3045_v39  ;;  %v3550_v24 = vrot.slane %v3530_v15, 2 }
 0x248   : > { %3074 = vst.msk [vmem:[%s5859_s7 + $0x41] sm:$0x1] %vm903_vm9, %v3060_v42  ;;  %v3547_v20 = vsel %vm832_vm5, %v3546_v8, %v3545_v13  ;;  %v1383_v22 = vsel %vm838_vm7, %v1382_v12, %v1381_v14  ;;  %v5939_v43 = vadd.f32 %v5795_v44, %v5843_v57  ;;  %v947_v27 = vcombine.high %v5927_v17, %v5927_v17  ;;  %v1898_v1 = vld [vmem:[%s5602_s4 + $0x10] sm:$0x1] }
 0x249   : > { %785 = vxpose.xlu1.b32.cont [12/16] (narrow) %v673_v35, 16  ;;  %v3063_v4 = vcombine.high %v3059_v60, %v3059_v60  ;;  %3075 = vst.msk [vmem:[%s5859_s7 + $0x61] sm:$0x1] %vm903_vm9, %v3062_v62  ;;  %3077 = vst.msk [vmem:[%s5859_s7 + $0xa1] sm:$0x1] %vm903_vm9, %v3059_v60  ;;  %v3549_v25 = vsel %vm835_vm6, %v3548_v16, %v3547_v20  ;;  %v1385_v26 = vsel %vm841_vm8, %v1384_v19, %v1383_v22 }
 0x24a   : > { %3078 = vst.msk [vmem:[%s5859_s7 + $0xc1] sm:$0x1] %vm903_vm9, %v3061_v61  ;;  %v3551_v31 = vsel %vm838_vm7, %v3550_v24, %v3549_v25  ;;  %v5953_v44 = vsub.s32 0, %v5838_v40  ;;  %v5957_v57 = vrot.slane %v5944_v46, %v5846_v58  ;;  %v5960_v33 = vrot.slane %v947_v27, %v5846_v58  ;;  %v1899_v35 = vld [vmem:[%s5602_s4 + $0x30] sm:$0x1] }
 0x24b   : > { %3079 = vst.msk [vmem:[%s5859_s7 + $0xe1] sm:$0x1] %vm903_vm9, %v3063_v4  ;;  %v5964_v34 = vrot.slane %v5939_v43, %v5846_v58  ;;  %v3553_v40 = vsel %vm841_vm8, %v3552_v29, %v3551_v31  ;;  %v1914_v42 = vrot.slane %v1899_v35, 7  ;;  %v1916_v7 = vrot.slane %v1900_v59, 6  ;;  %v1901_v19 = vld [vmem:[%s5602_s4 + $0x70] sm:$0x1] }
 0x24c   : > { %v1295_v54 = vrot.slane %v5957_v57, %v5953_v44  ;;  %v5977_v55 = vrot.slane %v5960_v33, %v5846_v58  ;;  %v1243_v16 = vcombine.high %v5931_v18, %v5931_v18  ;;  %v1902_v24 = vld [vmem:[%s5602_s4 + $0x90] sm:$0x1]  ;;  %v1918_v25 = vrot.slane %v1901_v19, 5  ;;  %v2443_v19 = vld [vmem:[%s5602_s4 + $0x78] sm:$0x1] }
 0x24d   : > { %786 = vxpose.xlu1.b32.cont [13/16] (narrow) %v674_v63, 16  ;;  %v1110_v56 = vcombine.high %v5964_v34, %v5964_v34  ;;  %v1915_v8 = vsel %vm823_vm2, %v1914_v42, %v1898_v1  ;;  %v1288_v29 = vcombine.high %v5957_v57, %v5957_v57 }
 0x24e   : > { %v1015_v14 = vrot.slane %v5977_v55, %v5953_v44  ;;  %v6034_v31 = vrot.slane %v1243_v16, %v5846_v58 }
 0x24f   : > { %v6009_v15 = vrot.slane %v1110_v56, %v5846_v58  ;;  %v4067_v56 = vld [vmem:[%s5602_s4 + $0x31] sm:$0x1] }
 0x250   : > { %v4082_v1 = vrot.slane %v4067_v56, 7 }
 0x251   : > { %787 = vxpose.xlu1.b32.cont [14/16] (narrow) %v675_v9, 16 }
 0x255   : > { %788 = vxpose.xlu1.b32.cont [15/16] (narrow) %v676_v21, 16 }
 0x259   : > { %789 = vxpose.xlu1.b32.end [16/16] (narrow) %v677_v28, 16  ;;  %v5948_v30 = vpop.trf.xlu1  ;;  %v1151_v28 = vrot.slane %v6009_v15, %v5953_v44 }
 0x25a   : > { %v1387_v32 = vadd.f32 %v1385_v26, %v5948_v30 }
 0x25c   : > { %v1389_v36 = vcombine.high %v1387_v32, %v1387_v32  ;;  %v1396_v37 = vrot.slane %v1387_v32, %v5846_v58  ;;  %v1917_v32 = vsel %vm826_vm3, %v1916_v7, %v1915_v8  ;;  %v6075_v7 = vrot.slane %v5964_v34, %v5846_v58 }
 0x25d   : > { %v5971_v53 = vpop.trf.xlu1  ;;  %v1919_v57 = vsel %vm829_vm4, %v1918_v25, %v1917_v32  ;;  %v2460_v32 = vrot.slane %v2443_v19, 5 }
 0x25e   : > { %v1403_v38 = vrot.slane %v1389_v36, %v5846_v58  ;;  %v1404_v39 = vcombine.high %v1396_v37, %v1396_v37  ;;  %v1412_v41 = vrot.slane %v1396_v37, %v5846_v58  ;;  %v3555_v60 = vadd.f32 %v3553_v40, %v5971_v53  ;;  %v1903_v36 = vld [vmem:[%s5602_s4 + $0xb0] sm:$0x1] }
 0x25f   : > { %v1920_v37 = vrot.slane %v1902_v24, 4  ;;  %v1303_v40 = vrot.slane %v1288_v29, %v5953_v44  ;;  %v1922_v42 = vrot.slane %v1903_v36, 3  ;;  %v1147_v34 = vrot.slane %v6075_v7, %v5953_v44 }
 0x260   : > { %v1405_v61 = vcombine.high %v1403_v38, %v1403_v38  ;;  %v1419_v62 = vrot.slane %v1403_v38, %v5846_v58  ;;  %v1426_v63 = vrot.slane %v1404_v39, %v5846_v58  ;;  %v1434_v0 = vcombine.high %v1412_v41, %v1412_v41  ;;  %1446 = vst.msk [vmem:[%s5859_s7 + $0x8] sm:$0x1] %vm903_vm9, %v1412_v41  ;;  %v1904_v41 = vld [vmem:[%s5602_s4 + $0xd0] sm:$0x1] }
 0x261   : > { %v3557_v2 = vcombine.high %v3555_v60, %v3555_v60  ;;  %v3564_v3 = vrot.slane %v3555_v60, %v5846_v58  ;;  %v6051_v38 = vrot.slane %v6034_v31, %v5846_v58  ;;  %v954_v39 = vrot.slane %v5927_v17, %v5846_v58  ;;  %v1905_v60 = vld [vmem:[%s5602_s4 + $0xf0] sm:$0x1] }
 0x262   : > { %v1433_v4 = vrot.slane %v1405_v61, %v5846_v58  ;;  %v1435_v5 = vcombine.high %v1419_v62, %v1419_v62  ;;  %v1436_v6 = vcombine.high %v1426_v63, %v1426_v63  ;;  %1447 = vst.msk [vmem:[%s5859_s7 + $0x28] sm:$0x1] %vm903_vm9, %v1426_v63  ;;  %1448 = vst.msk [vmem:[%s5859_s7 + $0x48] sm:$0x1] %vm903_vm9, %v1434_v0  ;;  %1324 = vrot.lane.b32.xlu0 %v1295_v54, %s5486_s5  ;;  %v2441_v63 = vld [vmem:[%s5602_s4 + $0x38] sm:$0x1] }
 0x263   : > { %1450 = vst.msk [vmem:[%s5859_s7 + $0x88] sm:$0x1] %vm903_vm9, %v1419_v62  ;;  %v3571_v9 = vrot.slane %v3557_v2, %v5846_v58  ;;  %v3572_v10 = vcombine.high %v3564_v3, %v3564_v3  ;;  %v3580_v12 = vrot.slane %v3564_v3, %v5846_v58  ;;  %v1921_v54 = vsel %vm832_vm5, %v1920_v37, %v1919_v57  ;;  %v4068_v0 = vld [vmem:[%s5602_s4 + $0x51] sm:$0x1] }
 0x264   : > { %v1437_v13 = vcombine.high %v1433_v4, %v1433_v4  ;;  %1449 = vst.msk [vmem:[%s5859_s7 + $0x68] sm:$0x1] %vm903_vm9, %v1436_v6  ;;  %1451 = vst.msk [vmem:[%s5859_s7 + $0xa8] sm:$0x1] %vm903_vm9, %v1433_v4  ;;  %v1311_v59 = vrot.slane %v6051_v38, %v5953_v44  ;;  %v1924_v61 = vrot.slane %v1904_v41, 2  ;;  %v6063_v62 = vrot.slane %v954_v39, %v5846_v58 }
 0x265   : > { %1452 = vst.msk [vmem:[%s5859_s7 + $0xc8] sm:$0x1] %vm903_vm9, %v1435_v5  ;;  %v3573_v20 = vcombine.high %v3571_v9, %v3571_v9  ;;  %v3587_v21 = vrot.slane %v3571_v9, %v5846_v58  ;;  %v3594_v22 = vrot.slane %v3572_v10, %v5846_v58  ;;  %v3602_v23 = vcombine.high %v3580_v12, %v3580_v12  ;;  %v4066_v3 = vld [vmem:[%s5602_s4 + $0x11] sm:$0x1]  ;;  %v2442_v9 = vld [vmem:[%s5602_s4 + $0x58] sm:$0x1] }
 0x266   : > { %3614 = vst.msk [vmem:[%s5859_s7 + $0x9] sm:$0x1] %vm903_vm9, %v3580_v12  ;;  %1453 = vst.msk [vmem:[%s5859_s7 + $0xe8] sm:$0x1] %vm903_vm9, %v1437_v13  ;;  %1036 = vrot.lane.b32.xlu0 %v1015_v14, %s5485_s30  ;;  %v1923_v17 = vsel %vm835_vm6, %v1922_v42, %v1921_v54  ;;  %v1926_v2 = vrot.slane %v1905_v60, 1  ;;  %v2456_v5 = vrot.slane %v2441_v63, 7  ;;  %v999_v6 = vrot.slane %v6063_v62, %v5953_v44 }
 0x267   : > { %v3601_v18 = vrot.slane %v3573_v20, %v5846_v58  ;;  %v3603_v26 = vcombine.high %v3587_v21, %v3587_v21  ;;  %v3604_v27 = vcombine.high %v3594_v22, %v3594_v22  ;;  %3615 = vst.msk [vmem:[%s5859_s7 + $0x29] sm:$0x1] %vm903_vm9, %v3594_v22  ;;  %3616 = vst.msk [vmem:[%s5859_s7 + $0x49] sm:$0x1] %vm903_vm9, %v3602_v23  ;;  %v4069_v10 = vld [vmem:[%s5602_s4 + $0x71] sm:$0x1] }
 0x268   : > { %3618 = vst.msk [vmem:[%s5859_s7 + $0x89] sm:$0x1] %vm903_vm9, %v3587_v21  ;;  %v1925_v4 = vsel %vm838_vm7, %v1924_v61, %v1923_v17  ;;  %v962_v8 = vcombine.high %v954_v39, %v954_v39  ;;  %v4084_v12 = vrot.slane %v4068_v0, 6  ;;  %v2440_v13 = vld [vmem:[%s5602_s4 + $0x18] sm:$0x1]  ;;  %v4083_v14 = vsel %vm823_vm2, %v4082_v1, %v4066_v3 }
 0x269   : > { %v3605_v35 = vcombine.high %v3601_v18, %v3601_v18  ;;  %3617 = vst.msk [vmem:[%s5859_s7 + $0x69] sm:$0x1] %vm903_vm9, %v3604_v27  ;;  %3619 = vst.msk [vmem:[%s5859_s7 + $0xa9] sm:$0x1] %vm903_vm9, %v3601_v18  ;;  %v1927_v16 = vsel %vm841_vm8, %v1926_v2, %v1925_v4  ;;  %v2458_v20 = vrot.slane %v2442_v9, 6  ;;  %v4086_v22 = vrot.slane %v4069_v10, 5 }
 0x26a   : > { %3620 = vst.msk [vmem:[%s5859_s7 + $0xc9] sm:$0x1] %vm903_vm9, %v3603_v26  ;;  %1178 = vrot.lane.b32.xlu0 %v1151_v28, %s5487_s6  ;;  %v4070_v21 = vld [vmem:[%s5602_s4 + $0x91] sm:$0x1]  ;;  %v6088_v24 = vrot.slane %v962_v8, %v5846_v58  ;;  %v2457_v25 = vsel %vm823_vm2, %v2456_v5, %v2440_v13  ;;  %v4085_v18 = vsel %vm826_vm3, %v4084_v12, %v4083_v14  ;;  %v2444_v4 = vld [vmem:[%s5602_s4 + $0x98] sm:$0x1] }
 0x26b   : > { %3621 = vst.msk [vmem:[%s5859_s7 + $0xe9] sm:$0x1] %vm903_vm9, %v3605_v35  ;;  %v1095_v29 = vcombine.high %v5939_v43, %v5939_v43  ;;  %v4088_v35 = vrot.slane %v4070_v21, 4  ;;  %v2459_v57 = vsel %vm826_vm3, %v2458_v20, %v2457_v25  ;;  %v992_v43 = vcombine.high %v6063_v62, %v6063_v62  ;;  %v4072_v62 = vld [vmem:[%s5602_s4 + $0xd1] sm:$0x1] }
 0x26c   : > { %v4073_v12 = vld [vmem:[%s5602_s4 + $0xf1] sm:$0x1]  ;;  %v4092_v13 = vrot.slane %v4072_v62, 2  ;;  %v2461_v14 = vsel %vm829_vm4, %v2460_v32, %v2459_v57  ;;  %v4609_v20 = vld [vmem:[%s5602_s4 + $0x39] sm:$0x1]  ;;  %v993_v21 = vcombine.high %v5977_v55, %v5977_v55 }
 0x26d   : > { %v6127_v61 = vrot.slane %v1095_v29, %v5846_v58  ;;  %v1258_v29 = vcombine.high %v5944_v46, %v5944_v46  ;;  %v4094_v32 = vrot.slane %v4073_v12, 1  ;;  %v1142_v46 = vcombine.high %v6009_v15, %v6009_v15 }
 0x26e   : > { %1328 = vrot.lane.b32.xlu0 %v1303_v40, %s5486_s5  ;;  %v4071_v40 = vld [vmem:[%s5602_s4 + $0xb1] sm:$0x1] }
 0x26f   : > { %v4090_v63 = vrot.slane %v4071_v40, 3  ;;  %v6167_v25 = vrot.slane %v6127_v61, %v5846_v58  ;;  %v4608_v40 = vld [vmem:[%s5602_s4 + $0x19] sm:$0x1] }
 0x272   : > { %1332 = vrot.lane.b32.xlu0 %v1311_v59, %s5486_s5  ;;  %v1140_v59 = vcombine.high %v6075_v7, %v6075_v7 }
 0x277   : > { %1028 = vrot.lane.b32.xlu1 %v999_v6, %s5485_s30  ;;  %v1007_v6 = vrot.slane %v992_v43, %v5953_v44  ;;  %v1163_v43 = vrot.slane %v6167_v25, %v5953_v44 }
 0x279   : > { %v758_v23 = vpop.trf.xlu0 }
 0x27a   : > { %v1929_v26 = vadd.f32 %v1927_v16, %v758_v23  ;;  %v6093_v27 = vadd.f32 %v5807_v50, %v758_v23  ;;  %v6096_v28 = vadd.f32 %v5811_v52, %v758_v23  ;;  %v4087_v50 = vsel %vm829_vm4, %v4086_v22, %v4085_v18  ;;  %v2445_v18 = vld [vmem:[%s5602_s4 + $0xb8] sm:$0x1] }
 0x27b   : > { %1176 = vrot.lane.b32.xlu1 %v1147_v34, %s5487_s6  ;;  %v1003_v52 = vrot.slane %v6088_v24, %v5953_v44  ;;  %v4089_v17 = vsel %vm832_vm5, %v4088_v35, %v4087_v50  ;;  %v2462_v16 = vrot.slane %v2444_v4, 4  ;;  %v1155_v34 = vrot.slane %v1140_v59, %v5953_v44  ;;  %v4611_v59 = vld [vmem:[%s5602_s4 + $0x79] sm:$0x1] }
 0x27c   : > { %v1931_v36 = vcombine.high %v1929_v26, %v1929_v26  ;;  %v1938_v37 = vrot.slane %v1929_v26, %v5846_v58  ;;  %v6109_v39 = vrot.slane %v6093_v27, %v5846_v58  ;;  %v6115_v41 = vrot.slane %v6096_v28, %v5846_v58 }
 0x27d   : > { %v4091_v19 = vsel %vm835_vm6, %v4090_v63, %v4089_v17  ;;  %v6171_v26 = vadd.f32 %v5805_v49, %v758_v23  ;;  %v2446_v49 = vld [vmem:[%s5602_s4 + $0xd8] sm:$0x1]  ;;  %v2463_v23 = vsel %vm832_vm5, %v2462_v16, %v2461_v14  ;;  %v2464_v57 = vrot.slane %v2445_v18, 3  ;;  %v6206_v63 = vpop.trf.xlu0 }
 0x27e   : > { %v1945_v42 = vrot.slane %v1931_v36, %v5846_v58  ;;  %v1946_v54 = vcombine.high %v1938_v37, %v1938_v37  ;;  %v1954_v56 = vrot.slane %v1938_v37, %v5846_v58  ;;  %v6124_v60 = vrot.slane %v6109_v39, %v5846_v58  ;;  %v4610_v36 = vld [vmem:[%s5602_s4 + $0x59] sm:$0x1] }
 0x27f   : > { %1030 = vrot.lane.b32.xlu1 %v1003_v52, %s5485_s30  ;;  %v6141_v7 = vrot.slane %v6115_v41, %v5846_v58  ;;  %v4093_v35 = vsel %vm838_vm7, %v4092_v13, %v4091_v19  ;;  %v4624_v37 = vrot.slane %v4609_v20, 7  ;;  %v1023_v50 = vrot.slane %v993_v21, %v5953_v44  ;;  %v4613_v13 = vld [vmem:[%s5602_s4 + $0xb9] sm:$0x1]  ;;  %v2447_v21 = vld [vmem:[%s5602_s4 + $0xf8] sm:$0x1] }
 0x280   : > { %v1947_v0 = vcombine.high %v1945_v42, %v1945_v42  ;;  %v1961_v1 = vrot.slane %v1945_v42, %v5846_v58  ;;  %v1968_v2 = vrot.slane %v1946_v54, %v5846_v58  ;;  %v1976_v3 = vcombine.high %v1954_v56, %v1954_v56  ;;  %1988 = vst.msk [vmem:[%s5859_s7 + $0x10] sm:$0x1] %vm903_vm9, %v1954_v56 }
 0x281   : > { %v2083_v5 = vrot.slane %v6124_v60, %v5953_v44  ;;  %v2379_v55 = vrot.slane %v6141_v7, %v5953_v44  ;;  %v1111_v52 = vcombine.high %v6127_v61, %v6127_v61  ;;  %v6194_v42 = vrot.slane %v1258_v29, %v5846_v58 }
 0x282   : > { %v1975_v8 = vrot.slane %v1947_v0, %v5846_v58  ;;  %v1977_v9 = vcombine.high %v1961_v1, %v1961_v1  ;;  %v1978_v10 = vcombine.high %v1968_v2, %v1968_v2  ;;  %1989 = vst.msk [vmem:[%s5859_s7 + $0x30] sm:$0x1] %vm903_vm9, %v1968_v2  ;;  %1990 = vst.msk [vmem:[%s5859_s7 + $0x50] sm:$0x1] %vm903_vm9, %v1976_v3  ;;  %v4626_v15 = vrot.slane %v4610_v36, 6 }
 0x283   : > { %1992 = vst.msk [vmem:[%s5859_s7 + $0x90] sm:$0x1] %vm903_vm9, %v1961_v1  ;;  %2112 = vrot.lane.b32.xlu0 %v2083_v5, %s5485_s30  ;;  %1032 = vrot.lane.b32.xlu1 %v1007_v6, %s5485_s30  ;;  %v6198_v54 = vrot.slane %v6171_v26, %v5846_v58  ;;  %v4095_v56 = vsel %vm841_vm8, %v4094_v32, %v4093_v35  ;;  %v2466_v62 = vrot.slane %v2446_v49, 2  ;;  %v4612_v2 = vld [vmem:[%s5602_s4 + $0x99] sm:$0x1]  ;;  %v4628_v3 = vrot.slane %v4611_v59, 5 }
 0x284   : > { %v1979_v22 = vcombine.high %v1975_v8, %v1975_v8  ;;  %1991 = vst.msk [vmem:[%s5859_s7 + $0x70] sm:$0x1] %vm903_vm9, %v1978_v10  ;;  %1993 = vst.msk [vmem:[%s5859_s7 + $0xb0] sm:$0x1] %vm903_vm9, %v1975_v8  ;;  %v4625_v17 = vsel %vm823_vm2, %v4624_v37, %v4608_v40  ;;  %v2465_v61 = vsel %vm835_vm6, %v2464_v57, %v2463_v23  ;;  %v4630_v20 = vrot.slane %v4612_v2, 4 }
 0x285   : > { %1994 = vst.msk [vmem:[%s5859_s7 + $0xd0] sm:$0x1] %vm903_vm9, %v1977_v9  ;;  %v1159_v0 = vrot.slane %v1142_v46, %v5953_v44  ;;  %v4097_v1 = vadd.f32 %v4095_v56, %v6206_v63  ;;  %v1299_v4 = vrot.slane %v6194_v42, %v5953_v44  ;;  %v6214_v5 = vrot.slane %v1111_v52, %v5846_v58  ;;  %v4614_v49 = vld [vmem:[%s5602_s4 + $0xd9] sm:$0x1] }
 0x286   : > { %1995 = vst.msk [vmem:[%s5859_s7 + $0xf0] sm:$0x1] %vm903_vm9, %v1979_v22  ;;  %v6218_v6 = vrot.slane %v6198_v54, %v5846_v58  ;;  %v4627_v8 = vsel %vm826_vm3, %v4626_v15, %v4625_v17  ;;  %v2467_v9 = vsel %vm838_vm7, %v2466_v62, %v2465_v61  ;;  %v963_v14 = vcombine.high %v5960_v33, %v5960_v33  ;;  %v4615_v15 = vld [vmem:[%s5602_s4 + $0xf9] sm:$0x1] }
 0x287   : > { %2408 = vrot.lane.b32.xlu0 %v2379_v55, %s5486_s5  ;;  %1180 = vrot.lane.b32.xlu1 %v1155_v34, %s5487_s6  ;;  %v4099_v10 = vcombine.high %v4097_v1, %v4097_v1  ;;  %v4106_v12 = vrot.slane %v4097_v1, %v5846_v58  ;;  %v1289_v16 = vcombine.high %v6051_v38, %v6051_v38  ;;  %v2468_v57 = vrot.slane %v2447_v21, 1 }
 0x288   : > { %v994_v19 = vcombine.high %v6088_v24, %v6088_v24  ;;  %v4629_v33 = vsel %vm829_vm4, %v4628_v3, %v4627_v8  ;;  %v2031_v38 = vcombine.high %v6093_v27, %v6093_v27  ;;  %v1167_v55 = vrot.slane %v6214_v5, %v5953_v44 }
 0x289   : > { %v4113_v22 = vrot.slane %v4099_v10, %v5846_v58  ;;  %v4114_v34 = vcombine.high %v4106_v12, %v4106_v12  ;;  %v4122_v18 = vrot.slane %v4106_v12, %v5846_v58  ;;  %v2231_v29 = vrot.slane %v6218_v6, %v5953_v44 }
 0x28a   : > { %v4632_v24 = vrot.slane %v4613_v13, 3  ;;  %v1259_v27 = vcombine.high %v6034_v31, %v6034_v31  ;;  %v1319_v23 = vrot.slane %v1289_v16, %v5953_v44  ;;  %v4631_v40 = vsel %vm832_vm5, %v4630_v20, %v4629_v33 }
 0x28b   : > { %1040 = vrot.lane.b32.xlu0 %v1023_v50, %s5485_s30  ;;  %1184 = vrot.lane.b32.xlu1 %v1163_v43, %s5487_s6  ;;  %v4115_v32 = vcombine.high %v4113_v22, %v4113_v22  ;;  %v4129_v35 = vrot.slane %v4113_v22, %v5846_v58  ;;  %v4136_v36 = vrot.slane %v4114_v34, %v5846_v58  ;;  %v4634_v62 = vrot.slane %v4614_v49, 2 }
 0x28c   : > { %v4144_v37 = vcombine.high %v4122_v18, %v4122_v18  ;;  %4156 = vst.msk [vmem:[%s5859_s7 + $0x11] sm:$0x1] %vm903_vm9, %v4122_v18  ;;  %v6254_v46 = vrot.slane %v963_v14, %v5846_v58  ;;  %v2076_v43 = vcombine.high %v6124_v60, %v6124_v60  ;;  %v1011_v56 = vrot.slane %v994_v19, %v5953_v44 }
 0x28d   : > { %v4143_v50 = vrot.slane %v4115_v32, %v5846_v58  ;;  %v4145_v52 = vcombine.high %v4129_v35, %v4129_v35  ;;  %v4146_v31 = vcombine.high %v4136_v36, %v4136_v36  ;;  %4157 = vst.msk [vmem:[%s5859_s7 + $0x31] sm:$0x1] %vm903_vm9, %v4136_v36  ;;  %4160 = vst.msk [vmem:[%s5859_s7 + $0x91] sm:$0x1] %vm903_vm9, %v4129_v35  ;;  %v4636_v3 = vrot.slane %v4615_v15, 1 }
 0x28e   : > { %4158 = vst.msk [vmem:[%s5859_s7 + $0x51] sm:$0x1] %vm903_vm9, %v4144_v37  ;;  %v6267_v59 = vrot.slane %v2031_v38, %v5846_v58  ;;  %v4633_v61 = vsel %vm835_vm6, %v4632_v24, %v4631_v40  ;;  %v2469_v60 = vsel %vm841_vm8, %v2468_v57, %v2467_v9  ;;  %v1019_v1 = vrot.slane %v6254_v46, %v5953_v44 }
 0x28f   : > { %1182 = vrot.lane.b32.xlu0 %v1159_v0, %s5487_s6  ;;  %1326 = vrot.lane.b32.xlu1 %v1299_v4, %s5486_s5  ;;  %v4147_v17 = vcombine.high %v4143_v50, %v4143_v50  ;;  %4159 = vst.msk [vmem:[%s5859_s7 + $0x71] sm:$0x1] %vm903_vm9, %v4146_v31  ;;  %4161 = vst.msk [vmem:[%s5859_s7 + $0xb1] sm:$0x1] %vm903_vm9, %v4143_v50  ;;  %v1141_v0 = vcombine.high %v6167_v25, %v6167_v25 }
 0x290   : > { %4162 = vst.msk [vmem:[%s5859_s7 + $0xd1] sm:$0x1] %vm903_vm9, %v4145_v52  ;;  %v6285_v2 = vrot.slane %v1259_v27, %v5846_v58  ;;  %v2194_v4 = vcombine.high %v6198_v54, %v6198_v54  ;;  %v2091_v10 = vrot.slane %v2076_v43, %v5953_v44  ;;  %v6296_v9 = vrot.slane %v6267_v59, %v5846_v58 }
 0x291   : > { %4163 = vst.msk [vmem:[%s5859_s7 + $0xf1] sm:$0x1] %vm903_vm9, %v4147_v17  ;;  %v4635_v25 = vsel %vm838_vm7, %v4634_v62, %v4633_v61  ;;  %v2327_v13 = vcombine.high %v6096_v28, %v6096_v28  ;;  %v1290_v20 = vcombine.high %v6194_v42, %v6194_v42  ;;  %v1171_v28 = vrot.slane %v1141_v0, %v5953_v44 }
 0x292   : > { %v1315_v16 = vrot.slane %v6285_v2, %v5953_v44  ;;  %v4637_v19 = vsel %vm841_vm8, %v4636_v3, %v4635_v25  ;;  %v2099_v21 = vrot.slane %v6296_v9, %v5953_v44  ;;  %v6314_v22 = vrot.slane %v2194_v4, %v5846_v58 }
 0x293   : > { %1186 = vrot.lane.b32.xlu0 %v1167_v55, %s5487_s6  ;;  %2260 = vrot.lane.b32.xlu1 %v2231_v29, %s5487_s6  ;;  %v2046_v18 = vcombine.high %v6109_v39, %v6109_v39  ;;  %v2372_v42 = vcombine.high %v6141_v7, %v6141_v7  ;;  %v6327_v29 = vrot.slane %v2327_v13, %v5846_v58 }
 0x294   : > { %v2235_v7 = vrot.slane %v6314_v22, %v5953_v44  ;;  %v1307_v37 = vrot.slane %v1290_v20, %v5953_v44  ;;  %v1143_v25 = vcombine.high %v6214_v5, %v6214_v5 }
 0x295   : > { %v2357_v15 = vrot.slane %v6327_v29, %v5846_v58  ;;  %v6361_v62 = vrot.slane %v2046_v18, %v5846_v58 }
 0x296   : > { %v1175_v5 = vrot.slane %v1143_v25, %v5953_v44 }
 0x297   : > { %1336 = vrot.lane.b32.xlu0 %v1319_v23, %s5486_s5  ;;  %1034 = vrot.lane.b32.xlu1 %v1011_v56, %s5485_s30  ;;  %v2179_v23 = vcombine.high %v6171_v26, %v6171_v26  ;;  %v2387_v56 = vrot.slane %v2372_v42, %v5953_v44  ;;  %v2087_v13 = vrot.slane %v6361_v62, %v5953_v44 }
 0x298   : > { %v1487_v42 = vadd.f32 %v5797_v45, %v5948_v30 }
 0x299   : > { %v6291_v8 = vpop.trf.xlu1 }
 0x29a   : > { %v2471_v12 = vadd.f32 %v2469_v60, %v6291_v8 }
 0x29b   : > { %2116 = vrot.lane.b32.xlu0 %v2091_v10, %s5485_s30  ;;  %1038 = vrot.lane.b32.xlu1 %v1019_v1, %s5485_s30  ;;  %v2224_v10 = vcombine.high %v6218_v6, %v6218_v6  ;;  %v2342_v6 = vcombine.high %v6115_v41, %v6115_v41 }
 0x29c   : > { %v2473_v54 = vcombine.high %v2471_v12, %v2471_v12  ;;  %v2480_v14 = vrot.slane %v2471_v12, %v5846_v58  ;;  %v2395_v12 = vrot.slane %v2357_v15, %v5953_v44 }
 0x29d   : > { %v6316_v34 = vpop.trf.xlu1  ;;  %v2364_v41 = vrot.slane %v2342_v6, %v5846_v58 }
 0x29e   : > { %v2487_v33 = vrot.slane %v2473_v54, %v5846_v58  ;;  %v2488_v38 = vcombine.high %v2480_v14, %v2480_v14  ;;  %v2496_v55 = vrot.slane %v2480_v14, %v5846_v58  ;;  %v4639_v24 = vadd.f32 %v4637_v19, %v6316_v34 }
 0x29f   : > { %2120 = vrot.lane.b32.xlu0 %v2099_v21, %s5485_s30  ;;  %1188 = vrot.lane.b32.xlu1 %v1171_v28, %s5487_s6  ;;  %v2193_v54 = vrot.slane %v2179_v23, %v5846_v58  ;;  %v2077_v19 = vcombine.high %v6296_v9, %v6296_v9  ;;  %v2226_v21 = vcombine.high %v6314_v22, %v6314_v22 }
 0x2a0   : > { %v2489_v39 = vcombine.high %v2487_v33, %v2487_v33  ;;  %v2503_v32 = vrot.slane %v2487_v33, %v5846_v58  ;;  %v2510_v35 = vrot.slane %v2488_v38, %v5846_v58  ;;  %v2518_v36 = vcombine.high %v2496_v55, %v2496_v55  ;;  %2530 = vst.msk [vmem:[%s5859_s7 + $0x18] sm:$0x1] %vm903_vm9, %v2496_v55 }
 0x2a1   : > { %v4641_v49 = vcombine.high %v4639_v24, %v4639_v24  ;;  %v4648_v27 = vrot.slane %v4639_v24, %v5846_v58  ;;  %v2209_v20 = vrot.slane %v2193_v54, %v5846_v58  ;;  %v2107_v28 = vrot.slane %v2077_v19, %v5953_v44 }
 0x2a2   : > { %v2517_v57 = vrot.slane %v2489_v39, %v5846_v58  ;;  %v2519_v40 = vcombine.high %v2503_v32, %v2503_v32  ;;  %v2520_v50 = vcombine.high %v2510_v35, %v2510_v35  ;;  %2531 = vst.msk [vmem:[%s5859_s7 + $0x38] sm:$0x1] %vm903_vm9, %v2510_v35  ;;  %2532 = vst.msk [vmem:[%s5859_s7 + $0x58] sm:$0x1] %vm903_vm9, %v2518_v36 }
 0x2a3   : > { %2534 = vst.msk [vmem:[%s5859_s7 + $0x98] sm:$0x1] %vm903_vm9, %v2503_v32  ;;  %2262 = vrot.lane.b32.xlu0 %v2235_v7, %s5487_s6  ;;  %1330 = vrot.lane.b32.xlu1 %v1307_v37, %s5486_s5  ;;  %v4655_v52 = vrot.slane %v4641_v49, %v5846_v58  ;;  %v4656_v31 = vcombine.high %v4648_v27, %v4648_v27 }
 0x2a4   : > { %v4664_v26 = vrot.slane %v4648_v27, %v5846_v58  ;;  %v2521_v43 = vcombine.high %v2517_v57, %v2517_v57  ;;  %2533 = vst.msk [vmem:[%s5859_s7 + $0x78] sm:$0x1] %vm903_vm9, %v2520_v50  ;;  %2535 = vst.msk [vmem:[%s5859_s7 + $0xb8] sm:$0x1] %vm903_vm9, %v2517_v57  ;;  %v2247_v18 = vrot.slane %v2209_v20, %v5953_v44 }
 0x2a5   : > { %2536 = vst.msk [vmem:[%s5859_s7 + $0xd8] sm:$0x1] %vm903_vm9, %v2519_v40  ;;  %v4657_v17 = vcombine.high %v4655_v52, %v4655_v52  ;;  %v4671_v61 = vrot.slane %v4655_v52, %v5846_v58  ;;  %v4678_v60 = vrot.slane %v4656_v31, %v5846_v58  ;;  %v2195_v33 = vcombine.high %v2193_v54, %v2193_v54 }
 0x2a6   : > { %v4686_v0 = vcombine.high %v4664_v26, %v4664_v26  ;;  %4698 = vst.msk [vmem:[%s5859_s7 + $0x19] sm:$0x1] %vm903_vm9, %v4664_v26  ;;  %2537 = vst.msk [vmem:[%s5859_s7 + $0xf8] sm:$0x1] %vm903_vm9, %v2521_v43  ;;  %v2243_v9 = vrot.slane %v2226_v21, %v5953_v44  ;;  %v2383_v38 = vrot.slane %v2364_v41, %v5953_v44 }
 0x2a7   : > { %2412 = vrot.lane.b32.xlu0 %v2387_v56, %s5486_s5  ;;  %1334 = vrot.lane.b32.xlu1 %v1315_v16, %s5486_s5  ;;  %v4685_v1 = vrot.slane %v4657_v17, %v5846_v58  ;;  %v4687_v3 = vcombine.high %v4671_v61, %v4671_v61  ;;  %v4688_v4 = vcombine.high %v4678_v60, %v4678_v60 }
 0x2a8   : > { %4699 = vst.msk [vmem:[%s5859_s7 + $0x39] sm:$0x1] %vm903_vm9, %v4678_v60  ;;  %4700 = vst.msk [vmem:[%s5859_s7 + $0x59] sm:$0x1] %vm903_vm9, %v4686_v0  ;;  %v2239_v16 = vrot.slane %v2224_v10, %v5953_v44  ;;  %v2223_v55 = vrot.slane %v2195_v33, %v5846_v58  ;;  %v995_v22 = vcombine.high %v6254_v46, %v6254_v46 }
 0x2a9   : > { %4702 = vst.msk [vmem:[%s5859_s7 + $0x99] sm:$0x1] %vm903_vm9, %v4671_v61  ;;  %v4689_v14 = vcombine.high %v4685_v1, %v4685_v1  ;;  %4701 = vst.msk [vmem:[%s5859_s7 + $0x79] sm:$0x1] %vm903_vm9, %v4688_v4  ;;  %v1635_v24 = vadd.f32 %v5803_v48, %v5948_v30  ;;  %v1291_v39 = vcombine.high %v6285_v2, %v6285_v2 }
 0x2aa   : > { %4703 = vst.msk [vmem:[%s5859_s7 + $0xb9] sm:$0x1] %vm903_vm9, %v4685_v1  ;;  %4704 = vst.msk [vmem:[%s5859_s7 + $0xd9] sm:$0x1] %vm903_vm9, %v4687_v3  ;;  %v2251_v32 = vrot.slane %v2223_v55, %v5953_v44  ;;  %v1027_v35 = vrot.slane %v995_v22, %v5953_v44  ;;  %v2373_v36 = vcombine.high %v2357_v15, %v2357_v15 }
 0x2ab   : > { %2416 = vrot.lane.b32.xlu0 %v2395_v12, %s5486_s5  ;;  %2114 = vrot.lane.b32.xlu1 %v2087_v13, %s5485_s30  ;;  %4705 = vst.msk [vmem:[%s5859_s7 + $0xf9] sm:$0x1] %vm903_vm9, %v4689_v14  ;;  %v6430_v46 = vrot.slane %v1487_v42, %v5846_v58  ;;  %v6433_v45 = vrot.slane %v1635_v24, %v5846_v58 }
 0x2ac   : > { %v1323_v48 = vrot.slane %v1291_v39, %v5953_v44  ;;  %v2403_v7 = vrot.slane %v2373_v36, %v5953_v44  ;;  %v2227_v2 = vcombine.high %v2223_v55, %v2223_v55  ;;  %v2078_v37 = vcombine.high %v6361_v62, %v6361_v62 }
 0x2ad   : > { %v2047_v49 = vcombine.high %v6267_v59, %v6267_v59  ;;  %v1504_v27 = vcombine.high %v6430_v46, %v6430_v46  ;;  %v1660_v40 = vrot.slane %v6433_v45, %v5846_v58  ;;  %v1783_v59 = vadd.f32 %v5801_v47, %v5948_v30 }
 0x2ae   : > { %v2259_v23 = vrot.slane %v2227_v2, %v5953_v44  ;;  %v2095_v57 = vrot.slane %v2078_v37, %v5953_v44  ;;  %v1637_v31 = vcombine.high %v1635_v24, %v1635_v24  ;;  %v2225_v56 = vcombine.high %v2209_v20, %v2209_v20 }
 0x2af   : > { %1190 = vrot.lane.b32.xlu0 %v1175_v5, %s5487_s6  ;;  %2264 = vrot.lane.b32.xlu1 %v2239_v16, %s5487_s6  ;;  %v2075_v50 = vrot.slane %v2047_v49, %v5846_v58  ;;  %v1526_v52 = vrot.slane %v1504_v27, %v5846_v58  ;;  %v1689_v26 = vrot.slane %v1660_v40, %v5953_v44 }
 0x2b0   : > { %v1792_v15 = vrot.slane %v1783_v59, %v5846_v58  ;;  %v1682_v17 = vcombine.high %v1660_v40, %v1660_v40  ;;  %v2255_v61 = vrot.slane %v2225_v56, %v5953_v44  ;;  %v2374_v47 = vcombine.high %v2364_v41, %v2364_v41 }
 0x2b1   : > { %v2103_v43 = vrot.slane %v2075_v50, %v5953_v44  ;;  %v1545_v62 = vrot.slane %v1526_v52, %v5953_v44  ;;  %v6463_v30 = vrot.slane %v1637_v31, %v5846_v58  ;;  %v2343_v60 = vcombine.high %v6327_v29, %v6327_v29 }
 0x2b2   : > { %v1489_v0 = vcombine.high %v1487_v42, %v1487_v42  ;;  %v1697_v1 = vrot.slane %v1682_v17, %v5953_v44  ;;  %v2391_v3 = vrot.slane %v2374_v47, %v5953_v44  ;;  %v1800_v25 = vcombine.high %v1792_v15, %v1792_v15 }
 0x2b3   : > { %2124 = vrot.lane.b32.xlu0 %v2107_v28, %s5485_s30  ;;  %2268 = vrot.lane.b32.xlu1 %v2247_v18, %s5487_s6  ;;  %v1667_v4 = vrot.slane %v6463_v30, %v5846_v58  ;;  %v2371_v10 = vrot.slane %v2343_v60, %v5846_v58  ;;  %v2079_v14 = vcombine.high %v2075_v50, %v2075_v50 }
 0x2b4   : > { %v1503_v29 = vrot.slane %v1489_v0, %v5846_v58  ;;  %v1822_v54 = vrot.slane %v1800_v25, %v5846_v58  ;;  %v1536_v6 = vcombine.high %v1526_v52, %v1526_v52  ;;  %v1785_v28 = vcombine.high %v1783_v59, %v1783_v59 }
 0x2b5   : > { %v1705_v12 = vrot.slane %v1667_v4, %v5953_v44  ;;  %v2399_v13 = vrot.slane %v2371_v10, %v5953_v44  ;;  %v2111_v19 = vrot.slane %v2079_v14, %v5953_v44  ;;  %v2375_v20 = vcombine.high %v2371_v10, %v2371_v10 }
 0x2b6   : > { %v1841_v16 = vrot.slane %v1822_v54, %v5953_v44  ;;  %v1505_v21 = vcombine.high %v1503_v29, %v1503_v29  ;;  %v1553_v41 = vrot.slane %v1536_v6, %v5953_v44  ;;  %v1799_v55 = vrot.slane %v1785_v28, %v5846_v58 }
 0x2b7   : > { %2266 = vrot.lane.b32.xlu0 %v2243_v9, %s5487_s6  ;;  %2410 = vrot.lane.b32.xlu1 %v2383_v38, %s5486_s5  ;;  %v2407_v33 = vrot.slane %v2375_v20, %v5953_v44  ;;  %v1512_v38 = vrot.slane %v6430_v46, %v5846_v58  ;;  %v1683_v42 = vcombine.high %v1667_v4, %v1667_v4 }
 0x2b8   : > { %v1533_v9 = vrot.slane %v1505_v21, %v5846_v58  ;;  %v2571_v24 = vadd.f32 %v5809_v51, %v6291_v8  ;;  %v1801_v37 = vcombine.high %v1799_v55, %v1799_v55  ;;  %v1652_v59 = vcombine.high %v6433_v45, %v6433_v45 }
 0x2b9   : > { %v1713_v46 = vrot.slane %v1683_v42, %v5953_v44  ;;  %v1534_v2 = vcombine.high %v1512_v38, %v1512_v38  ;;  %v1815_v10 = vrot.slane %v1799_v55, %v5846_v58 }
 0x2ba   : > { %v1561_v39 = vrot.slane %v1533_v9, %v5953_v44  ;;  %v1829_v40 = vrot.slane %v1801_v37, %v5846_v58  ;;  %v1674_v56 = vrot.slane %v1652_v59, %v5846_v58  ;;  %v1537_v45 = vcombine.high %v1533_v9, %v1533_v9  ;;  %v2686_v37 = vld [vmem:[%s5602_s4 + $0x1c] sm:$0x1] }
 0x2bb   : > { %2270 = vrot.lane.b32.xlu0 %v2251_v32, %s5487_s6  ;;  %1042 = vrot.lane.b32.xlu1 %v1027_v35, %s5485_s30  ;;  %v1541_v32 = vrot.slane %v1512_v38, %v5953_v44  ;;  %v1808_v35 = vrot.slane %v1792_v15, %v5846_v58  ;;  %v2573_v15 = vcombine.high %v2571_v24, %v2571_v24 }
 0x2bc   : > { %v1857_v31 = vrot.slane %v1829_v40, %v5953_v44  ;;  %v1833_v60 = vcombine.high %v1829_v40, %v1829_v40  ;;  %v2689_v40 = vld [vmem:[%s5602_s4 + $0x7c] sm:$0x1] }
 0x2bd   : > { %v1837_v51 = vrot.slane %v1808_v35, %v5953_v44  ;;  %v1830_v47 = vcombine.high %v1808_v35, %v1808_v35  ;;  %v6539_v0 = vrot.slane %v2573_v15, %v5846_v58  ;;  %v2687_v35 = vld [vmem:[%s5602_s4 + $0x3c] sm:$0x1] }
 0x2be   : > { %v1865_v25 = vrot.slane %v1833_v60, %v5953_v44 }
 0x2bf   : > { %2420 = vrot.lane.b32.xlu0 %v2403_v7, %s5486_s5  ;;  %1338 = vrot.lane.b32.xlu1 %v1323_v48, %s5486_s5  ;;  %v1832_v48 = vcombine.high %v1822_v54, %v1822_v54  ;;  %v2580_v7 = vrot.slane %v2571_v24, %v5846_v58  ;;  %v1845_v4 = vrot.slane %v1830_v47, %v5953_v44 }
 0x2c1   : > { %v1849_v27 = vrot.slane %v1832_v48, %v5953_v44  ;;  %v2588_v50 = vcombine.high %v2580_v7, %v2580_v7  ;;  %v2596_v14 = vrot.slane %v2580_v7, %v5846_v58  ;;  %v1831_v7 = vcombine.high %v1815_v10, %v1815_v10 }
 0x2c3   : > { %2274 = vrot.lane.b32.xlu0 %v2259_v23, %s5487_s6  ;;  %2118 = vrot.lane.b32.xlu1 %v2095_v57, %s5485_s30  ;;  %v1519_v23 = vrot.slane %v1503_v29, %v5846_v58  ;;  %v1549_v57 = vrot.slane %v1534_v2, %v5953_v44  ;;  %v2625_v20 = vrot.slane %v2596_v14, %v5953_v44  ;;  %v2702_v2 = vrot.slane %v2687_v35, 7 }
 0x2c5   : > { %v1535_v28 = vcombine.high %v1519_v23, %v1519_v23  ;;  %v2703_v59 = vsel %vm823_vm2, %v2702_v2, %v2686_v37 }
 0x2c7   : > { %1718 = vrot.lane.b32.xlu0 %v1689_v26, %s5487_s6  ;;  %2122 = vrot.lane.b32.xlu1 %v2103_v43, %s5485_s30  ;;  %v1557_v26 = vrot.slane %v1519_v23, %v5953_v44  ;;  %v2610_v43 = vrot.slane %v2588_v50, %v5846_v58  ;;  %v1565_v38 = vrot.slane %v1535_v28, %v5953_v44 }
 0x2c8   : > { %v1861_v23 = vrot.slane %v1831_v7, %v5953_v44 }
 0x2c9   : > { %v2629_v17 = vrot.slane %v2610_v43, %v5953_v44  ;;  %v2620_v54 = vcombine.high %v2610_v43, %v2610_v43 }
 0x2cb   : > { %1572 = vrot.lane.b32.xlu0 %v1545_v62, %s5485_s30  ;;  %2272 = vrot.lane.b32.xlu1 %v2255_v61, %s5487_s6  ;;  %v1693_v61 = vrot.slane %v1674_v56, %v5953_v44 }
 0x2cf   : > { %1722 = vrot.lane.b32.xlu0 %v1697_v1, %s5487_s6  ;;  %2414 = vrot.lane.b32.xlu1 %v2391_v3, %s5486_s5  ;;  %v1569_v3 = vrot.slane %v1537_v45, %v5953_v44  ;;  %v2603_v45 = vrot.slane %v6539_v0, %v5846_v58 }
 0x2d3   : > { %1726 = vrot.lane.b32.xlu0 %v1705_v12, %s5487_s6  ;;  %2418 = vrot.lane.b32.xlu1 %v2399_v13, %s5486_s5  ;;  %v1853_v13 = vrot.slane %v1815_v10, %v5953_v44 }
 0x2d4   : > { %v1325_v5 = vpop.permute.xlu0 %1324 }
 0x2d5   : > { %1348 = vst.msk [vmem:[%s5859_s7 + $0x6] sm:$0x1] %vm903_vm9, %v1325_v5  ;;  %v2589_v5 = vcombine.high %v6539_v0, %v6539_v0 }
 0x2d7   : > { %1868 = vrot.lane.b32.xlu0 %v1841_v16, %s5486_s5  ;;  %2126 = vrot.lane.b32.xlu1 %v2111_v19, %s5485_s30  ;;  %v2637_v19 = vrot.slane %v2620_v54, %v5953_v44  ;;  %v2617_v21 = vrot.slane %v2589_v5, %v5846_v58  ;;  %v2693_v54 = vld [vmem:[%s5602_s4 + $0xfc] sm:$0x1] }
 0x2d8   : > { %v1037_v18 = vpop.permute.xlu0 %1036 }
 0x2d9   : > { %1056 = vst.msk [vmem:[%s5859_s7 + $0x82] sm:$0x1] %vm903_vm9, %v1037_v18  ;;  %v1684_v18 = vcombine.high %v1674_v56, %v1674_v56  ;;  %v2645_v9 = vrot.slane %v2617_v21, %v5953_v44  ;;  %v2621_v55 = vcombine.high %v2617_v21, %v2617_v21 }
 0x2db   : > { %1576 = vrot.lane.b32.xlu0 %v1553_v41, %s5485_s30  ;;  %2422 = vrot.lane.b32.xlu1 %v2407_v33, %s5486_s5 }
 0x2dc   : > { %v1179_v22 = vpop.permute.xlu0 %1178 }
 0x2dd   : > { %1201 = vst.msk [vmem:[%s5859_s7 + $0x24] sm:$0x1] %vm903_vm9, %v1179_v22  ;;  %v1653_v22 = vcombine.high %v6463_v30, %v6463_v30 }
 0x2df   : > { %1580 = vrot.lane.b32.xlu0 %v1561_v39, %s5485_s30  ;;  %1570 = vrot.lane.b32.xlu1 %v1541_v32, %s5485_s30  ;;  %v2653_v39 = vrot.slane %v2621_v55, %v5953_v44  ;;  %v1701_v32 = vrot.slane %v1684_v18, %v5953_v44  ;;  %v1681_v30 = vrot.slane %v1653_v22, %v5846_v58 }
 0x2e0   : > { %v1329_v36 = vpop.permute.xlu0 %1328 }
 0x2e1   : > { %1350 = vst.msk [vmem:[%s5859_s7 + $0x46] sm:$0x1] %vm903_vm9, %v1329_v36  ;;  %v1709_v48 = vrot.slane %v1681_v30, %v5953_v44  ;;  %v1685_v0 = vcombine.high %v1681_v30, %v1681_v30 }
 0x2e3   : > { %1730 = vrot.lane.b32.xlu0 %v1713_v46, %s5487_s6  ;;  %1866 = vrot.lane.b32.xlu1 %v1837_v51, %s5486_s5  ;;  %v2688_v51 = vld [vmem:[%s5602_s4 + $0x5c] sm:$0x1] }
 0x2e4   : > { %v1333_v49 = vpop.permute.xlu0 %1332  ;;  %v2704_v50 = vrot.slane %v2688_v51, 6 }
 0x2e5   : > { %1352 = vst.msk [vmem:[%s5859_s7 + $0x86] sm:$0x1] %vm903_vm9, %v1333_v49 }
 0x2e6   : > { %v2705_v15 = vsel %vm826_vm3, %v2704_v50, %v2703_v59 }
 0x2e7   : > { %1872 = vrot.lane.b32.xlu0 %v1849_v27, %s5486_s5  ;;  %1574 = vrot.lane.b32.xlu1 %v1549_v57, %s5485_s30  ;;  %v2618_v57 = vcombine.high %v2596_v14, %v2596_v14 }
 0x2e9   : > { %v1029_v52 = vpop.permute.xlu1 %1028  ;;  %v2633_v56 = vrot.slane %v2618_v57, %v5953_v44 }
 0x2ea   : > { %1052 = vst.msk [vmem:[%s5859_s7 + $0x2] sm:$0x1] %vm903_vm9, %v1029_v52  ;;  %v2690_v52 = vld [vmem:[%s5602_s4 + $0x9c] sm:$0x1] }
 0x2eb   : > { %1876 = vrot.lane.b32.xlu0 %v1857_v31, %s5486_s5  ;;  %1578 = vrot.lane.b32.xlu1 %v1557_v26, %s5485_s30  ;;  %v2706_v31 = vrot.slane %v2689_v40, 5 }
 0x2ed   : > { %v1177_v62 = vpop.permute.xlu1 %1176 }
 0x2ee   : > { %1200 = vst.msk [vmem:[%s5859_s7 + $0x4] sm:$0x1] %vm903_vm9, %v1177_v62  ;;  %v2691_v62 = vld [vmem:[%s5602_s4 + $0xbc] sm:$0x1] }
 0x2ef   : > { %2656 = vrot.lane.b32.xlu0 %v2629_v17, %s5485_s30  ;;  %1720 = vrot.lane.b32.xlu1 %v1693_v61, %s5487_s6  ;;  %v2708_v17 = vrot.slane %v2690_v52, 4  ;;  %v2707_v61 = vsel %vm829_vm4, %v2706_v31, %v2705_v15 }
 0x2f1   : > { %v1031_v1 = vpop.permute.xlu1 %1030  ;;  %v2709_v10 = vsel %vm832_vm5, %v2708_v17, %v2707_v61 }
 0x2f2   : > { %1053 = vst.msk [vmem:[%s5859_s7 + $0x22] sm:$0x1] %vm903_vm9, %v1031_v1  ;;  %v2641_v1 = vrot.slane %v2603_v45, %v5953_v44 }
 0x2f3   : > { %1584 = vrot.lane.b32.xlu0 %v1569_v3, %s5485_s30  ;;  %1870 = vrot.lane.b32.xlu1 %v1845_v4, %s5486_s5  ;;  %v2692_v3 = vld [vmem:[%s5602_s4 + $0xdc] sm:$0x1]  ;;  %v2710_v4 = vrot.slane %v2691_v62, 3 }
 0x2f4   : > { %v2712_v14 = vrot.slane %v2692_v3, 2 }
 0x2f5   : > { %v2113_v29 = vpop.permute.xlu0 %2112  ;;  %v1033_v12 = vpop.permute.xlu1 %1032  ;;  %v2711_v5 = vsel %vm835_vm6, %v2710_v4, %v2709_v10 }
 0x2f6   : > { %2136 = vst.msk [vmem:[%s5859_s7 + $0x12] sm:$0x1] %vm903_vm9, %v2113_v29  ;;  %1054 = vst.msk [vmem:[%s5859_s7 + $0x42] sm:$0x1] %vm903_vm9, %v1033_v12  ;;  %v1717_v12 = vrot.slane %v1685_v0, %v5953_v44  ;;  %v2713_v21 = vsel %vm838_vm7, %v2712_v14, %v2711_v5 }
 0x2f7   : > { %1880 = vrot.lane.b32.xlu0 %v1865_v25, %s5486_s5  ;;  %1874 = vrot.lane.b32.xlu1 %v1853_v13, %s5486_s5  ;;  %v2619_v13 = vcombine.high %v2603_v45, %v2603_v45 }
 0x2f9   : > { %v2409_v6 = vpop.permute.xlu0 %2408  ;;  %v1181_v16 = vpop.permute.xlu1 %1180 }
 0x2fa   : > { %2432 = vst.msk [vmem:[%s5859_s7 + $0x16] sm:$0x1] %vm903_vm9, %v2409_v6  ;;  %1202 = vst.msk [vmem:[%s5859_s7 + $0x44] sm:$0x1] %vm903_vm9, %v1181_v16  ;;  %v2714_v6 = vrot.slane %v2693_v54, 1 }
 0x2fb   : > { %2660 = vrot.lane.b32.xlu0 %v2637_v19, %s5485_s30  ;;  %2654 = vrot.lane.b32.xlu1 %v2625_v20, %s5485_s30  ;;  %v2649_v20 = vrot.slane %v2619_v13, %v5953_v44 }
 0x2fc   : > { %v2715_v28 = vsel %vm841_vm8, %v2714_v6, %v2713_v21  ;;  %v2836_v21 = vld [vmem:[%s5602_s4 + $0x5e] sm:$0x1] }
 0x2fd   : > { %v1041_v41 = vpop.permute.xlu0 %1040  ;;  %v1185_v33 = vpop.permute.xlu1 %1184 }
 0x2fe   : > { %1058 = vst.msk [vmem:[%s5859_s7 + $0xc2] sm:$0x1] %vm903_vm9, %v1041_v41  ;;  %1204 = vst.msk [vmem:[%s5859_s7 + $0x84] sm:$0x1] %vm903_vm9, %v1185_v33 }
 0x2ff   : > { %2664 = vrot.lane.b32.xlu0 %v2645_v9, %s5485_s30  ;;  %1582 = vrot.lane.b32.xlu1 %v1565_v38, %s5485_s30 }
 0x301   : > { %v1183_v42 = vpop.permute.xlu0 %1182  ;;  %v1327_v24 = vpop.permute.xlu1 %1326 }
 0x302   : > { %1203 = vst.msk [vmem:[%s5859_s7 + $0x64] sm:$0x1] %vm903_vm9, %v1183_v42  ;;  %1349 = vst.msk [vmem:[%s5859_s7 + $0x26] sm:$0x1] %vm903_vm9, %v1327_v24 }
 0x303   : > { %2668 = vrot.lane.b32.xlu0 %v2653_v39, %s5485_s30  ;;  %1724 = vrot.lane.b32.xlu1 %v1701_v32, %s5487_s6 }
 0x305   : > { %v1187_v36 = vpop.permute.xlu0 %1186  ;;  %v2261_v46 = vpop.permute.xlu1 %2260 }
 0x306   : > { %1205 = vst.msk [vmem:[%s5859_s7 + $0xa4] sm:$0x1] %vm903_vm9, %v1187_v36  ;;  %2284 = vst.msk [vmem:[%s5859_s7 + $0x14] sm:$0x1] %vm903_vm9, %v2261_v46 }
 0x307   : > { %1728 = vrot.lane.b32.xlu1 %v1709_v48, %s5487_s6 }
 0x309   : > { %v1337_v49 = vpop.permute.xlu0 %1336  ;;  %v1035_v27 = vpop.permute.xlu1 %1034 }
 0x30a   : > { %1354 = vst.msk [vmem:[%s5859_s7 + $0xc6] sm:$0x1] %vm903_vm9, %v1337_v49  ;;  %1055 = vst.msk [vmem:[%s5859_s7 + $0x62] sm:$0x1] %vm903_vm9, %v1035_v27 }
 0x30b   : > { %1878 = vrot.lane.b32.xlu1 %v1861_v23, %s5486_s5 }
 0x30d   : > { %v2117_v26 = vpop.permute.xlu0 %2116  ;;  %v1039_v43 = vpop.permute.xlu1 %1038 }
 0x30e   : > { %2138 = vst.msk [vmem:[%s5859_s7 + $0x52] sm:$0x1] %vm903_vm9, %v2117_v26  ;;  %1057 = vst.msk [vmem:[%s5859_s7 + $0xa2] sm:$0x1] %vm903_vm9, %v1039_v43 }
 0x30f   : > { %2658 = vrot.lane.b32.xlu1 %v2633_v56, %s5485_s30 }
 0x311   : > { %v2121_v47 = vpop.permute.xlu0 %2120  ;;  %v1189_v60 = vpop.permute.xlu1 %1188 }
 0x312   : > { %2140 = vst.msk [vmem:[%s5859_s7 + $0x92] sm:$0x1] %vm903_vm9, %v2121_v47  ;;  %1206 = vst.msk [vmem:[%s5859_s7 + $0xc4] sm:$0x1] %vm903_vm9, %v1189_v60 }
 0x313   : > { %2662 = vrot.lane.b32.xlu1 %v2641_v1, %s5485_s30 }
 0x315   : > { %v2263_v25 = vpop.permute.xlu0 %2262  ;;  %v1331_v29 = vpop.permute.xlu1 %1330 }
 0x316   : > { %2285 = vst.msk [vmem:[%s5859_s7 + $0x34] sm:$0x1] %vm903_vm9, %v2263_v25  ;;  %1351 = vst.msk [vmem:[%s5859_s7 + $0x66] sm:$0x1] %vm903_vm9, %v1331_v29 }
 0x317   : > { %1732 = vrot.lane.b32.xlu1 %v1717_v12, %s5487_s6 }
 0x319   : > { %v2413_v16 = vpop.permute.xlu0 %2412  ;;  %v1335_v19 = vpop.permute.xlu1 %1334 }
 0x31a   : > { %2434 = vst.msk [vmem:[%s5859_s7 + $0x56] sm:$0x1] %vm903_vm9, %v2413_v16  ;;  %1353 = vst.msk [vmem:[%s5859_s7 + $0xa6] sm:$0x1] %vm903_vm9, %v1335_v19  ;;  %v2835_v16 = vld [vmem:[%s5602_s4 + $0x3e] sm:$0x1] }
 0x31b   : > { %2666 = vrot.lane.b32.xlu1 %v2649_v20, %s5485_s30 }
 0x31d   : > { %v2417_v18 = vpop.permute.xlu0 %2416  ;;  %v2115_v41 = vpop.permute.xlu1 %2114 }
 0x31e   : > { %2436 = vst.msk [vmem:[%s5859_s7 + $0x96] sm:$0x1] %vm903_vm9, %v2417_v18  ;;  %2137 = vst.msk [vmem:[%s5859_s7 + $0x32] sm:$0x1] %vm903_vm9, %v2115_v41  ;;  %v2834_v18 = vld [vmem:[%s5602_s4 + $0x1e] sm:$0x1] }
 0x31f   : > { %2716 = vrot.lane.b32.xlu1 %v2715_v28, %s5487_s6  ;;  %v2850_v28 = vrot.slane %v2835_v16, 7 }
 0x321   : > { %v1191_v33 = vpop.permute.xlu0 %1190  ;;  %v2265_v9 = vpop.permute.xlu1 %2264 }
 0x322   : > { %1207 = vst.msk [vmem:[%s5859_s7 + $0xe4] sm:$0x1] %vm903_vm9, %v1191_v33  ;;  %2286 = vst.msk [vmem:[%s5859_s7 + $0x54] sm:$0x1] %vm903_vm9, %v2265_v9  ;;  %v2837_v9 = vld [vmem:[%s5602_s4 + $0x7e] sm:$0x1] }
 0x325   : > { %v2125_v38 = vpop.permute.xlu0 %2124  ;;  %v2269_v55 = vpop.permute.xlu1 %2268 }
 0x326   : > { %2142 = vst.msk [vmem:[%s5859_s7 + $0xd2] sm:$0x1] %vm903_vm9, %v2125_v38  ;;  %2288 = vst.msk [vmem:[%s5859_s7 + $0x94] sm:$0x1] %vm903_vm9, %v2269_v55  ;;  %v2852_v38 = vrot.slane %v2836_v21, 6 }
 0x329   : > { %v2267_v22 = vpop.permute.xlu0 %2266  ;;  %v2411_v42 = vpop.permute.xlu1 %2410 }
 0x32a   : > { %2287 = vst.msk [vmem:[%s5859_s7 + $0x74] sm:$0x1] %vm903_vm9, %v2267_v22  ;;  %2433 = vst.msk [vmem:[%s5859_s7 + $0x36] sm:$0x1] %vm903_vm9, %v2411_v42 }
 0x32d   : > { %v2271_v24 = vpop.permute.xlu0 %2270  ;;  %v1043_v39 = vpop.permute.xlu1 %1042 }
 0x32e   : > { %2289 = vst.msk [vmem:[%s5859_s7 + $0xb4] sm:$0x1] %vm903_vm9, %v2271_v24  ;;  %1059 = vst.msk [vmem:[%s5859_s7 + $0xe2] sm:$0x1] %vm903_vm9, %v1043_v39  ;;  %v2851_v24 = vsel %vm823_vm2, %v2850_v28, %v2834_v18  ;;  %v3083_v28 = vld [vmem:[%s5602_s4 + $0x63] sm:$0x1] }
 0x331   : > { %v2421_v32 = vpop.permute.xlu0 %2420  ;;  %v1339_v30 = vpop.permute.xlu1 %1338 }
 0x332   : > { %2438 = vst.msk [vmem:[%s5859_s7 + $0xd6] sm:$0x1] %vm903_vm9, %v2421_v32  ;;  %1355 = vst.msk [vmem:[%s5859_s7 + $0xe6] sm:$0x1] %vm903_vm9, %v1339_v30  ;;  %v2838_v32 = vld [vmem:[%s5602_s4 + $0x9e] sm:$0x1] }
 0x333   : > { %v2854_v30 = vrot.slane %v2837_v9, 5 }
 0x335   : > { %v2275_v35 = vpop.permute.xlu0 %2274  ;;  %v2119_v36 = vpop.permute.xlu1 %2118 }
 0x336   : > { %2291 = vst.msk [vmem:[%s5859_s7 + $0xf4] sm:$0x1] %vm903_vm9, %v2275_v35  ;;  %2139 = vst.msk [vmem:[%s5859_s7 + $0x72] sm:$0x1] %vm903_vm9, %v2119_v36 }
 0x339   : > { %v1719_v46 = vpop.permute.xlu0 %1718  ;;  %v2123_v48 = vpop.permute.xlu1 %2122 }
 0x33a   : > { %1742 = vst.msk [vmem:[%s5859_s7 + $0xc] sm:$0x1] %vm903_vm9, %v1719_v46  ;;  %2141 = vst.msk [vmem:[%s5859_s7 + $0xb2] sm:$0x1] %vm903_vm9, %v2123_v48  ;;  %v2853_v46 = vsel %vm826_vm3, %v2852_v38, %v2851_v24 }
 0x33d   : > { %v1573_v7 = vpop.permute.xlu0 %1572  ;;  %v2273_v51 = vpop.permute.xlu1 %2272 }
 0x33e   : > { %1595 = vst.msk [vmem:[%s5859_s7 + $0x2a] sm:$0x1] %vm903_vm9, %v1573_v7  ;;  %2290 = vst.msk [vmem:[%s5859_s7 + $0xd4] sm:$0x1] %vm903_vm9, %v2273_v51 }
 0x341   : > { %v1723_v2 = vpop.permute.xlu0 %1722  ;;  %v2415_v37 = vpop.permute.xlu1 %2414 }
 0x342   : > { %1744 = vst.msk [vmem:[%s5859_s7 + $0x4c] sm:$0x1] %vm903_vm9, %v1723_v2  ;;  %2435 = vst.msk [vmem:[%s5859_s7 + $0x76] sm:$0x1] %vm903_vm9, %v2415_v37  ;;  %v2839_v2 = vld [vmem:[%s5602_s4 + $0xbe] sm:$0x1] }
 0x343   : > { %v2856_v37 = vrot.slane %v2838_v32, 4 }
 0x345   : > { %v1727_v49 = vpop.permute.xlu0 %1726  ;;  %v2419_v27 = vpop.permute.xlu1 %2418 }
 0x346   : > { %1746 = vst.msk [vmem:[%s5859_s7 + $0x8c] sm:$0x1] %vm903_vm9, %v1727_v49  ;;  %2437 = vst.msk [vmem:[%s5859_s7 + $0xb6] sm:$0x1] %vm903_vm9, %v2419_v27  ;;  %v2855_v49 = vsel %vm829_vm4, %v2854_v30, %v2853_v46 }
 0x349   : > { %v1869_v23 = vpop.permute.xlu0 %1868  ;;  %v2127_v57 = vpop.permute.xlu1 %2126 }
 0x34a   : > { %1891 = vst.msk [vmem:[%s5859_s7 + $0x2e] sm:$0x1] %vm903_vm9, %v1869_v23  ;;  %2143 = vst.msk [vmem:[%s5859_s7 + $0xf2] sm:$0x1] %vm903_vm9, %v2127_v57 }
 0x34d   : > { %v1577_v40 = vpop.permute.xlu0 %1576  ;;  %v2423_v50 = vpop.permute.xlu1 %2422 }
 0x34e   : > { %1597 = vst.msk [vmem:[%s5859_s7 + $0x6a] sm:$0x1] %vm903_vm9, %v1577_v40  ;;  %2439 = vst.msk [vmem:[%s5859_s7 + $0xf6] sm:$0x1] %vm903_vm9, %v2423_v50  ;;  %v2840_v50 = vld [vmem:[%s5602_s4 + $0xde] sm:$0x1] }
 0x351   : > { %v1581_v59 = vpop.permute.xlu0 %1580  ;;  %v1571_v52 = vpop.permute.xlu1 %1570 }
 0x352   : > { %1599 = vst.msk [vmem:[%s5859_s7 + $0xaa] sm:$0x1] %vm903_vm9, %v1581_v59  ;;  %1594 = vst.msk [vmem:[%s5859_s7 + $0xa] sm:$0x1] %vm903_vm9, %v1571_v52  ;;  %v2858_v59 = vrot.slane %v2839_v2, 3  ;;  %v2857_v52 = vsel %vm832_vm5, %v2856_v37, %v2855_v49 }
 0x353   : > { %v3086_v49 = vld [vmem:[%s5602_s4 + $0xc3] sm:$0x1] }
 0x355   : > { %v1731_v31 = vpop.permute.xlu0 %1730  ;;  %v1867_v26 = vpop.permute.xlu1 %1866 }
 0x356   : > { %1748 = vst.msk [vmem:[%s5859_s7 + $0xcc] sm:$0x1] %vm903_vm9, %v1731_v31  ;;  %1890 = vst.msk [vmem:[%s5859_s7 + $0xe] sm:$0x1] %vm903_vm9, %v1867_v26 }
 0x359   : > { %v1873_v43 = vpop.permute.xlu0 %1872  ;;  %v1575_v56 = vpop.permute.xlu1 %1574 }
 0x35a   : > { %1893 = vst.msk [vmem:[%s5859_s7 + $0x6e] sm:$0x1] %vm903_vm9, %v1873_v43  ;;  %1596 = vst.msk [vmem:[%s5859_s7 + $0x4a] sm:$0x1] %vm903_vm9, %v1575_v56  ;;  %v2841_v43 = vld [vmem:[%s5602_s4 + $0xfe] sm:$0x1] }
 0x35b   : > { %v2860_v56 = vrot.slane %v2840_v50, 2  ;;  %v3087_v50 = vld [vmem:[%s5602_s4 + $0xe3] sm:$0x1] }
 0x35d   : > { %v1877_v45 = vpop.permute.xlu0 %1876  ;;  %v1579_v15 = vpop.permute.xlu1 %1578 }
 0x35e   : > { %1895 = vst.msk [vmem:[%s5859_s7 + $0xae] sm:$0x1] %vm903_vm9, %v1877_v45  ;;  %1598 = vst.msk [vmem:[%s5859_s7 + $0x8a] sm:$0x1] %vm903_vm9, %v1579_v15 }
 0x361   : > { %v2657_v62 = vpop.permute.xlu0 %2656  ;;  %v1721_v17 = vpop.permute.xlu1 %1720 }
 0x362   : > { %2679 = vst.msk [vmem:[%s5859_s7 + $0x3a] sm:$0x1] %vm903_vm9, %v2657_v62  ;;  %1743 = vst.msk [vmem:[%s5859_s7 + $0x2c] sm:$0x1] %vm903_vm9, %v1721_v17  ;;  %v2859_v62 = vsel %vm835_vm6, %v2858_v59, %v2857_v52  ;;  %v2862_v17 = vrot.slane %v2841_v43, 1  ;;  %v3106_v59 = vrot.slane %v3086_v49, 2 }
 0x363   : > { %v3108_v43 = vrot.slane %v3087_v50, 1  ;;  %v3235_v49 = vld [vmem:[%s5602_s4 + $0xe5] sm:$0x1] }
 0x364   : > { %v3256_v50 = vrot.slane %v3235_v49, 1 }
 0x365   : > { %v1585_v61 = vpop.permute.xlu0 %1584  ;;  %v1871_v47 = vpop.permute.xlu1 %1870 }
 0x366   : > { %1601 = vst.msk [vmem:[%s5859_s7 + $0xea] sm:$0x1] %vm903_vm9, %v1585_v61  ;;  %1892 = vst.msk [vmem:[%s5859_s7 + $0x4e] sm:$0x1] %vm903_vm9, %v1871_v47  ;;  %v2861_v47 = vsel %vm838_vm7, %v2860_v56, %v2859_v62 }
 0x369   : > { %v1881_v60 = vpop.permute.xlu0 %1880  ;;  %v1875_v1 = vpop.permute.xlu1 %1874 }
 0x36a   : > { %1897 = vst.msk [vmem:[%s5859_s7 + $0xee] sm:$0x1] %vm903_vm9, %v1881_v60  ;;  %1894 = vst.msk [vmem:[%s5859_s7 + $0x8e] sm:$0x1] %vm903_vm9, %v1875_v1  ;;  %v2863_v1 = vsel %vm841_vm8, %v2862_v17, %v2861_v47 }
 0x36d   : > { %v2661_v0 = vpop.permute.xlu0 %2660  ;;  %v2655_v3 = vpop.permute.xlu1 %2654 }
 0x36e   : > { %2681 = vst.msk [vmem:[%s5859_s7 + $0x7a] sm:$0x1] %vm903_vm9, %v2661_v0  ;;  %2678 = vst.msk [vmem:[%s5859_s7 + $0x1a] sm:$0x1] %vm903_vm9, %v2655_v3 }
 0x371   : > { %v2665_v4 = vpop.permute.xlu0 %2664  ;;  %v1583_v10 = vpop.permute.xlu1 %1582 }
 0x372   : > { %2683 = vst.msk [vmem:[%s5859_s7 + $0xba] sm:$0x1] %vm903_vm9, %v2665_v4  ;;  %1600 = vst.msk [vmem:[%s5859_s7 + $0xca] sm:$0x1] %vm903_vm9, %v1583_v10 }
 0x375   : > { %v2669_v25 = vpop.permute.xlu0 %2668  ;;  %v1725_v29 = vpop.permute.xlu1 %1724 }
 0x376   : > { %2685 = vst.msk [vmem:[%s5859_s7 + $0xfa] sm:$0x1] %vm903_vm9, %v2669_v25  ;;  %1745 = vst.msk [vmem:[%s5859_s7 + $0x6c] sm:$0x1] %vm903_vm9, %v1725_v29 }
 0x379   : > { %v1729_v12 = vpop.permute.xlu1 %1728 }
 0x37a   : > { %1747 = vst.msk [vmem:[%s5859_s7 + $0xac] sm:$0x1] %vm903_vm9, %v1729_v12 }
 0x37d   : > { %v1879_v13 = vpop.permute.xlu1 %1878 }
 0x37e   : > { %1896 = vst.msk [vmem:[%s5859_s7 + $0xce] sm:$0x1] %vm903_vm9, %v1879_v13 }
 0x381   : > { %v2659_v54 = vpop.permute.xlu1 %2658 }
 0x382   : > { %2680 = vst.msk [vmem:[%s5859_s7 + $0x5a] sm:$0x1] %vm903_vm9, %v2659_v54  ;;  %v3081_v54 = vld [vmem:[%s5602_s4 + $0x23] sm:$0x1] }
 0x383   : > { %v3096_v16 = vrot.slane %v3081_v54, 7  ;;  %v3228_v54 = vld [vmem:[%s5602_s4 + $0x5] sm:$0x1] }
 0x385   : > { %v2663_v14 = vpop.permute.xlu1 %2662 }
 0x386   : > { %2682 = vst.msk [vmem:[%s5859_s7 + $0x9a] sm:$0x1] %vm903_vm9, %v2663_v14 }
 0x389   : > { %v1733_v5 = vpop.permute.xlu1 %1732 }
 0x38a   : > { %1749 = vst.msk [vmem:[%s5859_s7 + $0xec] sm:$0x1] %vm903_vm9, %v1733_v5 }
 0x38d   : > { %v2667_v6 = vpop.permute.xlu1 %2666 }
 0x38e   : > { %2684 = vst.msk [vmem:[%s5859_s7 + $0xda] sm:$0x1] %vm903_vm9, %v2667_v6  ;;  %v3082_v6 = vld [vmem:[%s5602_s4 + $0x43] sm:$0x1] }
 0x38f   : > { %v3098_v18 = vrot.slane %v3082_v6, 6  ;;  %v3231_v6 = vld [vmem:[%s5602_s4 + $0x65] sm:$0x1] }
 0x391   : > { %v2717_v19 = vpop.permute.xlu1 %2716 }
 0x392   : > { %v2719_v20 = vadd.f32 %v2717_v19, %v6291_v8  ;;  %v3080_v19 = vld [vmem:[%s5602_s4 + $0x3] sm:$0x1] }
 0x393   : > { %v3097_v38 = vsel %vm823_vm2, %v3096_v16, %v3080_v19 }
 0x394   : > { %v2721_v41 = vcombine.high %v2719_v20, %v2719_v20  ;;  %v2728_v33 = vrot.slane %v2719_v20, %v5846_v58 }
 0x396   : > { %v2735_v55 = vrot.slane %v2721_v41, %v5846_v58  ;;  %v2736_v22 = vcombine.high %v2728_v33, %v2728_v33  ;;  %v2744_v42 = vrot.slane %v2728_v33, %v5846_v58 }
 0x398   : > { %v2758_v39 = vrot.slane %v2736_v22, %v5846_v58  ;;  %v2766_v35 = vcombine.high %v2744_v42, %v2744_v42  ;;  %v2773_v36 = vrot.slane %v2744_v42, %v5953_v44  ;;  %v2737_v48 = vcombine.high %v2735_v55, %v2735_v55  ;;  %v3084_v22 = vld [vmem:[%s5602_s4 + $0x83] sm:$0x1] }
 0x399   : > { %v2751_v27 = vrot.slane %v2735_v55, %v5846_v58  ;;  %v3102_v46 = vrot.slane %v3084_v22, 4 }
 0x39a   : > { %v2777_v7 = vrot.slane %v2758_v39, %v5953_v44  ;;  %v2768_v51 = vcombine.high %v2758_v39, %v2758_v39  ;;  %2802 = vrot.lane.b32.xlu0 %v2773_v36, %s5487_s6  ;;  %v2781_v23 = vrot.slane %v2766_v35, %v5953_v44  ;;  %v2765_v40 = vrot.slane %v2737_v48, %v5846_v58  ;;  %v3085_v36 = vld [vmem:[%s5602_s4 + $0xa3] sm:$0x1] }
 0x39b   : > { %v2789_v31 = vrot.slane %v2751_v27, %v5953_v44  ;;  %v2767_v26 = vcombine.high %v2751_v27, %v2751_v27  ;;  %v3099_v39 = vsel %vm826_vm3, %v3098_v18, %v3097_v38  ;;  %v3104_v27 = vrot.slane %v3085_v36, 3 }
 0x39c   : > { %2804 = vrot.lane.b32.xlu1 %v2777_v7, %s5487_s6  ;;  %v2785_v57 = vrot.slane %v2768_v51, %v5953_v44  ;;  %v2793_v45 = vrot.slane %v2765_v40, %v5953_v44  ;;  %v2769_v15 = vcombine.high %v2765_v40, %v2765_v40 }
 0x39d   : > { %v2797_v61 = vrot.slane %v2767_v26, %v5953_v44 }
 0x39e   : > { %2806 = vrot.lane.b32.xlu0 %v2781_v23, %s5487_s6  ;;  %v2801_v60 = vrot.slane %v2769_v15, %v5953_v44 }
 0x3a0   : > { %2808 = vrot.lane.b32.xlu1 %v2785_v57, %s5487_s6 }
 0x3a2   : > { %2810 = vrot.lane.b32.xlu0 %v2789_v31, %s5487_s6 }
 0x3a4   : > { %2812 = vrot.lane.b32.xlu1 %v2793_v45, %s5487_s6 }
 0x3a6   : > { %2814 = vrot.lane.b32.xlu0 %v2797_v61, %s5487_s6 }
 0x3a8   : > { %2816 = vrot.lane.b32.xlu1 %v2801_v60, %s5487_s6 }
 0x3aa   : > { %2864 = vrot.lane.b32.xlu0 %v2863_v1, %s5485_s30 }
 0x40c   : > { %v2803_v0 = vpop.permute.xlu0 %2802 }
 0x40d   : > { %2826 = vst.msk [vmem:[%s5859_s7 + $0x1c] sm:$0x1] %vm903_vm9, %v2803_v0 }
 0x40e   : > { %v2805_v3 = vpop.permute.xlu1 %2804 }
 0x40f   : > { %2827 = vst.msk [vmem:[%s5859_s7 + $0x3c] sm:$0x1] %vm903_vm9, %v2805_v3 }
 0x410   : > { %v2807_v4 = vpop.permute.xlu0 %2806 }
 0x411   : > { %2828 = vst.msk [vmem:[%s5859_s7 + $0x5c] sm:$0x1] %vm903_vm9, %v2807_v4 }
 0x412   : > { %v2809_v10 = vpop.permute.xlu1 %2808 }
 0x413   : > { %2829 = vst.msk [vmem:[%s5859_s7 + $0x7c] sm:$0x1] %vm903_vm9, %v2809_v10  ;;  %v3229_v10 = vld [vmem:[%s5602_s4 + $0x25] sm:$0x1] }
 0x414   : > { %v2811_v25 = vpop.permute.xlu0 %2810 }
 0x415   : > { %2830 = vst.msk [vmem:[%s5859_s7 + $0x9c] sm:$0x1] %vm903_vm9, %v2811_v25 }
 0x416   : > { %v2813_v29 = vpop.permute.xlu1 %2812 }
 0x417   : > { %2831 = vst.msk [vmem:[%s5859_s7 + $0xbc] sm:$0x1] %vm903_vm9, %v2813_v29 }
 0x418   : > { %v2815_v12 = vpop.permute.xlu0 %2814 }
 0x419   : > { %2832 = vst.msk [vmem:[%s5859_s7 + $0xdc] sm:$0x1] %vm903_vm9, %v2815_v12  ;;  %v3230_v12 = vld [vmem:[%s5602_s4 + $0x45] sm:$0x1] }
 0x41a   : > { %v2817_v13 = vpop.permute.xlu1 %2816  ;;  %v3246_v16 = vrot.slane %v3230_v12, 6  ;;  %v3379_v12 = vld [vmem:[%s5602_s4 + $0x67] sm:$0x1] }
 0x41b   : > { %2833 = vst.msk [vmem:[%s5859_s7 + $0xfc] sm:$0x1] %vm903_vm9, %v2817_v13  ;;  %v3244_v13 = vrot.slane %v3229_v10, 7  ;;  %v3376_v10 = vld [vmem:[%s5602_s4 + $0x7] sm:$0x1] }
 0x41c   : > { %v2865_v14 = vpop.permute.xlu0 %2864 }
 0x41d   : > { %v2867_v5 = vadd.f32 %v2865_v14, %v6291_v8  ;;  %v3100_v8 = vrot.slane %v3083_v28, 5  ;;  %v3245_v28 = vsel %vm823_vm2, %v3244_v13, %v3228_v54 }
 0x41f   : > { %v2869_v20 = vcombine.high %v2867_v5, %v2867_v5  ;;  %v2876_v21 = vrot.slane %v2867_v5, %v5846_v58  ;;  %v3101_v48 = vsel %vm829_vm4, %v3100_v8, %v3099_v39 }
 0x420   : > { %v3103_v23 = vsel %vm832_vm5, %v3102_v46, %v3101_v48  ;;  %v3234_v48 = vld [vmem:[%s5602_s4 + $0xc5] sm:$0x1] }
 0x421   : > { %v2883_v41 = vrot.slane %v2869_v20, %v5846_v58  ;;  %v2884_v33 = vcombine.high %v2876_v21, %v2876_v21  ;;  %v2892_v9 = vrot.slane %v2876_v21, %v5846_v58  ;;  %v3105_v26 = vsel %vm835_vm6, %v3104_v27, %v3103_v23 }
 0x422   : > { %v3107_v45 = vsel %vm838_vm7, %v3106_v59, %v3105_v26  ;;  %v3254_v27 = vrot.slane %v3234_v48, 2  ;;  %v3383_v48 = vld [vmem:[%s5602_s4 + $0xe7] sm:$0x1] }
 0x423   : > { %v2906_v55 = vrot.slane %v2884_v33, %v5846_v58  ;;  %v2914_v42 = vcombine.high %v2892_v9, %v2892_v9  ;;  %v2921_v24 = vrot.slane %v2892_v9, %v5953_v44  ;;  %v2885_v32 = vcombine.high %v2883_v41, %v2883_v41 }
 0x424   : > { %v2899_v7 = vrot.slane %v2883_v41, %v5846_v58  ;;  %v3109_v62 = vsel %vm841_vm8, %v3108_v43, %v3107_v45  ;;  %v3232_v41 = vld [vmem:[%s5602_s4 + $0x85] sm:$0x1]  ;;  %v3248_v33 = vrot.slane %v3231_v6, 5  ;;  %v3404_v49 = vrot.slane %v3383_v48, 1 }
 0x425   : > { %v2925_v30 = vrot.slane %v2906_v55, %v5953_v44  ;;  %v2916_v35 = vcombine.high %v2906_v55, %v2906_v55  ;;  %2950 = vrot.lane.b32.xlu1 %v2921_v24, %s5486_s5  ;;  %v2929_v51 = vrot.slane %v2914_v42, %v5953_v44  ;;  %v2913_v37 = vrot.slane %v2885_v32, %v5846_v58  ;;  %v3233_v24 = vld [vmem:[%s5602_s4 + $0xa5] sm:$0x1] }
 0x426   : > { %v2937_v57 = vrot.slane %v2899_v7, %v5953_v44  ;;  %v2915_v40 = vcombine.high %v2899_v7, %v2899_v7  ;;  %v3247_v55 = vsel %vm826_vm3, %v3246_v16, %v3245_v28  ;;  %v3250_v39 = vrot.slane %v3232_v41, 4 }
 0x427   : > { %2952 = vrot.lane.b32.xlu0 %v2925_v30, %s5486_s5  ;;  %v2933_v2 = vrot.slane %v2916_v35, %v5953_v44  ;;  %v2941_v52 = vrot.slane %v2913_v37, %v5953_v44  ;;  %v2917_v31 = vcombine.high %v2913_v37, %v2913_v37  ;;  %v3249_v32 = vsel %vm829_vm4, %v3248_v33, %v3247_v55 }
 0x428   : > { %v2945_v56 = vrot.slane %v2915_v40, %v5953_v44  ;;  %v3252_v7 = vrot.slane %v3233_v24, 3 }
 0x429   : > { %2954 = vrot.lane.b32.xlu1 %v2929_v51, %s5486_s5  ;;  %v2949_v15 = vrot.slane %v2917_v31, %v5953_v44  ;;  %v3251_v51 = vsel %vm832_vm5, %v3250_v39, %v3249_v32  ;;  %v3382_v32 = vld [vmem:[%s5602_s4 + $0xc7] sm:$0x1] }
 0x42a   : > { %v3253_v40 = vsel %vm835_vm6, %v3252_v7, %v3251_v51  ;;  %v3402_v7 = vrot.slane %v3382_v32, 2 }
 0x42b   : > { %2956 = vrot.lane.b32.xlu0 %v2933_v2, %s5486_s5 }
 0x42d   : > { %2958 = vrot.lane.b32.xlu1 %v2937_v57, %s5486_s5 }
 0x42f   : > { %2960 = vrot.lane.b32.xlu0 %v2941_v52, %s5486_s5  ;;  %v3255_v52 = vsel %vm838_vm7, %v3254_v27, %v3253_v40 }
 0x430   : > { %v3257_v26 = vsel %vm841_vm8, %v3256_v50, %v3255_v52 }
 0x431   : > { %2962 = vrot.lane.b32.xlu1 %v2945_v56, %s5486_s5 }
 0x433   : > { %2964 = vrot.lane.b32.xlu0 %v2949_v15, %s5486_s5 }
 0x435   : > { %3110 = vrot.lane.b32.xlu1 %v3109_v62, %s5486_s5 }
 0x497   : > { %v2951_v17 = vpop.permute.xlu1 %2950 }
 0x498   : > { %2974 = vst.msk [vmem:[%s5859_s7 + $0x1e] sm:$0x1] %vm903_vm9, %v2951_v17 }
 0x499   : > { %v2953_v61 = vpop.permute.xlu0 %2952 }
 0x49a   : > { %2975 = vst.msk [vmem:[%s5859_s7 + $0x3e] sm:$0x1] %vm903_vm9, %v2953_v61 }
 0x49b   : > { %v2955_v47 = vpop.permute.xlu1 %2954 }
 0x49c   : > { %2976 = vst.msk [vmem:[%s5859_s7 + $0x5e] sm:$0x1] %vm903_vm9, %v2955_v47 }
 0x49d   : > { %v2957_v60 = vpop.permute.xlu0 %2956 }
 0x49e   : > { %2977 = vst.msk [vmem:[%s5859_s7 + $0x7e] sm:$0x1] %vm903_vm9, %v2957_v60  ;;  %v3377_v60 = vld [vmem:[%s5602_s4 + $0x27] sm:$0x1] }
 0x49f   : > { %v2959_v1 = vpop.permute.xlu1 %2958 }
 0x4a0   : > { %2978 = vst.msk [vmem:[%s5859_s7 + $0x9e] sm:$0x1] %vm903_vm9, %v2959_v1 }
 0x4a1   : > { %v2961_v0 = vpop.permute.xlu0 %2960 }
 0x4a2   : > { %2979 = vst.msk [vmem:[%s5859_s7 + $0xbe] sm:$0x1] %vm903_vm9, %v2961_v0 }
 0x4a3   : > { %v2963_v3 = vpop.permute.xlu1 %2962 }
 0x4a4   : > { %2980 = vst.msk [vmem:[%s5859_s7 + $0xde] sm:$0x1] %vm903_vm9, %v2963_v3  ;;  %v3378_v3 = vld [vmem:[%s5602_s4 + $0x47] sm:$0x1] }
 0x4a5   : > { %v2965_v4 = vpop.permute.xlu0 %2964  ;;  %v3394_v13 = vrot.slane %v3378_v3, 6  ;;  %v3625_v3 = vld [vmem:[%s5602_s4 + $0x6b] sm:$0x1] }
 0x4a6   : > { %2981 = vst.msk [vmem:[%s5859_s7 + $0xfe] sm:$0x1] %vm903_vm9, %v2965_v4  ;;  %v3392_v4 = vrot.slane %v3377_v60, 7  ;;  %v3622_v60 = vld [vmem:[%s5602_s4 + $0xb] sm:$0x1] }
 0x4a7   : > { %v3111_v25 = vpop.permute.xlu1 %3110 }
 0x4a8   : > { %v3113_v29 = vadd.f32 %v3111_v25, %v5863_v11  ;;  %v3393_v6 = vsel %vm823_vm2, %v3392_v4, %v3376_v10 }
 0x4aa   : > { %v3115_v14 = vcombine.high %v3113_v29, %v3113_v29  ;;  %v3122_v5 = vrot.slane %v3113_v29, %v5846_v58 }
 0x4ac   : > { %v3129_v19 = vrot.slane %v3115_v14, %v5846_v58  ;;  %v3130_v20 = vcombine.high %v3122_v5, %v3122_v5  ;;  %v3138_v21 = vrot.slane %v3122_v5, %v5846_v58 }
 0x4ae   : > { %v3152_v18 = vrot.slane %v3130_v20, %v5846_v58  ;;  %v3160_v9 = vcombine.high %v3138_v21, %v3138_v21  ;;  %v3167_v38 = vrot.slane %v3138_v21, %v5953_v44  ;;  %v3131_v22 = vcombine.high %v3129_v19, %v3129_v19 }
 0x4af   : > { %v3145_v30 = vrot.slane %v3129_v19, %v5846_v58  ;;  %v3380_v19 = vld [vmem:[%s5602_s4 + $0x87] sm:$0x1]  ;;  %v3396_v20 = vrot.slane %v3379_v12, 5 }
 0x4b0   : > { %v3171_v8 = vrot.slane %v3152_v18, %v5953_v44  ;;  %v3162_v42 = vcombine.high %v3152_v18, %v3152_v18  ;;  %3196 = vrot.lane.b32.xlu0 %v3167_v38, %s5485_s30  ;;  %v3175_v35 = vrot.slane %v3160_v9, %v5953_v44  ;;  %v3159_v46 = vrot.slane %v3131_v22, %v5846_v58  ;;  %v3381_v38 = vld [vmem:[%s5602_s4 + $0xa7] sm:$0x1] }
 0x4b1   : > { %v3183_v2 = vrot.slane %v3145_v30, %v5953_v44  ;;  %v3161_v37 = vcombine.high %v3145_v30, %v3145_v30  ;;  %v3395_v18 = vsel %vm826_vm3, %v3394_v13, %v3393_v6  ;;  %v3398_v55 = vrot.slane %v3380_v19, 4 }
 0x4b2   : > { %3198 = vrot.lane.b32.xlu1 %v3171_v8, %s5485_s30  ;;  %v3179_v36 = vrot.slane %v3162_v42, %v5953_v44  ;;  %v3187_v23 = vrot.slane %v3159_v46, %v5953_v44  ;;  %v3163_v57 = vcombine.high %v3159_v46, %v3159_v46  ;;  %v3397_v22 = vsel %vm829_vm4, %v3396_v20, %v3395_v18 }
 0x4b3   : > { %v3191_v59 = vrot.slane %v3161_v37, %v5953_v44  ;;  %v3400_v30 = vrot.slane %v3381_v38, 3 }
 0x4b4   : > { %3200 = vrot.lane.b32.xlu0 %v3175_v35, %s5485_s30  ;;  %v3195_v31 = vrot.slane %v3163_v57, %v5953_v44  ;;  %v3399_v35 = vsel %vm832_vm5, %v3398_v55, %v3397_v22  ;;  %v3628_v55 = vld [vmem:[%s5602_s4 + $0xcb] sm:$0x1] }
 0x4b5   : > { %v3401_v37 = vsel %vm835_vm6, %v3400_v30, %v3399_v35  ;;  %v3648_v32 = vrot.slane %v3628_v55, 2 }
 0x4b6   : > { %3202 = vrot.lane.b32.xlu1 %v3179_v36, %s5485_s30 }
 0x4b8   : > { %3204 = vrot.lane.b32.xlu0 %v3183_v2, %s5485_s30 }
 0x4ba   : > { %3206 = vrot.lane.b32.xlu1 %v3187_v23, %s5485_s30  ;;  %v3403_v23 = vsel %vm838_vm7, %v3402_v7, %v3401_v37 }
 0x4bb   : > { %v3405_v40 = vsel %vm841_vm8, %v3404_v49, %v3403_v23 }
 0x4bc   : > { %3208 = vrot.lane.b32.xlu0 %v3191_v59, %s5485_s30 }
 0x4be   : > { %3210 = vrot.lane.b32.xlu1 %v3195_v31, %s5485_s30 }
 0x4c0   : > { %3258 = vrot.lane.b32.xlu0 %v3257_v26, %s5487_s6 }
 0x522   : > { %v3197_v43 = vpop.permute.xlu0 %3196 }
 0x523   : > { %3220 = vst.msk [vmem:[%s5859_s7 + $0x3] sm:$0x1] %vm903_vm9, %v3197_v43 }
 0x524   : > { %v3199_v56 = vpop.permute.xlu1 %3198 }
 0x525   : > { %3221 = vst.msk [vmem:[%s5859_s7 + $0x23] sm:$0x1] %vm903_vm9, %v3199_v56 }
 0x526   : > { %v3201_v45 = vpop.permute.xlu0 %3200 }
 0x527   : > { %3222 = vst.msk [vmem:[%s5859_s7 + $0x43] sm:$0x1] %vm903_vm9, %v3201_v45 }
 0x528   : > { %v3203_v15 = vpop.permute.xlu1 %3202 }
 0x529   : > { %3223 = vst.msk [vmem:[%s5859_s7 + $0x63] sm:$0x1] %vm903_vm9, %v3203_v15  ;;  %v3623_v15 = vld [vmem:[%s5602_s4 + $0x2b] sm:$0x1] }
 0x52a   : > { %v3205_v62 = vpop.permute.xlu0 %3204 }
 0x52b   : > { %3224 = vst.msk [vmem:[%s5859_s7 + $0x83] sm:$0x1] %vm903_vm9, %v3205_v62 }
 0x52c   : > { %v3207_v17 = vpop.permute.xlu1 %3206 }
 0x52d   : > { %3225 = vst.msk [vmem:[%s5859_s7 + $0xa3] sm:$0x1] %vm903_vm9, %v3207_v17 }
 0x52e   : > { %v3209_v61 = vpop.permute.xlu0 %3208 }
 0x52f   : > { %3226 = vst.msk [vmem:[%s5859_s7 + $0xc3] sm:$0x1] %vm903_vm9, %v3209_v61  ;;  %v3624_v61 = vld [vmem:[%s5602_s4 + $0x4b] sm:$0x1] }
 0x530   : > { %v3211_v47 = vpop.permute.xlu1 %3210  ;;  %v3640_v4 = vrot.slane %v3624_v61, 6 }
 0x531   : > { %3227 = vst.msk [vmem:[%s5859_s7 + $0xe3] sm:$0x1] %vm903_vm9, %v3211_v47  ;;  %v3638_v47 = vrot.slane %v3623_v15, 7 }
 0x532   : > { %v3259_v1 = vpop.permute.xlu0 %3258 }
 0x533   : > { %v3261_v0 = vadd.f32 %v3259_v1, %v5863_v11  ;;  %v3639_v12 = vsel %vm823_vm2, %v3638_v47, %v3622_v60 }
 0x534   : > { %v3641_v6 = vsel %vm826_vm3, %v3640_v4, %v3639_v12  ;;  %v3774_v4 = vld [vmem:[%s5602_s4 + $0x8d] sm:$0x1] }
 0x535   : > { %v3263_v25 = vcombine.high %v3261_v0, %v3261_v0  ;;  %v3270_v29 = vrot.slane %v3261_v0, %v5846_v58 }
 0x537   : > { %v3277_v54 = vrot.slane %v3263_v25, %v5846_v58  ;;  %v3278_v14 = vcombine.high %v3270_v29, %v3270_v29  ;;  %v3286_v5 = vrot.slane %v3270_v29, %v5846_v58 }
 0x539   : > { %v3300_v16 = vrot.slane %v3278_v14, %v5846_v58  ;;  %v3308_v21 = vcombine.high %v3286_v5, %v3286_v5  ;;  %v3315_v28 = vrot.slane %v3286_v5, %v5953_v44  ;;  %v3279_v41 = vcombine.high %v3277_v54, %v3277_v54 }
 0x53a   : > { %v3293_v8 = vrot.slane %v3277_v54, %v5846_v58  ;;  %v3626_v54 = vld [vmem:[%s5602_s4 + $0x8b] sm:$0x1] }
 0x53b   : > { %v3319_v33 = vrot.slane %v3300_v16, %v5953_v44  ;;  %v3310_v9 = vcombine.high %v3300_v16, %v3300_v16  ;;  %3344 = vrot.lane.b32.xlu1 %v3315_v28, %s5487_s6  ;;  %v3323_v42 = vrot.slane %v3308_v21, %v5953_v44  ;;  %v3307_v39 = vrot.slane %v3279_v41, %v5846_v58  ;;  %v3627_v21 = vld [vmem:[%s5602_s4 + $0xab] sm:$0x1] }
 0x53c   : > { %v3331_v36 = vrot.slane %v3293_v8, %v5953_v44  ;;  %v3309_v46 = vcombine.high %v3293_v8, %v3293_v8  ;;  %v3644_v28 = vrot.slane %v3626_v54, 4  ;;  %v3646_v22 = vrot.slane %v3627_v21, 3 }
 0x53d   : > { %3346 = vrot.lane.b32.xlu0 %v3319_v33, %s5487_s6  ;;  %v3327_v24 = vrot.slane %v3310_v9, %v5953_v44  ;;  %v3335_v51 = vrot.slane %v3307_v39, %v5953_v44  ;;  %v3311_v2 = vcombine.high %v3307_v39, %v3307_v39  ;;  %v3629_v39 = vld [vmem:[%s5602_s4 + $0xeb] sm:$0x1] }
 0x53e   : > { %v3339_v27 = vrot.slane %v3309_v46, %v5953_v44  ;;  %v3650_v46 = vrot.slane %v3629_v39, 1 }
 0x53f   : > { %3348 = vrot.lane.b32.xlu1 %v3323_v42, %s5487_s6  ;;  %v3343_v57 = vrot.slane %v3311_v2, %v5953_v44 }
 0x541   : > { %3350 = vrot.lane.b32.xlu0 %v3327_v24, %s5487_s6 }
 0x543   : > { %3352 = vrot.lane.b32.xlu1 %v3331_v36, %s5487_s6 }
 0x545   : > { %3354 = vrot.lane.b32.xlu0 %v3335_v51, %s5487_s6 }
 0x547   : > { %3356 = vrot.lane.b32.xlu1 %v3339_v27, %s5487_s6 }
 0x549   : > { %3358 = vrot.lane.b32.xlu0 %v3343_v57, %s5487_s6 }
 0x54b   : > { %3406 = vrot.lane.b32.xlu1 %v3405_v40, %s5485_s30 }
 0x5ad   : > { %v3345_v50 = vpop.permute.xlu1 %3344 }
 0x5ae   : > { %3368 = vst.msk [vmem:[%s5859_s7 + $0x5] sm:$0x1] %vm903_vm9, %v3345_v50 }
 0x5af   : > { %v3347_v59 = vpop.permute.xlu0 %3346 }
 0x5b0   : > { %3369 = vst.msk [vmem:[%s5859_s7 + $0x25] sm:$0x1] %vm903_vm9, %v3347_v59 }
 0x5b1   : > { %v3349_v52 = vpop.permute.xlu1 %3348 }
 0x5b2   : > { %3370 = vst.msk [vmem:[%s5859_s7 + $0x45] sm:$0x1] %vm903_vm9, %v3349_v52  ;;  %v3771_v52 = vld [vmem:[%s5602_s4 + $0x2d] sm:$0x1] }
 0x5b3   : > { %v3351_v31 = vpop.permute.xlu0 %3350 }
 0x5b4   : > { %3371 = vst.msk [vmem:[%s5859_s7 + $0x65] sm:$0x1] %vm903_vm9, %v3351_v31 }
 0x5b5   : > { %v3353_v26 = vpop.permute.xlu1 %3352 }
 0x5b6   : > { %3372 = vst.msk [vmem:[%s5859_s7 + $0x85] sm:$0x1] %vm903_vm9, %v3353_v26 }
 0x5b7   : > { %v3355_v43 = vpop.permute.xlu0 %3354 }
 0x5b8   : > { %3373 = vst.msk [vmem:[%s5859_s7 + $0xa5] sm:$0x1] %vm903_vm9, %v3355_v43  ;;  %v3772_v43 = vld [vmem:[%s5602_s4 + $0x4d] sm:$0x1] }
 0x5b9   : > { %v3357_v56 = vpop.permute.xlu1 %3356  ;;  %v3788_v61 = vrot.slane %v3772_v43, 6  ;;  %v4164_v43 = vld [vmem:[%s5602_s4 + $0x13] sm:$0x1] }
 0x5ba   : > { %3374 = vst.msk [vmem:[%s5859_s7 + $0xc5] sm:$0x1] %vm903_vm9, %v3357_v56  ;;  %v3786_v56 = vrot.slane %v3771_v52, 7 }
 0x5bb   : > { %v3359_v45 = vpop.permute.xlu0 %3358 }
 0x5bc   : > { %3375 = vst.msk [vmem:[%s5859_s7 + $0xe5] sm:$0x1] %vm903_vm9, %v3359_v45  ;;  %v3770_v45 = vld [vmem:[%s5602_s4 + $0xd] sm:$0x1] }
 0x5bd   : > { %v3407_v62 = vpop.permute.xlu1 %3406 }
 0x5be   : > { %v3409_v17 = vadd.f32 %v3407_v62, %v5863_v11  ;;  %v3642_v11 = vrot.slane %v3625_v3, 5 }
 0x5c0   : > { %v3411_v1 = vcombine.high %v3409_v17, %v3409_v17  ;;  %v3418_v0 = vrot.slane %v3409_v17, %v5846_v58  ;;  %v3643_v18 = vsel %vm829_vm4, %v3642_v11, %v3641_v6  ;;  %v3773_v17 = vld [vmem:[%s5602_s4 + $0x6d] sm:$0x1] }
 0x5c1   : > { %v3645_v8 = vsel %vm832_vm5, %v3644_v28, %v3643_v18  ;;  %v3776_v28 = vld [vmem:[%s5602_s4 + $0xcd] sm:$0x1] }
 0x5c2   : > { %v3425_v10 = vrot.slane %v3411_v1, %v5846_v58  ;;  %v3426_v25 = vcombine.high %v3418_v0, %v3418_v0  ;;  %v3434_v29 = vrot.slane %v3418_v0, %v5846_v58  ;;  %v3647_v36 = vsel %vm835_vm6, %v3646_v22, %v3645_v8 }
 0x5c3   : > { %v3649_v7 = vsel %vm838_vm7, %v3648_v32, %v3647_v36  ;;  %v3787_v0 = vsel %vm823_vm2, %v3786_v56, %v3770_v45  ;;  %v3796_v55 = vrot.slane %v3776_v28, 2  ;;  %v3919_v36 = vld [vmem:[%s5602_s4 + $0x2f] sm:$0x1] }
 0x5c4   : > { %v3448_v13 = vrot.slane %v3426_v25, %v5846_v58  ;;  %v3456_v14 = vcombine.high %v3434_v29, %v3434_v29  ;;  %v3463_v5 = vrot.slane %v3434_v29, %v5953_v44  ;;  %v3427_v16 = vcombine.high %v3425_v10, %v3425_v10 }
 0x5c5   : > { %v3441_v41 = vrot.slane %v3425_v10, %v5846_v58  ;;  %v3651_v2 = vsel %vm841_vm8, %v3650_v46, %v3649_v7  ;;  %v3790_v10 = vrot.slane %v3773_v17, 5  ;;  %v3789_v12 = vsel %vm826_vm3, %v3788_v61, %v3787_v0  ;;  %v3920_v7 = vld [vmem:[%s5602_s4 + $0x4f] sm:$0x1] }
 0x5c6   : > { %v3458_v19 = vcombine.high %v3448_v13, %v3448_v13  ;;  %v3467_v20 = vrot.slane %v3448_v13, %v5953_v44  ;;  %3492 = vrot.lane.b32.xlu0 %v3463_v5, %s5486_s5  ;;  %v3471_v33 = vrot.slane %v3456_v14, %v5953_v44  ;;  %v3455_v9 = vrot.slane %v3427_v16, %v5846_v58  ;;  %v3775_v14 = vld [vmem:[%s5602_s4 + $0xad] sm:$0x1]  ;;  %v3923_v17 = vld [vmem:[%s5602_s4 + $0xaf] sm:$0x1] }
 0x5c7   : > { %v3457_v42 = vcombine.high %v3441_v41, %v3441_v41  ;;  %v3479_v24 = vrot.slane %v3441_v41, %v5953_v44  ;;  %v3792_v5 = vrot.slane %v3774_v4, 4  ;;  %v3791_v6 = vsel %vm829_vm4, %v3790_v10, %v3789_v12  ;;  %v7088_v0 = vld [vmem:[%s5602_s4 + $0xef] sm:$0x1]  ;;  %v4313_v4 = vld [vmem:[%s5602_s4 + $0x35] sm:$0x1] }
 0x5c8   : > { %3494 = vrot.lane.b32.xlu1 %v3467_v20, %s5486_s5  ;;  %v3475_v38 = vrot.slane %v3458_v19, %v5953_v44  ;;  %v3483_v30 = vrot.slane %v3455_v9, %v5953_v44  ;;  %v3459_v35 = vcombine.high %v3455_v9, %v3455_v9  ;;  %v3794_v18 = vrot.slane %v3775_v14, 3  ;;  %v4461_v12 = vld [vmem:[%s5602_s4 + $0x37] sm:$0x1] }
 0x5c9   : > { %v3487_v48 = vrot.slane %v3457_v42, %v5953_v44  ;;  %v3793_v41 = vsel %vm832_vm5, %v3792_v5, %v3791_v6 }
 0x5ca   : > { %3496 = vrot.lane.b32.xlu0 %v3471_v33, %s5486_s5  ;;  %v3491_v51 = vrot.slane %v3459_v35, %v5953_v44  ;;  %v3795_v42 = vsel %vm835_vm6, %v3794_v18, %v3793_v41  ;;  %v4312_v18 = vld [vmem:[%s5602_s4 + $0x15] sm:$0x1]  ;;  %v4462_v41 = vld [vmem:[%s5602_s4 + $0x57] sm:$0x1] }
 0x5cb   : > { %v3797_v32 = vsel %vm838_vm7, %v3796_v55, %v3795_v42  ;;  %v4707_v42 = vld [vmem:[%s5602_s4 + $0x3b] sm:$0x1] }
 0x5cc   : > { %3498 = vrot.lane.b32.xlu1 %v3475_v38, %s5486_s5  ;;  %v3777_v38 = vld [vmem:[%s5602_s4 + $0xed] sm:$0x1] }
 0x5ce   : > { %3500 = vrot.lane.b32.xlu0 %v3479_v24, %s5486_s5  ;;  %v3798_v24 = vrot.slane %v3777_v38, 1  ;;  %v3946_v38 = vrot.slane %v7088_v0, 1 }
 0x5d0   : > { %3502 = vrot.lane.b32.xlu1 %v3483_v30, %s5486_s5  ;;  %v3799_v35 = vsel %vm841_vm8, %v3798_v24, %v3797_v32  ;;  %v4315_v32 = vld [vmem:[%s5602_s4 + $0x75] sm:$0x1] }
 0x5d2   : > { %3504 = vrot.lane.b32.xlu0 %v3487_v48, %s5486_s5 }
 0x5d4   : > { %3506 = vrot.lane.b32.xlu1 %v3491_v51, %s5486_s5  ;;  %v3934_v51 = vrot.slane %v3919_v36, 7 }
 0x5d6   : > { %3652 = vrot.lane.b32.xlu0 %v3651_v2, %s5486_s5  ;;  %v3918_v2 = vld [vmem:[%s5602_s4 + $0xf] sm:$0x1] }
 0x638   : > { %v3493_v37 = vpop.permute.xlu0 %3492 }
 0x639   : > { %3516 = vst.msk [vmem:[%s5859_s7 + $0x7] sm:$0x1] %vm903_vm9, %v3493_v37 }
 0x63a   : > { %v3495_v49 = vpop.permute.xlu1 %3494 }
 0x63b   : > { %3517 = vst.msk [vmem:[%s5859_s7 + $0x27] sm:$0x1] %vm903_vm9, %v3495_v49  ;;  %v4165_v49 = vld [vmem:[%s5602_s4 + $0x33] sm:$0x1] }
 0x63c   : > { %v3497_v27 = vpop.permute.xlu0 %3496 }
 0x63d   : > { %3518 = vst.msk [vmem:[%s5859_s7 + $0x47] sm:$0x1] %vm903_vm9, %v3497_v27 }
 0x63e   : > { %v3499_v23 = vpop.permute.xlu1 %3498 }
 0x63f   : > { %3519 = vst.msk [vmem:[%s5859_s7 + $0x67] sm:$0x1] %vm903_vm9, %v3499_v23  ;;  %v3921_v23 = vld [vmem:[%s5602_s4 + $0x6f] sm:$0x1] }
 0x640   : > { %v3501_v57 = vpop.permute.xlu0 %3500 }
 0x641   : > { %3520 = vst.msk [vmem:[%s5859_s7 + $0x87] sm:$0x1] %vm903_vm9, %v3501_v57  ;;  %v3936_v57 = vrot.slane %v3920_v7, 6 }
 0x642   : > { %v3503_v40 = vpop.permute.xlu1 %3502 }
 0x643   : > { %3521 = vst.msk [vmem:[%s5859_s7 + $0xa7] sm:$0x1] %vm903_vm9, %v3503_v40  ;;  %v3935_v40 = vsel %vm823_vm2, %v3934_v51, %v3918_v2  ;;  %v4478_v51 = vrot.slane %v4462_v41, 6  ;;  %v4855_v2 = vld [vmem:[%s5602_s4 + $0x3d] sm:$0x1] }
 0x644   : > { %v3505_v50 = vpop.permute.xlu0 %3504  ;;  %v3937_v45 = vsel %vm826_vm3, %v3936_v57, %v3935_v40  ;;  %v4708_v57 = vld [vmem:[%s5602_s4 + $0x5b] sm:$0x1]  ;;  %v4722_v40 = vrot.slane %v4707_v42, 7  ;;  %v4465_v42 = vld [vmem:[%s5602_s4 + $0xb7] sm:$0x1] }
 0x645   : > { %3522 = vst.msk [vmem:[%s5859_s7 + $0xc7] sm:$0x1] %vm903_vm9, %v3505_v50  ;;  %v4166_v50 = vld [vmem:[%s5602_s4 + $0x53] sm:$0x1] }
 0x646   : > { %v3507_v59 = vpop.permute.xlu1 %3506 }
 0x647   : > { %3523 = vst.msk [vmem:[%s5859_s7 + $0xe7] sm:$0x1] %vm903_vm9, %v3507_v59  ;;  %v4180_v59 = vrot.slane %v4165_v49, 7 }
 0x648   : > { %v3653_v31 = vpop.permute.xlu0 %3652 }
 0x649   : > { %v3655_v26 = vadd.f32 %v3653_v31, %v5971_v53  ;;  %v3922_v31 = vld [vmem:[%s5602_s4 + $0x8f] sm:$0x1] }
 0x64a   : > { %v3940_v61 = vrot.slane %v3922_v31, 4  ;;  %v4332_v31 = vrot.slane %v4315_v32, 5 }
 0x64b   : > { %v3657_v15 = vcombine.high %v3655_v26, %v3655_v26  ;;  %v3664_v62 = vrot.slane %v3655_v26, %v5846_v58  ;;  %v3938_v26 = vrot.slane %v3921_v23, 5 }
 0x64d   : > { %v3671_v47 = vrot.slane %v3657_v15, %v5846_v58  ;;  %v3672_v60 = vcombine.high %v3664_v62, %v3664_v62  ;;  %v3680_v1 = vrot.slane %v3664_v62, %v5846_v58  ;;  %v4167_v15 = vld [vmem:[%s5602_s4 + $0x73] sm:$0x1]  ;;  %v4182_v62 = vrot.slane %v4166_v50, 6 }
 0x64f   : > { %v3694_v3 = vrot.slane %v3672_v60, %v5846_v58  ;;  %v3702_v25 = vcombine.high %v3680_v1, %v3680_v1  ;;  %v3709_v29 = vrot.slane %v3680_v1, %v5953_v44  ;;  %v3673_v13 = vcombine.high %v3671_v47, %v3671_v47  ;;  %v7085_v1 = vld [vmem:[%s5602_s4 + $0xcf] sm:$0x1] }
 0x650   : > { %v3687_v16 = vrot.slane %v3671_v47, %v5846_v58  ;;  %v4181_v47 = vsel %vm823_vm2, %v4180_v59, %v4164_v43  ;;  %v3944_v6 = vrot.slane %v7085_v1, 2  ;;  %v4856_v43 = vld [vmem:[%s5602_s4 + $0x5d] sm:$0x1]  ;;  %v5006_v1 = vld [vmem:[%s5602_s4 + $0x9f] sm:$0x1] }
 0x651   : > { %v3704_v54 = vcombine.high %v3694_v3, %v3694_v3  ;;  %v3713_v11 = vrot.slane %v3694_v3, %v5953_v44  ;;  %3738 = vrot.lane.b32.xlu1 %v3709_v29, %s5485_s30  ;;  %v3717_v19 = vrot.slane %v3702_v25, %v5953_v44  ;;  %v3701_v20 = vrot.slane %v3673_v13, %v5846_v58  ;;  %v4168_v25 = vld [vmem:[%s5602_s4 + $0x93] sm:$0x1] }
 0x652   : > { %v3703_v33 = vcombine.high %v3687_v16, %v3687_v16  ;;  %v3725_v9 = vrot.slane %v3687_v16, %v5953_v44  ;;  %v3939_v3 = vsel %vm829_vm4, %v3938_v26, %v3937_v45  ;;  %v4184_v29 = vrot.slane %v4167_v15, 5  ;;  %v7108_v16 = vld [vmem:[%s5602_s4 + $0xf3] sm:$0x1]  ;;  %v4706_v26 = vld [vmem:[%s5602_s4 + $0x1b] sm:$0x1] }
 0x653   : > { %3740 = vrot.lane.b32.xlu0 %v3713_v11, %s5485_s30  ;;  %v3721_v21 = vrot.slane %v3704_v54, %v5953_v44  ;;  %v3729_v22 = vrot.slane %v3701_v20, %v5953_v44  ;;  %v3705_v8 = vcombine.high %v3701_v20, %v3701_v20  ;;  %v3942_v13 = vrot.slane %v3923_v17, 3  ;;  %v7099_v54 = vld [vmem:[%s5602_s4 + $0xb3] sm:$0x1]  ;;  %v5003_v17 = vld [vmem:[%s5602_s4 + $0x3f] sm:$0x1] }
 0x654   : > { %v3733_v39 = vrot.slane %v3703_v33, %v5953_v44  ;;  %v7102_v11 = vld [vmem:[%s5602_s4 + $0xd3] sm:$0x1]  ;;  %v4183_v14 = vsel %vm826_vm3, %v4182_v62, %v4181_v47  ;;  %v3941_v5 = vsel %vm832_vm5, %v3940_v61, %v3939_v3  ;;  %v4328_v20 = vrot.slane %v4313_v4, 7  ;;  %v7148_v47 = vld [vmem:[%s5602_s4 + $0xd5] sm:$0x1] }
 0x655   : > { %3742 = vrot.lane.b32.xlu1 %v3717_v19, %s5485_s30  ;;  %v3737_v30 = vrot.slane %v3705_v8, %v5953_v44  ;;  %v4314_v19 = vld [vmem:[%s5602_s4 + $0x55] sm:$0x1]  ;;  %v4186_v28 = vrot.slane %v4168_v25, 4  ;;  %v4476_v33 = vrot.slane %v4461_v12, 7  ;;  %v4185_v55 = vsel %vm829_vm4, %v4184_v29, %v4183_v14  ;;  %v4460_v8 = vld [vmem:[%s5602_s4 + $0x17] sm:$0x1] }
 0x656   : > { %v7120_v24 = vsel %vm835_vm6, %v3942_v13, %v3941_v5  ;;  %v4329_v7 = vsel %vm823_vm2, %v4328_v20, %v4312_v18  ;;  %v4192_v49 = vrot.slane %v7108_v16, 1  ;;  %v4870_v62 = vrot.slane %v4855_v2, 7  ;;  %v4464_v12 = vld [vmem:[%s5602_s4 + $0x97] sm:$0x1]  ;;  %v4709_v13 = vld [vmem:[%s5602_s4 + $0x7b] sm:$0x1] }
 0x657   : > { %3744 = vrot.lane.b32.xlu0 %v3721_v21, %s5485_s30  ;;  %v4477_v23 = vsel %vm823_vm2, %v4476_v33, %v4460_v8  ;;  %v4724_v4 = vrot.slane %v4708_v57, 6  ;;  %v4872_v14 = vrot.slane %v4856_v43, 6  ;;  %v5018_v18 = vrot.slane %v5003_v17, 7  ;;  %v5002_v8 = vld [vmem:[%s5602_s4 + $0x1f] sm:$0x1] }
 0x658   : > { %v4711_v43 = vld [vmem:[%s5602_s4 + $0xbb] sm:$0x1] }
 0x659   : > { %3746 = vrot.lane.b32.xlu1 %v3725_v9, %s5485_s30 }
 0x65b   : > { %3748 = vrot.lane.b32.xlu0 %v3729_v22, %s5485_s30  ;;  %v4188_v22 = vrot.slane %v7099_v54, 3  ;;  %v4723_v54 = vsel %vm823_vm2, %v4722_v40, %v4706_v26  ;;  %v4484_v26 = vrot.slane %v4465_v42, 3 }
 0x65d   : > { %3750 = vrot.lane.b32.xlu1 %v3733_v39, %s5485_s30  ;;  %v4190_v39 = vrot.slane %v7102_v11, 2 }
 0x65f   : > { %3752 = vrot.lane.b32.xlu0 %v3737_v30, %s5485_s30  ;;  %v7125_v30 = vld [vmem:[%s5602_s4 + $0x95] sm:$0x1] }
 0x660   : > { %v4334_v45 = vrot.slane %v7125_v30, 4  ;;  %v4482_v30 = vrot.slane %v4464_v12, 4 }
 0x661   : > { %3800 = vrot.lane.b32.xlu1 %v3799_v35, %s5487_s6  ;;  %v4330_v35 = vrot.slane %v4314_v19, 6 }
 0x6c3   : > { %v3739_v46 = vpop.permute.xlu1 %3738 }
 0x6c4   : > { %3762 = vst.msk [vmem:[%s5859_s7 + $0xb] sm:$0x1] %vm903_vm9, %v3739_v46 }
 0x6c5   : > { %v3741_v48 = vpop.permute.xlu0 %3740 }
 0x6c6   : > { %3763 = vst.msk [vmem:[%s5859_s7 + $0x2b] sm:$0x1] %vm903_vm9, %v3741_v48  ;;  %v7129_v48 = vld [vmem:[%s5602_s4 + $0xb5] sm:$0x1] }
 0x6c7   : > { %v3743_v37 = vpop.permute.xlu1 %3742  ;;  %v4336_v15 = vrot.slane %v7129_v48, 3 }
 0x6c8   : > { %3764 = vst.msk [vmem:[%s5859_s7 + $0x4b] sm:$0x1] %vm903_vm9, %v3743_v37  ;;  %v4187_v37 = vsel %vm832_vm5, %v4186_v28, %v4185_v55  ;;  %v5004_v28 = vld [vmem:[%s5602_s4 + $0x5f] sm:$0x1] }
 0x6c9   : > { %v3745_v27 = vpop.permute.xlu0 %3744  ;;  %v4189_v41 = vsel %vm835_vm6, %v4188_v22, %v4187_v37  ;;  %v5005_v37 = vld [vmem:[%s5602_s4 + $0x7f] sm:$0x1] }
 0x6ca   : > { %3765 = vst.msk [vmem:[%s5859_s7 + $0x6b] sm:$0x1] %vm903_vm9, %v3745_v27  ;;  %v4463_v27 = vld [vmem:[%s5602_s4 + $0x77] sm:$0x1] }
 0x6cb   : > { %v3747_v52 = vpop.permute.xlu1 %3746  ;;  %v4480_v3 = vrot.slane %v4463_v27, 5  ;;  %v5020_v27 = vrot.slane %v5004_v28, 6 }
 0x6cc   : > { %3766 = vst.msk [vmem:[%s5859_s7 + $0x8b] sm:$0x1] %vm903_vm9, %v3747_v52 }
 0x6cd   : > { %v3749_v56 = vpop.permute.xlu0 %3748 }
 0x6ce   : > { %3767 = vst.msk [vmem:[%s5859_s7 + $0xab] sm:$0x1] %vm903_vm9, %v3749_v56  ;;  %v4331_v56 = vsel %vm826_vm3, %v4330_v35, %v4329_v7  ;;  %v4710_v35 = vld [vmem:[%s5602_s4 + $0x9b] sm:$0x1] }
 0x6cf   : > { %v3751_v60 = vpop.permute.xlu1 %3750  ;;  %v4333_v33 = vsel %vm829_vm4, %v4332_v31, %v4331_v56  ;;  %v4466_v31 = vld [vmem:[%s5602_s4 + $0xd7] sm:$0x1]  ;;  %v4728_v56 = vrot.slane %v4710_v35, 4 }
 0x6d0   : > { %3768 = vst.msk [vmem:[%s5859_s7 + $0xcb] sm:$0x1] %vm903_vm9, %v3751_v60  ;;  %v4479_v60 = vsel %vm826_vm3, %v4478_v51, %v4477_v23  ;;  %v4858_v51 = vld [vmem:[%s5602_s4 + $0x9d] sm:$0x1]  ;;  %v4486_v12 = vrot.slane %v4466_v31, 2 }
 0x6d1   : > { %v3753_v10 = vpop.permute.xlu0 %3752  ;;  %v4481_v32 = vsel %vm829_vm4, %v4480_v3, %v4479_v60  ;;  %v5022_v60 = vrot.slane %v5005_v37, 5 }
 0x6d2   : > { %3769 = vst.msk [vmem:[%s5859_s7 + $0xeb] sm:$0x1] %vm903_vm9, %v3753_v10  ;;  %v4854_v10 = vld [vmem:[%s5602_s4 + $0x1d] sm:$0x1] }
 0x6d3   : > { %v3801_v21 = vpop.permute.xlu1 %3800  ;;  %v4871_v55 = vsel %vm823_vm2, %v4870_v62, %v4854_v10  ;;  %v4483_v62 = vsel %vm832_vm5, %v4482_v30, %v4481_v32  ;;  %v5008_v30 = vld [vmem:[%s5602_s4 + $0xdf] sm:$0x1] }
 0x6d4   : > { %v3803_v9 = vadd.f32 %v3801_v21, %v5971_v53  ;;  %v4857_v21 = vld [vmem:[%s5602_s4 + $0x7d] sm:$0x1]  ;;  %v4873_v40 = vsel %vm826_vm3, %v4872_v14, %v4871_v55  ;;  %v4485_v11 = vsel %vm835_vm6, %v4484_v26, %v4483_v62  ;;  %v4713_v55 = vld [vmem:[%s5602_s4 + $0xfb] sm:$0x1]  ;;  %v5028_v37 = vrot.slane %v5008_v30, 2 }
 0x6d5   : > { %v4874_v2 = vrot.slane %v4857_v21, 5  ;;  %v4860_v14 = vld [vmem:[%s5602_s4 + $0xdd] sm:$0x1]  ;;  %v4487_v42 = vsel %vm838_vm7, %v4486_v12, %v4485_v11 }
 0x6d6   : > { %v3805_v36 = vcombine.high %v3803_v9, %v3803_v9  ;;  %v3812_v46 = vrot.slane %v3803_v9, %v5846_v58  ;;  %v4338_v9 = vrot.slane %v7148_v47, 2  ;;  %v4876_v47 = vrot.slane %v4858_v51, 4 }
 0x6d7   : > { %v4875_v3 = vsel %vm829_vm4, %v4874_v2, %v4873_v40  ;;  %v4880_v32 = vrot.slane %v4860_v14, 2  ;;  %v5009_v2 = vld [vmem:[%s5602_s4 + $0xff] sm:$0x1] }
 0x6d8   : > { %v3819_v50 = vrot.slane %v3805_v36, %v5846_v58  ;;  %v3820_v59 = vcombine.high %v3812_v46, %v3812_v46  ;;  %v3828_v52 = vrot.slane %v3812_v46, %v5846_v58  ;;  %v4725_v36 = vsel %vm826_vm3, %v4724_v4, %v4723_v54 }
 0x6d9   : > { %v4726_v46 = vrot.slane %v4709_v13, 5  ;;  %v4712_v13 = vld [vmem:[%s5602_s4 + $0xdb] sm:$0x1]  ;;  %v4730_v54 = vrot.slane %v4711_v43, 3  ;;  %v4877_v21 = vsel %vm832_vm5, %v4876_v47, %v4875_v3 }
 0x6da   : > { %v3842_v61 = vrot.slane %v3820_v59, %v5846_v58  ;;  %v3850_v25 = vcombine.high %v3828_v52, %v3828_v52  ;;  %v3857_v29 = vrot.slane %v3828_v52, %v5953_v44  ;;  %v3821_v5 = vcombine.high %v3819_v50, %v3819_v50 }
 0x6db   : > { %v7171_v22 = vrot.slane %v3819_v50, %v5846_v58  ;;  %v5019_v59 = vsel %vm823_vm2, %v5018_v18, %v5002_v8  ;;  %v3945_v50 = vsel %vm838_vm7, %v3944_v6, %v7120_v24  ;;  %v4335_v52 = vsel %vm832_vm5, %v4334_v45, %v4333_v33  ;;  %v4319_v45 = vld [vmem:[%s5602_s4 + $0xf5] sm:$0x1] }
 0x6dc   : > { %v3852_v19 = vcombine.high %v3842_v61, %v3842_v61  ;;  %v3861_v20 = vrot.slane %v3842_v61, %v5953_v44  ;;  %3886 = vrot.lane.b32.xlu0 %v3857_v29, %s5487_s6  ;;  %v3865_v7 = vrot.slane %v3850_v25, %v5953_v44  ;;  %v7177_v23 = vrot.slane %v3821_v5, %v5846_v58  ;;  %v4859_v61 = vld [vmem:[%s5602_s4 + $0xbd] sm:$0x1]  ;;  %v4467_v29 = vld [vmem:[%s5602_s4 + $0xf7] sm:$0x1] }
 0x6dd   : > { %v4727_v17 = vsel %vm829_vm4, %v4726_v46, %v4725_v36  ;;  %v3873_v6 = vrot.slane %v7171_v22, %v5953_v44  ;;  %v4191_v24 = vsel %vm838_vm7, %v4190_v39, %v4189_v41  ;;  %v5021_v4 = vsel %vm826_vm3, %v5020_v27, %v5019_v59 }
 0x6de   : > { %3888 = vrot.lane.b32.xlu1 %v3861_v20, %s5487_s6  ;;  %v3869_v57 = vrot.slane %v3852_v19, %v5953_v44  ;;  %v3877_v10 = vrot.slane %v7177_v23, %v5953_v44  ;;  %v4337_v25 = vsel %vm835_vm6, %v4336_v15, %v4335_v52  ;;  %v4729_v39 = vsel %vm832_vm5, %v4728_v56, %v4727_v17  ;;  %v5007_v19 = vld [vmem:[%s5602_s4 + $0xbf] sm:$0x1] }
 0x6df   : > { %v4878_v5 = vrot.slane %v4859_v61, 3  ;;  %v5024_v20 = vrot.slane %v5006_v1, 4  ;;  %v3947_v48 = vsel %vm841_vm8, %v3946_v38, %v3945_v50  ;;  %v4340_v15 = vrot.slane %v4319_v45, 1  ;;  %v4861_v38 = vld [vmem:[%s5602_s4 + $0xfd] sm:$0x1]  ;;  %s5166_s4 = sshll.u32 %s5859_s7, 4  ;;  %s7563_s4 = int_to_ptr.vmem [resolvable:$true] %s5166_s4 }
 0x6e0   : > { %3890 = vrot.lane.b32.xlu0 %v3865_v7, %s5487_s6  ;;  %v5023_v28 = vsel %vm829_vm4, %v5022_v60, %v5021_v4  ;;  %v4193_v18 = vsel %vm841_vm8, %v4192_v49, %v4191_v24  ;;  %v4339_v41 = vsel %vm838_vm7, %v4338_v9, %v4337_v25  ;;  %v4488_v33 = vrot.slane %v4467_v29, 1  ;;  %s5399_s10 = scalar_lea.vmem %s7563_s4, 4096  ;;  %p5406_p3 = scmp.lt.s32.totalorder %s7563_s4, %s5404_s18 }
 0x6e1   : > { %v4732_v8 = vrot.slane %v4712_v13, 2  ;;  %v4731_v0 = vsel %vm835_vm6, %v4730_v54, %v4729_v39  ;;  %v5026_v35 = vrot.slane %v5007_v19, 3  ;;  %v4879_v16 = vsel %vm835_vm6, %v4878_v5, %v4877_v21  ;;  %p5400_p8 = scmp.ne.s32.totalorder %s7563_s4, %s5399_s10  ;;  %p5407_p5 = scmp.lt.s32.totalorder %s5405_s19, %s5399_s10 }
 0x6e2   : > { %3892 = vrot.lane.b32.xlu1 %v3869_v57, %s5487_s6  ;;  %v5025_v49 = vsel %vm832_vm5, %v5024_v20, %v5023_v28  ;;  %v4341_v9 = vsel %vm841_vm8, %v4340_v15, %v4339_v41  ;;  %v4734_v36 = vrot.slane %v4713_v55, 1  ;;  %v4489_v46 = vsel %vm841_vm8, %v4488_v33, %v4487_v42 }
 0x6e3   : > { %v4733_v7 = vsel %vm838_vm7, %v4732_v8, %v4731_v0  ;;  %v4882_v51 = vrot.slane %v4861_v38, 1  ;;  %v4881_v27 = vsel %vm838_vm7, %v4880_v32, %v4879_v16  ;;  %v5027_v57 = vsel %vm835_vm6, %v5026_v35, %v5025_v49  ;;  %p5401_p0 = pnand %p5400_p8, %p5563_p9  ;;  %p5408_p6 = por %p5407_p5, %p5406_p3 }
 0x6e4   : > { %3894 = vrot.lane.b32.xlu0 %v3873_v6, %s5487_s6  ;;  %v4735_v40 = vsel %vm841_vm8, %v4734_v36, %v4733_v7  ;;  %v5030_v59 = vrot.slane %v5009_v2, 1  ;;  %v5029_v52 = vsel %vm838_vm7, %v5028_v37, %v5027_v57  ;;  %v3851_v31 = vcombine.high %v7171_v22, %v7171_v22 }
 0x6e5   : > { %v4883_v50 = vsel %vm841_vm8, %v4882_v51, %v4881_v27  ;;  %v3853_v43 = vcombine.high %v7177_v23, %v7177_v23  ;;  %p5402_p1 = pneg %p5401_p0 }
 0x6e6   : > { %3896 = vrot.lane.b32.xlu1 %v3877_v10, %s5487_s6  ;;  %v5031_v26 = vsel %vm841_vm8, %v5030_v59, %v5029_v52  ;;  %v3881_v56 = vrot.slane %v3851_v31, %v5953_v44 }
 0x6e7   : > { %v3885_v22 = vrot.slane %v3853_v43, %v5953_v44  ;;  %p5409_p7 = pnand %p5408_p6, %p5402_p1 }
 0x6e8   : > { %3948 = vrot.lane.b32.xlu0 %v3947_v48, %s5485_s30 }
 0x6ea   : > { %4194 = vrot.lane.b32.xlu1 %v4193_v18, %s5486_s5 }
 0x6ec   : > { %4342 = vrot.lane.b32.xlu0 %v4341_v9, %s5487_s6 }
 0x6ee   : > { %4490 = vrot.lane.b32.xlu1 %v4489_v46, %s5485_s30 }
 0x6f0   : > { %4736 = vrot.lane.b32.xlu0 %v4735_v40, %s5486_s5 }
 0x6f2   : > { %4884 = vrot.lane.b32.xlu1 %v4883_v50, %s5487_s6 }
 0x6f4   : > { %5032 = vrot.lane.b32.xlu0 %v5031_v26, %s5485_s30 }
 0x6f6   : > { %3898 = vrot.lane.b32.xlu1 %v3881_v56, %s5487_s6 }
 0x6f8   : > { %3900 = vrot.lane.b32.xlu0 %v3885_v22, %s5487_s6 }
 0x74e   : > { %v3887_v62 = vpop.permute.xlu0 %3886 }
 0x74f   : > { %3910 = vst.msk [vmem:[%s5859_s7 + $0xd] sm:$0x1] %vm903_vm9, %v3887_v62 }
 0x750   : > { %v3889_v17 = vpop.permute.xlu1 %3888 }
 0x751   : > { %3911 = vst.msk [vmem:[%s5859_s7 + $0x2d] sm:$0x1] %vm903_vm9, %v3889_v17 }
 0x752   : > { %v3891_v61 = vpop.permute.xlu0 %3890 }
 0x753   : > { %3912 = vst.msk [vmem:[%s5859_s7 + $0x4d] sm:$0x1] %vm903_vm9, %v3891_v61 }
 0x754   : > { %v3893_v23 = vpop.permute.xlu1 %3892 }
 0x755   : > { %3913 = vst.msk [vmem:[%s5859_s7 + $0x6d] sm:$0x1] %vm903_vm9, %v3893_v23 }
 0x756   : > { %v3895_v47 = vpop.permute.xlu0 %3894 }
 0x757   : > { %3914 = vst.msk [vmem:[%s5859_s7 + $0x8d] sm:$0x1] %vm903_vm9, %v3895_v47 }
 0x758   : > { %v3897_v1 = vpop.permute.xlu1 %3896 }
 0x759   : > { %3915 = vst.msk [vmem:[%s5859_s7 + $0xad] sm:$0x1] %vm903_vm9, %v3897_v1 }
 0x75a   : > { %v3949_v60 = vpop.permute.xlu0 %3948 }
 0x75b   : > { %v3951_v6 = vadd.f32 %v3949_v60, %v5971_v53 }
 0x75c   : > { %v4195_v24 = vpop.permute.xlu1 %4194 }
 0x75d   : > { %v3960_v45 = vrot.slane %v3951_v6, %v5846_v58  ;;  %v3953_v54 = vcombine.high %v3951_v6, %v3951_v6  ;;  %v4197_v18 = vadd.f32 %v4195_v24, %v6206_v63 }
 0x75e   : > { %v4343_v3 = vpop.permute.xlu0 %4342 }
 0x75f   : > { %v3968_v4 = vcombine.high %v3960_v45, %v3960_v45  ;;  %v3976_v10 = vrot.slane %v3960_v45, %v5846_v58  ;;  %v3967_v5 = vrot.slane %v3953_v54, %v5846_v58  ;;  %v4206_v42 = vrot.slane %v4197_v18, %v5846_v58 }
 0x760   : > { %v7272_v25 = vpop.permute.xlu1 %4490  ;;  %v4199_v0 = vcombine.high %v4197_v18, %v4197_v18  ;;  %v4345_v2 = vadd.f32 %v4343_v3, %v6206_v63 }
 0x761   : > { %v3990_v29 = vrot.slane %v3968_v4, %v5846_v58  ;;  %v4005_v12 = vrot.slane %v3976_v10, %v5953_v44  ;;  %v3998_v11 = vcombine.high %v3976_v10, %v3976_v10  ;;  %v3969_v21 = vcombine.high %v3967_v5, %v3967_v5 }
 0x762   : > { %v7276_v13 = vpop.permute.xlu0 %4736  ;;  %v3983_v28 = vrot.slane %v3967_v5, %v5846_v58  ;;  %v4214_v32 = vcombine.high %v4206_v42, %v4206_v42  ;;  %v4222_v30 = vrot.slane %v4206_v42, %v5846_v58  ;;  %v4213_v49 = vrot.slane %v4199_v0, %v5846_v58 }
 0x763   : > { %4034 = vrot.lane.b32.xlu1 %v4005_v12, %s5486_s5  ;;  %v4009_v39 = vrot.slane %v3990_v29, %v5953_v44  ;;  %v4013_v19 = vrot.slane %v3998_v11, %v5953_v44  ;;  %v4000_v48 = vcombine.high %v3990_v29, %v3990_v29  ;;  %v3997_v33 = vrot.slane %v3969_v21, %v5846_v58 }
 0x764   : > { %v7278_v53 = vpop.permute.xlu1 %4884  ;;  %v4021_v55 = vrot.slane %v3983_v28, %v5953_v44  ;;  %v3999_v8 = vcombine.high %v3983_v28, %v3983_v28  ;;  %v4236_v9 = vrot.slane %v4214_v32, %v5846_v58  ;;  %v4244_v36 = vcombine.high %v4222_v30, %v4222_v30 }
 0x765   : > { %4036 = vrot.lane.b32.xlu0 %v4009_v39, %s5486_s5  ;;  %v4017_v41 = vrot.slane %v4000_v48, %v5953_v44  ;;  %v4025_v38 = vrot.slane %v3997_v33, %v5953_v44  ;;  %v4001_v16 = vcombine.high %v3997_v33, %v3997_v33  ;;  %v4251_v46 = vrot.slane %v4222_v30, %v5953_v44 }
 0x766   : > { %v7282_v14 = vpop.permute.xlu0 %5032  ;;  %v4029_v35 = vrot.slane %v3999_v8, %v5953_v44  ;;  %v4215_v51 = vcombine.high %v4213_v49, %v4213_v49  ;;  %v4229_v37 = vrot.slane %v4213_v49, %v5846_v58  ;;  %v4246_v27 = vcombine.high %v4236_v9, %v4236_v9 }
 0x767   : > { %4038 = vrot.lane.b32.xlu1 %v4013_v19, %s5486_s5  ;;  %v4033_v7 = vrot.slane %v4001_v16, %v5953_v44  ;;  %v4255_v57 = vrot.slane %v4236_v9, %v5953_v44  ;;  %v4259_v40 = vrot.slane %v4244_v36, %v5953_v44  ;;  %v4354_v59 = vrot.slane %v4345_v2, %v5846_v58 }
 0x768   : > { %v3899_v20 = vpop.permute.xlu1 %3898  ;;  %v4243_v50 = vrot.slane %v4215_v51, %v5846_v58  ;;  %v4245_v52 = vcombine.high %v4229_v37, %v4229_v37  ;;  %v4263_v31 = vrot.slane %v4246_v27, %v5953_v44  ;;  %v4267_v26 = vrot.slane %v4229_v37, %v5953_v44 }
 0x769   : > { %3916 = vst.msk [vmem:[%s5859_s7 + $0xcd] sm:$0x1] %vm903_vm9, %v3899_v20  ;;  %4040 = vrot.lane.b32.xlu0 %v4017_v41, %s5486_s5  ;;  %v4347_v43 = vcombine.high %v4345_v2, %v4345_v2  ;;  %v4362_v56 = vcombine.high %v4354_v59, %v4354_v59  ;;  %v4370_v22 = vrot.slane %v4354_v59, %v5846_v58 }
 0x76a   : > { %v3901_v15 = vpop.permute.xlu0 %3900  ;;  %v4271_v62 = vrot.slane %v4243_v50, %v5953_v44  ;;  %v4275_v17 = vrot.slane %v4245_v52, %v5953_v44  ;;  %v4247_v61 = vcombine.high %v4243_v50, %v4243_v50  ;;  %v4493_v45 = vadd.f32 %v7272_v25, %v6206_v63 }
 0x76b   : > { %3917 = vst.msk [vmem:[%s5859_s7 + $0xed] sm:$0x1] %vm903_vm9, %v3901_v15  ;;  %4042 = vrot.lane.b32.xlu1 %v4021_v55, %s5486_s5  ;;  %v4361_v23 = vrot.slane %v4347_v43, %v5846_v58  ;;  %v4384_v47 = vrot.slane %v4362_v56, %v5846_v58  ;;  %v4392_v1 = vcombine.high %v4370_v22, %v4370_v22 }
 0x76c   : > { %v4399_v60 = vrot.slane %v4370_v22, %v5953_v44  ;;  %v4279_v6 = vrot.slane %v4247_v61, %v5953_v44  ;;  %v4502_v12 = vrot.slane %v4493_v45, %v5846_v58  ;;  %v4495_v25 = vcombine.high %v4493_v45, %v4493_v45 }
 0x76d   : > { %4044 = vrot.lane.b32.xlu0 %v4025_v38, %s5486_s5  ;;  %v4363_v24 = vcombine.high %v4361_v23, %v4361_v23  ;;  %v4377_v3 = vrot.slane %v4361_v23, %v5846_v58  ;;  %v4394_v4 = vcombine.high %v4384_v47, %v4384_v47  ;;  %v4403_v10 = vrot.slane %v4384_v47, %v5953_v44 }
 0x76e   : > { %v4407_v29 = vrot.slane %v4392_v1, %v5953_v44  ;;  %v4510_v5 = vcombine.high %v4502_v12, %v4502_v12  ;;  %v4518_v19 = vrot.slane %v4502_v12, %v5846_v58  ;;  %v4509_v21 = vrot.slane %v4495_v25, %v5846_v58 }
 0x76f   : > { %4046 = vrot.lane.b32.xlu1 %v4029_v35, %s5486_s5  ;;  %v4391_v54 = vrot.slane %v4363_v24, %v5846_v58  ;;  %v4393_v11 = vcombine.high %v4377_v3, %v4377_v3  ;;  %v4411_v39 = vrot.slane %v4394_v4, %v5953_v44  ;;  %v4415_v63 = vrot.slane %v4377_v3, %v5953_v44 }
 0x770   : > { %v4532_v28 = vrot.slane %v4510_v5, %v5846_v58  ;;  %v4540_v18 = vcombine.high %v4518_v19, %v4518_v19  ;;  %v4547_v41 = vrot.slane %v4518_v19, %v5953_v44  ;;  %v4511_v55 = vcombine.high %v4509_v21, %v4509_v21 }
 0x771   : > { %4048 = vrot.lane.b32.xlu0 %v4033_v7, %s5486_s5  ;;  %v4419_v20 = vrot.slane %v4391_v54, %v5953_v44  ;;  %v4423_v48 = vrot.slane %v4393_v11, %v5953_v44  ;;  %v4395_v15 = vcombine.high %v4391_v54, %v4391_v54  ;;  %v4739_v8 = vadd.f32 %v7276_v13, %v6316_v34 }
 0x772   : > { %v4525_v42 = vrot.slane %v4509_v21, %v5846_v58  ;;  %v4542_v0 = vcombine.high %v4532_v28, %v4532_v28  ;;  %v4551_v38 = vrot.slane %v4532_v28, %v5953_v44  ;;  %v4555_v32 = vrot.slane %v4540_v18, %v5953_v44 }
 0x773   : > { %4280 = vrot.lane.b32.xlu1 %v4251_v46, %s5485_s30  ;;  %v4427_v33 = vrot.slane %v4395_v15, %v5953_v44  ;;  %v4748_v30 = vrot.slane %v4739_v8, %v5846_v58  ;;  %v4539_v35 = vrot.slane %v4511_v55, %v5846_v58  ;;  %v4741_v9 = vcombine.high %v4739_v8, %v4739_v8 }
 0x774   : > { %v4541_v16 = vcombine.high %v4525_v42, %v4525_v42  ;;  %v4559_v49 = vrot.slane %v4542_v0, %v5953_v44  ;;  %v4563_v13 = vrot.slane %v4525_v42, %v5953_v44  ;;  %v4887_v52 = vadd.f32 %v7278_v53, %v6316_v34 }
 0x775   : > { %4282 = vrot.lane.b32.xlu0 %v4255_v57, %s5485_s30  ;;  %v4756_v36 = vcombine.high %v4748_v30, %v4748_v30  ;;  %v4764_v46 = vrot.slane %v4748_v30, %v5846_v58  ;;  %v4567_v7 = vrot.slane %v4539_v35, %v5953_v44  ;;  %v4543_v2 = vcombine.high %v4539_v35, %v4539_v35 }
 0x776   : > { %v4571_v51 = vrot.slane %v4541_v16, %v5953_v44  ;;  %v4755_v37 = vrot.slane %v4741_v9, %v5846_v58  ;;  %v4896_v22 = vrot.slane %v4887_v52, %v5846_v58  ;;  %v4889_v23 = vcombine.high %v4887_v52, %v4887_v52 }
 0x777   : > { %4284 = vrot.lane.b32.xlu1 %v4259_v40, %s5485_s30  ;;  %v4778_v27 = vrot.slane %v4756_v36, %v5846_v58  ;;  %v4786_v57 = vcombine.high %v4764_v46, %v4764_v46  ;;  %v4793_v40 = vrot.slane %v4764_v46, %v5953_v44  ;;  %v4575_v59 = vrot.slane %v4543_v2, %v5953_v44 }
 0x778   : > { %v4757_v50 = vcombine.high %v4755_v37, %v4755_v37  ;;  %v4904_v47 = vcombine.high %v4896_v22, %v4896_v22  ;;  %v4912_v1 = vrot.slane %v4896_v22, %v5846_v58  ;;  %v4903_v45 = vrot.slane %v4889_v23, %v5846_v58 }
 0x779   : > { %4286 = vrot.lane.b32.xlu0 %v4263_v31, %s5485_s30  ;;  %v4771_v31 = vrot.slane %v4755_v37, %v5846_v58  ;;  %v4797_v43 = vrot.slane %v4778_v27, %v5953_v44  ;;  %v4801_v56 = vrot.slane %v4786_v57, %v5953_v44  ;;  %v5035_v54 = vadd.f32 %v7282_v14, %v6316_v34 }
 0x77a   : > { %v4926_v3 = vrot.slane %v4904_v47, %v5846_v58  ;;  %v4934_v4 = vcombine.high %v4912_v1, %v4912_v1  ;;  %v4905_v12 = vcombine.high %v4903_v45, %v4903_v45  ;;  %v4919_v11 = vrot.slane %v4903_v45, %v5846_v58 }
 0x77b   : > { %4288 = vrot.lane.b32.xlu1 %v4267_v26, %s5485_s30  ;;  %v4788_v26 = vcombine.high %v4778_v27, %v4778_v27  ;;  %v4809_v53 = vrot.slane %v4771_v31, %v5953_v44  ;;  %v5044_v5 = vrot.slane %v5035_v54, %v5846_v58  ;;  %v5037_v14 = vcombine.high %v5035_v54, %v5035_v54 }
 0x77c   : > { %v4949_v25 = vrot.slane %v4934_v4, %v5953_v44  ;;  %v4933_v19 = vrot.slane %v4905_v12, %v5846_v58  ;;  %v4957_v34 = vrot.slane %v4919_v11, %v5953_v44 }
 0x77d   : > { %4290 = vrot.lane.b32.xlu0 %v4271_v62, %s5485_s30  ;;  %v4785_v62 = vrot.slane %v4757_v50, %v5846_v58  ;;  %v4805_v61 = vrot.slane %v4788_v26, %v5953_v44  ;;  %v5052_v15 = vcombine.high %v5044_v5, %v5044_v5  ;;  %v5060_v21 = vrot.slane %v5044_v5, %v5846_v58 }
 0x77e   : > { %v4961_v28 = vrot.slane %v4933_v19, %v5953_v44 }
 0x77f   : > { %4292 = vrot.lane.b32.xlu1 %v4275_v17, %s5485_s30  ;;  %v4787_v17 = vcombine.high %v4771_v31, %v4771_v31  ;;  %v4789_v24 = vcombine.high %v4785_v62, %v4785_v62  ;;  %v5074_v55 = vrot.slane %v5052_v15, %v5846_v58  ;;  %v5082_v8 = vcombine.high %v5060_v21, %v5060_v21 }
 0x780   : > { %v5089_v42 = vrot.slane %v5060_v21, %v5953_v44 }
 0x781   : > { %4294 = vrot.lane.b32.xlu0 %v4279_v6, %s5485_s30  ;;  %v4817_v6 = vrot.slane %v4787_v17, %v5953_v44  ;;  %v5084_v30 = vcombine.high %v5074_v55, %v5074_v55  ;;  %v5093_v35 = vrot.slane %v5074_v55, %v5953_v44  ;;  %v5097_v16 = vrot.slane %v5082_v8, %v5953_v44 }
 0x783   : > { %4428 = vrot.lane.b32.xlu1 %v4399_v60, %s5487_s6  ;;  %v4813_v60 = vrot.slane %v4785_v62, %v5953_v44  ;;  %v5101_v9 = vrot.slane %v5084_v30, %v5953_v44 }
 0x785   : > { %4430 = vrot.lane.b32.xlu0 %v4403_v10, %s5487_s6  ;;  %v4941_v10 = vrot.slane %v4912_v1, %v5953_v44 }
 0x787   : > { %4432 = vrot.lane.b32.xlu1 %v4407_v29, %s5487_s6  ;;  %v4821_v29 = vrot.slane %v4789_v24, %v5953_v44 }
 0x789   : > { %4434 = vrot.lane.b32.xlu0 %v4411_v39, %s5487_s6  ;;  %v4936_v39 = vcombine.high %v4926_v3, %v4926_v3 }
 0x78b   : > { %4436 = vrot.lane.b32.xlu1 %v4415_v63, %s5487_s6  ;;  %v4945_v63 = vrot.slane %v4926_v3, %v5953_v44 }
 0x78d   : > { %4438 = vrot.lane.b32.xlu0 %v4419_v20, %s5487_s6  ;;  %v4935_v20 = vcombine.high %v4919_v11, %v4919_v11 }
 0x78f   : > { %4440 = vrot.lane.b32.xlu1 %v4423_v48, %s5487_s6  ;;  %v4953_v48 = vrot.slane %v4936_v39, %v5953_v44  ;;  %v4965_v18 = vrot.slane %v4935_v20, %v5953_v44 }
 0x791   : > { %4442 = vrot.lane.b32.xlu0 %v4427_v33, %s5487_s6  ;;  %v5051_v33 = vrot.slane %v5037_v14, %v5846_v58 }
 0x793   : > { %4576 = vrot.lane.b32.xlu1 %v4547_v41, %s5486_s5  ;;  %v4937_v41 = vcombine.high %v4933_v19, %v4933_v19 }
 0x795   : > { %4578 = vrot.lane.b32.xlu0 %v4551_v38, %s5486_s5  ;;  %v4969_v0 = vrot.slane %v4937_v41, %v5953_v44  ;;  %v5053_v38 = vcombine.high %v5051_v33, %v5051_v33 }
 0x797   : > { %4580 = vrot.lane.b32.xlu1 %v4555_v32, %s5486_s5  ;;  %v5067_v32 = vrot.slane %v5051_v33, %v5846_v58 }
 0x799   : > { %4582 = vrot.lane.b32.xlu0 %v4559_v49, %s5486_s5  ;;  %v5081_v49 = vrot.slane %v5053_v38, %v5846_v58  ;;  %v5105_v36 = vrot.slane %v5067_v32, %v5953_v44 }
 0x79b   : > { %4584 = vrot.lane.b32.xlu1 %v4563_v13, %s5486_s5  ;;  %v5083_v13 = vcombine.high %v5067_v32, %v5067_v32  ;;  %v5109_v46 = vrot.slane %v5081_v49, %v5953_v44 }
 0x79d   : > { %4586 = vrot.lane.b32.xlu0 %v4567_v7, %s5486_s5  ;;  %v5113_v7 = vrot.slane %v5083_v13, %v5953_v44 }
 0x79f   : > { %4588 = vrot.lane.b32.xlu1 %v4571_v51, %s5486_s5  ;;  %v5085_v51 = vcombine.high %v5081_v49, %v5081_v49 }
 0x7a1   : > { %4590 = vrot.lane.b32.xlu0 %v4575_v59, %s5486_s5  ;;  %v5117_v2 = vrot.slane %v5085_v51, %v5953_v44 }
 0x7a3   : > { %4822 = vrot.lane.b32.xlu1 %v4793_v40, %s5485_s30 }
 0x7a5   : > { %4824 = vrot.lane.b32.xlu0 %v4797_v43, %s5485_s30 }
 0x7a7   : > { %4826 = vrot.lane.b32.xlu1 %v4801_v56, %s5485_s30 }
 0x7a9   : > { %4828 = vrot.lane.b32.xlu0 %v4805_v61, %s5485_s30 }
 0x7ab   : > { %4830 = vrot.lane.b32.xlu1 %v4809_v53, %s5485_s30 }
 0x7ad   : > { %4832 = vrot.lane.b32.xlu0 %v4813_v60, %s5485_s30 }
 0x7af   : > { %4834 = vrot.lane.b32.xlu1 %v4817_v6, %s5485_s30 }
 0x7b1   : > { %4836 = vrot.lane.b32.xlu0 %v4821_v29, %s5485_s30 }
 0x7b3   : > { %4970 = vrot.lane.b32.xlu1 %v4941_v10, %s5487_s6 }
 0x7b5   : > { %4972 = vrot.lane.b32.xlu0 %v4945_v63, %s5487_s6 }
 0x7b7   : > { %4974 = vrot.lane.b32.xlu1 %v4949_v25, %s5487_s6 }
 0x7b9   : > { %4976 = vrot.lane.b32.xlu0 %v4953_v48, %s5487_s6 }
 0x7bb   : > { %4978 = vrot.lane.b32.xlu1 %v4957_v34, %s5487_s6 }
 0x7bd   : > { %4980 = vrot.lane.b32.xlu0 %v4961_v28, %s5487_s6 }
 0x7bf   : > { %4982 = vrot.lane.b32.xlu1 %v4965_v18, %s5487_s6 }
 0x7c1   : > { %4984 = vrot.lane.b32.xlu0 %v4969_v0, %s5487_s6 }
 0x7c3   : > { %5118 = vrot.lane.b32.xlu1 %v5089_v42, %s5486_s5 }
 0x7c5   : > { %5120 = vrot.lane.b32.xlu0 %v5093_v35, %s5486_s5 }
 0x7c7   : > { %5122 = vrot.lane.b32.xlu1 %v5097_v16, %s5486_s5 }
 0x7c9   : > { %5124 = vrot.lane.b32.xlu0 %v5101_v9, %s5486_s5 }
 0x7cb   : > { %5126 = vrot.lane.b32.xlu1 %v5105_v36, %s5486_s5 }
 0x7cd   : > { %5128 = vrot.lane.b32.xlu0 %v5109_v46, %s5486_s5 }
 0x7cf   : > { %5130 = vrot.lane.b32.xlu1 %v5113_v7, %s5486_s5 }
 0x7d1   : > { %5132 = vrot.lane.b32.xlu0 %v5117_v2, %s5486_s5 }
 0x7d5   : > { %v4035_v58 = vpop.permute.xlu1 %4034 }
 0x7d6   : > { %4058 = vst.msk [vmem:[%s5859_s7 + $0xf] sm:$0x1] %vm903_vm9, %v4035_v58 }
 0x7d7   : > { %v4037_v37 = vpop.permute.xlu0 %4036 }
 0x7d8   : > { %4059 = vst.msk [vmem:[%s5859_s7 + $0x2f] sm:$0x1] %vm903_vm9, %v4037_v37 }
 0x7d9   : > { %v4039_v27 = vpop.permute.xlu1 %4038 }
 0x7da   : > { %4060 = vst.msk [vmem:[%s5859_s7 + $0x4f] sm:$0x1] %vm903_vm9, %v4039_v27 }
 0x7db   : > { %v4041_v57 = vpop.permute.xlu0 %4040 }
 0x7dc   : > { %4061 = vst.msk [vmem:[%s5859_s7 + $0x6f] sm:$0x1] %vm903_vm9, %v4041_v57 }
 0x7dd   : > { %v4043_v40 = vpop.permute.xlu1 %4042 }
 0x7de   : > { %4062 = vst.msk [vmem:[%s5859_s7 + $0x8f] sm:$0x1] %vm903_vm9, %v4043_v40 }
 0x7df   : > { %v4045_v44 = vpop.permute.xlu0 %4044 }
 0x7e0   : > { %4063 = vst.msk [vmem:[%s5859_s7 + $0xaf] sm:$0x1] %vm903_vm9, %v4045_v44 }
 0x7e1   : > { %v4047_v59 = vpop.permute.xlu1 %4046 }
 0x7e2   : > { %4064 = vst.msk [vmem:[%s5859_s7 + $0xcf] sm:$0x1] %vm903_vm9, %v4047_v59 }
 0x7e3   : > { %v4049_v50 = vpop.permute.xlu0 %4048 }
 0x7e4   : > { %4065 = vst.msk [vmem:[%s5859_s7 + $0xef] sm:$0x1] %vm903_vm9, %v4049_v50 }
 0x7e5   : > { %v4281_v52 = vpop.permute.xlu1 %4280 }
 0x7e6   : > { %4304 = vst.msk [vmem:[%s5859_s7 + $0x13] sm:$0x1] %vm903_vm9, %v4281_v52 }
 0x7e7   : > { %v4283_v31 = vpop.permute.xlu0 %4282 }
 0x7e8   : > { %4305 = vst.msk [vmem:[%s5859_s7 + $0x33] sm:$0x1] %vm903_vm9, %v4283_v31 }
 0x7e9   : > { %v4285_v26 = vpop.permute.xlu1 %4284 }
 0x7ea   : > { %4306 = vst.msk [vmem:[%s5859_s7 + $0x53] sm:$0x1] %vm903_vm9, %v4285_v26 }
 0x7eb   : > { %v4287_v43 = vpop.permute.xlu0 %4286 }
 0x7ec   : > { %4307 = vst.msk [vmem:[%s5859_s7 + $0x73] sm:$0x1] %vm903_vm9, %v4287_v43 }
 0x7ed   : > { %v4289_v56 = vpop.permute.xlu1 %4288 }
 0x7ee   : > { %4308 = vst.msk [vmem:[%s5859_s7 + $0x93] sm:$0x1] %vm903_vm9, %v4289_v56 }
 0x7ef   : > { %v4291_v22 = vpop.permute.xlu0 %4290 }
 0x7f0   : > { %4309 = vst.msk [vmem:[%s5859_s7 + $0xb3] sm:$0x1] %vm903_vm9, %v4291_v22 }
 0x7f1   : > { %v4293_v62 = vpop.permute.xlu1 %4292 }
 0x7f2   : > { %4310 = vst.msk [vmem:[%s5859_s7 + $0xd3] sm:$0x1] %vm903_vm9, %v4293_v62 }
 0x7f3   : > { %v4295_v17 = vpop.permute.xlu0 %4294 }
 0x7f4   : > { %4311 = vst.msk [vmem:[%s5859_s7 + $0xf3] sm:$0x1] %vm903_vm9, %v4295_v17 }
 0x7f5   : > { %v4429_v61 = vpop.permute.xlu1 %4428 }
 0x7f6   : > { %4452 = vst.msk [vmem:[%s5859_s7 + $0x15] sm:$0x1] %vm903_vm9, %v4429_v61 }
 0x7f7   : > { %v4431_v53 = vpop.permute.xlu0 %4430 }
 0x7f8   : > { %4453 = vst.msk [vmem:[%s5859_s7 + $0x35] sm:$0x1] %vm903_vm9, %v4431_v53 }
 0x7f9   : > { %v4433_v23 = vpop.permute.xlu1 %4432 }
 0x7fa   : > { %4454 = vst.msk [vmem:[%s5859_s7 + $0x55] sm:$0x1] %vm903_vm9, %v4433_v23 }
 0x7fb   : > { %v4435_v47 = vpop.permute.xlu0 %4434 }
 0x7fc   : > { %4455 = vst.msk [vmem:[%s5859_s7 + $0x75] sm:$0x1] %vm903_vm9, %v4435_v47 }
 0x7fd   : > { %v4437_v1 = vpop.permute.xlu1 %4436 }
 0x7fe   : > { %4456 = vst.msk [vmem:[%s5859_s7 + $0x95] sm:$0x1] %vm903_vm9, %v4437_v1 }
 0x7ff   : > { %v4439_v60 = vpop.permute.xlu0 %4438 }
 0x800   : > { %4457 = vst.msk [vmem:[%s5859_s7 + $0xb5] sm:$0x1] %vm903_vm9, %v4439_v60 }
 0x801   : > { %v4441_v6 = vpop.permute.xlu1 %4440 }
 0x802   : > { %4458 = vst.msk [vmem:[%s5859_s7 + $0xd5] sm:$0x1] %vm903_vm9, %v4441_v6 }
 0x803   : > { %v4443_v24 = vpop.permute.xlu0 %4442 }
 0x804   : > { %4459 = vst.msk [vmem:[%s5859_s7 + $0xf5] sm:$0x1] %vm903_vm9, %v4443_v24 }
 0x805   : > { %v4577_v45 = vpop.permute.xlu1 %4576 }
 0x806   : > { %4600 = vst.msk [vmem:[%s5859_s7 + $0x17] sm:$0x1] %vm903_vm9, %v4577_v45 }
 0x807   : > { %v4579_v3 = vpop.permute.xlu0 %4578 }
 0x808   : > { %4601 = vst.msk [vmem:[%s5859_s7 + $0x37] sm:$0x1] %vm903_vm9, %v4579_v3 }
 0x809   : > { %v4581_v4 = vpop.permute.xlu1 %4580 }
 0x80a   : > { %4602 = vst.msk [vmem:[%s5859_s7 + $0x57] sm:$0x1] %vm903_vm9, %v4581_v4 }
 0x80b   : > { %v4583_v10 = vpop.permute.xlu0 %4582 }
 0x80c   : > { %4603 = vst.msk [vmem:[%s5859_s7 + $0x77] sm:$0x1] %vm903_vm9, %v4583_v10 }
 0x80d   : > { %v4585_v29 = vpop.permute.xlu1 %4584 }
 0x80e   : > { %4604 = vst.msk [vmem:[%s5859_s7 + $0x97] sm:$0x1] %vm903_vm9, %v4585_v29 }
 0x80f   : > { %v4587_v12 = vpop.permute.xlu0 %4586 }
 0x810   : > { %4605 = vst.msk [vmem:[%s5859_s7 + $0xb7] sm:$0x1] %vm903_vm9, %v4587_v12 }
 0x811   : > { %v4589_v54 = vpop.permute.xlu1 %4588 }
 0x812   : > { %4606 = vst.msk [vmem:[%s5859_s7 + $0xd7] sm:$0x1] %vm903_vm9, %v4589_v54 }
 0x813   : > { %v4591_v11 = vpop.permute.xlu0 %4590 }
 0x814   : > { %4607 = vst.msk [vmem:[%s5859_s7 + $0xf7] sm:$0x1] %vm903_vm9, %v4591_v11 }
 0x815   : > { %v4823_v39 = vpop.permute.xlu1 %4822 }
 0x816   : > { %4846 = vst.msk [vmem:[%s5859_s7 + $0x1b] sm:$0x1] %vm903_vm9, %v4823_v39 }
 0x817   : > { %v4825_v63 = vpop.permute.xlu0 %4824 }
 0x818   : > { %4847 = vst.msk [vmem:[%s5859_s7 + $0x3b] sm:$0x1] %vm903_vm9, %v4825_v63 }
 0x819   : > { %v4827_v25 = vpop.permute.xlu1 %4826 }
 0x81a   : > { %4848 = vst.msk [vmem:[%s5859_s7 + $0x5b] sm:$0x1] %vm903_vm9, %v4827_v25 }
 0x81b   : > { %v4829_v5 = vpop.permute.xlu0 %4828 }
 0x81c   : > { %4849 = vst.msk [vmem:[%s5859_s7 + $0x7b] sm:$0x1] %vm903_vm9, %v4829_v5 }
 0x81d   : > { %v4831_v19 = vpop.permute.xlu1 %4830 }
 0x81e   : > { %4850 = vst.msk [vmem:[%s5859_s7 + $0x9b] sm:$0x1] %vm903_vm9, %v4831_v19 }
 0x81f   : > { %v4833_v20 = vpop.permute.xlu0 %4832 }
 0x820   : > { %4851 = vst.msk [vmem:[%s5859_s7 + $0xbb] sm:$0x1] %vm903_vm9, %v4833_v20 }
 0x821   : > { %v4835_v48 = vpop.permute.xlu1 %4834 }
 0x822   : > { %4852 = vst.msk [vmem:[%s5859_s7 + $0xdb] sm:$0x1] %vm903_vm9, %v4835_v48 }
 0x823   : > { %v4837_v34 = vpop.permute.xlu0 %4836 }
 0x824   : > { %4853 = vst.msk [vmem:[%s5859_s7 + $0xfb] sm:$0x1] %vm903_vm9, %v4837_v34 }
 0x825   : > { %v4971_v14 = vpop.permute.xlu1 %4970 }
 0x826   : > { %4994 = vst.msk [vmem:[%s5859_s7 + $0x1d] sm:$0x1] %vm903_vm9, %v4971_v14 }
 0x827   : > { %v4973_v15 = vpop.permute.xlu0 %4972 }
 0x828   : > { %4995 = vst.msk [vmem:[%s5859_s7 + $0x3d] sm:$0x1] %vm903_vm9, %v4973_v15 }
 0x829   : > { %v4975_v21 = vpop.permute.xlu1 %4974 }
 0x82a   : > { %4996 = vst.msk [vmem:[%s5859_s7 + $0x5d] sm:$0x1] %vm903_vm9, %v4975_v21 }
 0x82b   : > { %v4977_v28 = vpop.permute.xlu0 %4976 }
 0x82c   : > { %4997 = vst.msk [vmem:[%s5859_s7 + $0x7d] sm:$0x1] %vm903_vm9, %v4977_v28 }
 0x82d   : > { %v4979_v18 = vpop.permute.xlu1 %4978 }
 0x82e   : > { %4998 = vst.msk [vmem:[%s5859_s7 + $0x9d] sm:$0x1] %vm903_vm9, %v4979_v18 }
 0x82f   : > { %v4981_v41 = vpop.permute.xlu0 %4980 }
 0x830   : > { %4999 = vst.msk [vmem:[%s5859_s7 + $0xbd] sm:$0x1] %vm903_vm9, %v4981_v41 }
 0x831   : > { %v4983_v33 = vpop.permute.xlu1 %4982 }
 0x832   : > { %5000 = vst.msk [vmem:[%s5859_s7 + $0xdd] sm:$0x1] %vm903_vm9, %v4983_v33 }
 0x833   : > { %v4985_v55 = vpop.permute.xlu0 %4984 }
 0x834   : > { %5001 = vst.msk [vmem:[%s5859_s7 + $0xfd] sm:$0x1] %vm903_vm9, %v4985_v55 }
 0x835   : > { %v5119_v8 = vpop.permute.xlu1 %5118 }
 0x836   : > { %5142 = vst.msk [vmem:[%s5859_s7 + $0x1f] sm:$0x1] %vm903_vm9, %v5119_v8 }
 0x837   : > { %v5121_v42 = vpop.permute.xlu0 %5120 }
 0x838   : > { %5143 = vst.msk [vmem:[%s5859_s7 + $0x3f] sm:$0x1] %vm903_vm9, %v5121_v42 }
 0x839   : > { %v5123_v0 = vpop.permute.xlu1 %5122 }
 0x83a   : > { %5144 = vst.msk [vmem:[%s5859_s7 + $0x5f] sm:$0x1] %vm903_vm9, %v5123_v0 }
 0x83b   : > { %v5125_v38 = vpop.permute.xlu0 %5124 }
 0x83c   : > { %5145 = vst.msk [vmem:[%s5859_s7 + $0x7f] sm:$0x1] %vm903_vm9, %v5125_v38 }
 0x83d   : > { %v5127_v32 = vpop.permute.xlu1 %5126 }
 0x83e   : > { %5146 = vst.msk [vmem:[%s5859_s7 + $0x9f] sm:$0x1] %vm903_vm9, %v5127_v32 }
 0x83f   : > { %v5129_v30 = vpop.permute.xlu0 %5128 }
 0x840   : > { %5147 = vst.msk [vmem:[%s5859_s7 + $0xbf] sm:$0x1] %vm903_vm9, %v5129_v30 }
 0x841   : > { %v5131_v35 = vpop.permute.xlu1 %5130 }
 0x842   : > { %5148 = vst.msk [vmem:[%s5859_s7 + $0xdf] sm:$0x1] %vm903_vm9, %v5131_v35 }
 0x843   : > { %v5133_v16 = vpop.permute.xlu0 %5132 }
 0x844   : > { %5149 = vst.msk [vmem:[%s5859_s7 + $0xff] sm:$0x1] %vm903_vm9, %v5133_v16 }
 0x845   : > { %5412 = shalt.err (!%p5409_p7)
}
 0x846   : > { %s5413_s21 = scalar_lea.hbm %s7561_s24, 4096  ;;  %s5417_s30 = scalar_lea.hbm %s7616_s3, 8192 }
 0x847   : > { %p5414_p10 = scmp.ne.s32.totalorder %s7561_s24, %s5413_s21  ;;  %p5418_p2 = scmp.lt.s32.totalorder %s7561_s24, %s7616_s3 }
 0x848   : > { %p5419_p12 = scmp.lt.s32.totalorder %s5417_s30, %s5413_s21 }
 0x849   : > { %p5415_p4 = pnand %p5414_p10, %p5563_p9 }
 0x84a   : > { %p5420_p8 = por %p5419_p12, %p5418_p2 }
 0x84b   : > { %p5416_p13 = pneg %p5415_p4 }
 0x84d   : > { %p5421_p0 = pnand %p5420_p8, %p5416_p13 }
 0x84f   : > { %5424 = shalt.err (!%p5421_p0)
}
 0x850   : > { %s5490_s7 = smov 128   ;;  %s5491_s29 = smov 8  }
 0x851   : > { %5301 = dma.vmem_to_hbm [thread:$0]  (%p5563_p9), %s7563_s4, 4096, %s7561_s24, %s5151_s15, %s5490_s7, %s5490_s7, %s5491_s29  }
 0x852 PF: > { %s5181_s8 = sand.u32 1, %s5459_s12   ;;  %p7622_p1 = scmp.ge.s32.totalorder %s5479_s17, 2 }
 0x853   : > { %s5182_s9 = scalar_lea.sflag [#allocation5], %s5181_s8 }
 0x854   : > { %p5308_p3 = pnand %p7622_p1, %p5570_p11 }
 0x856   : > { %p5309_p5 = pneg %p5308_p3 }
 0x858   : > { %5454 = dma.done.wait (%p5309_p5), %s5182_s9, 4096  }
 0x859   : > { %5456 = vsyncadd (%p5309_p5), %s5182_s9, 4294963200  ;;  %s19_s17 = sadd.s32 1, %s5479_s17   ;;  %s7623_s12 = smov %s5463_s13 }
 0x85a   : > { %p16_p6 = scmp.ge.s32.totalorder %s19_s17, 4   ;;  %s7624_s13 = smov %s5467_s14 }
 0x85b   : > { %s7625_s14 = smov %s5568_s26  ;;  %s7626_s15 = smov %s5475_s16 }
 0x85c   : > { %s7627_s16 = smov %s7629_s20  ;;  %18 = sbr.rel (!%p16_p6) target bundleno = 6 (0x6), region = 143 }
 0x861   :  { %5187 = vsyncpa [#allocation4], 1 }
 0x862   :  { %5189 = vsyncpa [#allocation4 + $0x1], 1 }
 0x863   :  { %5190 = vsyncpa [#allocation5], 1 }
 0x864   :  { %5192 = vsyncpa [#allocation5 + $0x1], 1 }

// kernel: _fallback_forward.1
= control target key start
LH: loop header
LB: loop body
LE: loop exit
PB: predicated region body
PF: predicated region fallthrough
CT: control target
= control target key end

     0   :  { %s479_s9 = smov 0   ;;  %s481_s10 = smov 0   ;;  %s524_s0 = inlined_call_operand.vmem [shape: f32[2,4,256], index: 0, kind: input, shape index: {}]   ;;  %s525_s1 = inlined_call_operand.vmem [shape: f32[32,4], index: 1, kind: input, shape index: {}]   ;;  %s526_s2 = inlined_call_operand.vmem [shape: f32[2,32,256], index: 2, kind: output, shape index: {}]  }
   0x1   :  { %s483_s11 = smov 0  }
   0x2 LB: > { %s24_s12 = sadd.s32 1, %s457_s10  ;;  %p396_p0 = scmp.ge.s32.totalorder %s461_s11, 1  ;;  %s461_s11 = sphi %s483_s11, %s12_s11   ;;  %s457_s10 = sphi %s481_s10, %s528_s10   ;;  %s453_s9 = sphi %s479_s9, %s527_s9  }
   0x3   : > { %p26_p1 = scmp.ge.s32.totalorder %s24_s12, 2  ;;  %p133_p2 = scmp.lt.s32.totalorder %s461_s11, 3 }
   0x5   : > { %s530_s12 = smov (%p26_p1, %s24_s12), 0  ;;  %p134_p3 = pnand %p396_p0, %p133_p2 }
   0x6   : > { %p164_p4 = scmp.lt.s32.totalorder (!%p134_p3), %s453_s9, 1 }
   0x7   : > { %137 = sbr.rel (%p134_p3) target bundleno = 220 (0xdc), region = 28 }
   0xc   : > { %v463_v0 = vmov 0.0   ;;  %s532_s9 = smov (!%p164_p4, %s453_s9), 1  ;;  %vm203_vm0 = vcmask 1043456   ;;  %v183_v3 = vld [vmem:[%s525_s1] sm:$0xff]  ;;  %vm190_vm1 = vcmask 31744   ;;  %v185_v4 = vld [vmem:[%s525_s1 + $0x10] sm:$0xff] }
   0xd   : > { %272 = vmatprep.mubr.f32.mxu0 %v463_v0  ;;  %284 = vmatprep.mubr.f32.mxu1 %v463_v0  ;;  %s409_s13 = sshll.u32 %s532_s9, 3  ;;  %v184_v5 = vld [vmem:[%s525_s1 + $0x8] sm:$0xff]  ;;  %v186_v6 = vld [vmem:[%s525_s1 + $0x18] sm:$0xff]  ;;  %s410_s25 = sshll.u32 %s532_s9, 6 }
   0xe   : > { %s171_s16 = scalar_lea.vmem %s524_s0, %s409_s13  ;;  %s181_s28 = scalar_lea.vmem %s526_s2, %s410_s25 }
   0xf   : > { %v187_v1 = vld [vmem:[%s171_s16] sm:$0xff] }
  0x10   : > { %v189_v2 = vcombine.high %v187_v1, %v187_v1 }
  0x12   : > { %401 = vmatprep.subr.msk.mxu0 %vm203_vm0, %v189_v2  ;;  %411 = vmatprep.subr.msk.mxu1 %vm203_vm0, %v189_v2 }
  0x13   : > { %402 = vmatpush1.msk.msra.mxu0 %vm203_vm0, %v187_v1  ;;  %412 = vmatpush1.msk.msra.mxu1 %vm203_vm0, %v187_v1 }
  0x14   : > { %403 = vmatmul.mubr.msk.f32.vlgmr.msra.gmra.mxu0 %vm190_vm1, %v183_v3  ;;  %405 = vmatmul.mubr.msk.f32.vlgmr.msra.gmra.mxu1 %vm190_vm1, %v185_v4 }
  0x15   : > { %278 = vmatprep.mubr.f32.mxu0 %v463_v0  ;;  %290 = vmatprep.mubr.f32.mxu1 %v463_v0 }
  0x18   : > { %404 = vmatmul.mubr.msk.f32.gmra.mxu0 %vm190_vm1, %v184_v5  ;;  %406 = vmatmul.mubr.msk.f32.gmra.mxu1 %vm190_vm1, %v186_v6 }
  0xd4   : > { %v274_v7 = vpop.f32.mrf.mxu0  ;;  %v286_v8 = vpop.f32.mrf.mxu1 }
  0xd5   : > { %297 = vst [vmem:[%s181_s28] sm:$0xff] %v274_v7  ;;  %301 = vst [vmem:[%s181_s28 + $0x20] sm:$0xff] %v286_v8 }
  0xd6   : > { %v276_v9 = vpop.f32.mrf.mxu0  ;;  %v288_v10 = vpop.f32.mrf.mxu1 }
  0xd7   : > { %298 = vst [vmem:[%s181_s28 + $0x8] sm:$0xff] %v276_v9  ;;  %302 = vst [vmem:[%s181_s28 + $0x28] sm:$0xff] %v288_v10 }
  0xd8   : > { %v280_v11 = vpop.f32.mrf.mxu0  ;;  %v292_v12 = vpop.f32.mrf.mxu1 }
  0xd9   : > { %299 = vst [vmem:[%s181_s28 + $0x10] sm:$0xff] %v280_v11  ;;  %303 = vst [vmem:[%s181_s28 + $0x30] sm:$0xff] %v292_v12 }
  0xda   : > { %v282_v13 = vpop.f32.mrf.mxu0  ;;  %v294_v14 = vpop.f32.mrf.mxu1 }
  0xdb   : > { %300 = vst [vmem:[%s181_s28 + $0x18] sm:$0xff] %v282_v13  ;;  %304 = vst [vmem:[%s181_s28 + $0x38] sm:$0xff] %v294_v14 }
  0xdc PF: > { %s12_s11 = sadd.s32 1, %s461_s11   ;;  %s527_s9 = smov %s457_s10 }
  0xdd   : > { %p9_p5 = scmp.ge.s32.totalorder %s12_s11, 4   ;;  %s528_s10 = smov %s530_s12 }
  0xdf   :  { %11 = sbr.rel (!%p9_p5) target bundleno = 2 (0x2), region = 58 }

</bundles_post_ra>
